<compile_context>
chip_gen: v7x
topology: tpu7x:2x2x1
jax: 0.10.0
libtpu: 0.0.40
codegen_flags: <defaults>
</compile_context>

<pallas_src>
import functools

import jax
import jax.numpy as jnp
from jax import lax
from jax.experimental import pallas as pl
from jax.experimental.pallas import tpu as pltpu


def _round_up(x, m):
    return (x + m - 1) // m * m


# ----------------------------- Pallas kernel ------------------------------ #

def _birnn_gru_kernel(x_f_ref, x_b_ref, h0_ref,
                      wih_f_ref, whh_f_ref, bihc_f_ref, bhhn_f_ref,
                      wih_b_ref, whh_b_ref, bihc_b_ref, bhhn_b_ref,
                      out_f_ref, out_b_ref, hT_ref,
                      hf_sc, hb_sc, gxf_sc, gxb_sc,
                      *, T, T_pad, Hp, mask_pad):
    """One grid step = one chunk of C timesteps, both directions interleaved.

    Grid axis 0 (size nc) is sequential ("arbitrary"): the forward carry walks
    chunks 0..nc-1, the backward carry walks chunks nc-1..0 (x_b / out_b use a
    reversed index_map), so both carries advance with the grid.
    """
    c = pl.program_id(0)
    C, Bp, Ep = x_f_ref.shape

    @pl.when(c == 0)
    def _init():
        hf_sc[...] = h0_ref[0].astype(jnp.float32)
        hb_sc[...] = h0_ref[1].astype(jnp.float32)

    # ---- Hoisted input projection: one GEMM per chunk per direction ------- #
    # bihc = b_ih + b_hh[r,z gates] (folded in wrapper); n-gate b_hh is kept
    # separate because PyTorch applies it inside r * (W_hn h + b_hn).
    xf = x_f_ref[...].reshape(C * Bp, Ep)
    xb = x_b_ref[...].reshape(C * Bp, Ep)
    gxf_sc[...] = (jnp.dot(xf, wih_f_ref[...], preferred_element_type=jnp.float32)
                   + bihc_f_ref[...]).reshape(C, Bp, 3 * Hp)
    gxb_sc[...] = (jnp.dot(xb, wih_b_ref[...], preferred_element_type=jnp.float32)
                   + bihc_b_ref[...]).reshape(C, Bp, 3 * Hp)

    whh_f = whh_f_ref[...]
    whh_b = whh_b_ref[...]
    # Hoisted broadcasts (JAX does not CSE broadcast_in_dim inside the loop).
    bhhn_f = jnp.broadcast_to(bhhn_f_ref[...], (Bp, Hp))
    bhhn_b = jnp.broadcast_to(bhhn_b_ref[...], (Bp, Hp))

    def gru_cell(gx, h, whh, bhh_n):
        # gx: (Bp, 3Hp) precomputed x @ W_ih + b_ih (+ b_hh for r,z); h: (Bp, Hp)
        gh = jnp.dot(h, whh, preferred_element_type=jnp.float32)
        r = jax.nn.sigmoid(gx[:, 0:Hp] + gh[:, 0:Hp])
        z = jax.nn.sigmoid(gx[:, Hp:2 * Hp] + gh[:, Hp:2 * Hp])
        n = jnp.tanh(gx[:, 2 * Hp:3 * Hp] + r * (gh[:, 2 * Hp:3 * Hp] + bhh_n))
        return (1.0 - z) * n + z * h

    def step(i, _):
        hf = hf_sc[...]
        hb = hb_sc[...]

        hf_new = gru_cell(gxf_sc[i], hf, whh_f, bhhn_f)
        hb_new = gru_cell(gxb_sc[C - 1 - i], hb, whh_b, bhhn_b)

        if mask_pad:
            # Mask T-padding steps so carried hidden states stay correct.
            t_f = c * C + i            # global forward timestep
            hf_new = jnp.where(t_f < T, hf_new, hf)
            hb_new = jnp.where(t_f >= (T_pad - T), hb_new, hb)

        hf_sc[...] = hf_new
        hb_sc[...] = hb_new
        out_f_ref[i] = hf_new.astype(out_f_ref.dtype)
        out_b_ref[C - 1 - i] = hb_new.astype(out_b_ref.dtype)
        return 0

    lax.fori_loop(0, C, step, 0, unroll=True)

    # Final hidden states: hT block is resident (constant index map); write once.
    @pl.when(c == pl.num_programs(0) - 1)
    def _finalize():
        hT_ref[0] = hf_sc[...].astype(hT_ref.dtype)
        hT_ref[1] = hb_sc[...].astype(hT_ref.dtype)


# ------------------------------ JAX wrapper -------------------------------- #

def init_params(key, input_size, embed_size, hidden_size, padding_index=1):
    """Deterministic parameter init mirroring nn.Embedding + nn.GRU shapes."""
    keys = jax.random.split(key, 9)
    emb = jax.random.normal(keys[0], (input_size, embed_size), jnp.float32)
    emb = emb.at[padding_index].set(0.0)  # padding_idx row is zero
    bound = 1.0 / jnp.sqrt(jnp.float32(hidden_size))

    def u(kk, shape):
        return jax.random.uniform(kk, shape, jnp.float32, -bound, bound)

    return dict(
        embedding=emb,
        w_ih_f=u(keys[1], (3 * hidden_size, embed_size)),
        w_hh_f=u(keys[2], (3 * hidden_size, hidden_size)),
        b_ih_f=u(keys[3], (3 * hidden_size,)),
        b_hh_f=u(keys[4], (3 * hidden_size,)),
        w_ih_b=u(keys[5], (3 * hidden_size, embed_size)),
        w_hh_b=u(keys[6], (3 * hidden_size, hidden_size)),
        b_ih_b=u(keys[7], (3 * hidden_size,)),
        b_hh_b=u(keys[8], (3 * hidden_size,)),
    )


def birnn_encoder(params, tokens, hidden=None, *, chunk=8):
    """Forward pass of BiRNNEncoder.

    tokens: (T,) or (T, B) int32. hidden: None or (2, H) / (2, B, H).
    Returns (output, hidden) matching the PyTorch module's shapes.
    """
    tokens = jnp.asarray(tokens).astype(jnp.int32)
    unbatched = tokens.ndim == 1
    if unbatched:
        tokens = tokens[:, None]
        if hidden is not None:
            hidden = hidden[:, None, :]

    T, B = tokens.shape
    V, E = params["embedding"].shape
    H = params["w_hh_f"].shape[1]

    # Lane / sublane friendly padded sizes.
    Hp = _round_up(H, 128)
    Ep = _round_up(E, 128)
    Bp = _round_up(max(B, 8), 8)
    C = max(1, chunk)
    nc = -(-T // C)
    T_pad = nc * C

    # Glue: embedding gather straight into the padded layout.
    # Padded (time/batch) positions use token 0; their values never reach the
    # sliced output because hidden updates on padded timesteps are masked.
    emb_p = jnp.zeros((V, Ep), jnp.float32).at[:, :E].set(
        params["embedding"].astype(jnp.float32))
    tok_p = jnp.zeros((T_pad, Bp), jnp.int32).at[:T, :B].set(tokens)
    x = jnp.take(emb_p, tok_p, axis=0)                       # (T_pad, Bp, Ep)

    if hidden is None:
        h0 = jnp.zeros((2, Bp, Hp), jnp.float32)
    else:
        h0 = jnp.zeros((2, Bp, Hp), jnp.float32).at[:, :B, :H].set(
            hidden.astype(jnp.float32))

    def pad_gates(w_t, rows, rows_pad):
        # w_t: (rows, 3H) with gate layout [r|z|n]; -> (rows_pad, 3*Hp),
        # each gate placed in its own lane-aligned Hp-wide slab.
        out = jnp.zeros((rows_pad, 3 * Hp), jnp.float32)
        for g in range(3):
            out = out.at[:rows, g * Hp:g * Hp + H].set(w_t[:, g * H:(g + 1) * H])
        return out

    def fold_bias(b_ih, b_hh):
        # b_hh for r and z gates can be folded into the input-side bias; the
        # n-gate b_hh must stay inside r * (W_hn h + b_hn).
        return b_ih.at[:2 * H].add(b_hh[:2 * H])

    def pad_bhh_n(b_hh):
        return jnp.zeros((1, Hp), jnp.float32).at[0, :H].set(b_hh[2 * H:])

    wih_f = pad_gates(params["w_ih_f"].T, E, Ep)
    whh_f = pad_gates(params["w_hh_f"].T, H, Hp)
    wih_b = pad_gates(params["w_ih_b"].T, E, Ep)
    whh_b = pad_gates(params["w_hh_b"].T, H, Hp)
    bihc_f = pad_gates(fold_bias(params["b_ih_f"], params["b_hh_f"])[None, :], 1, 1)
    bihc_b = pad_gates(fold_bias(params["b_ih_b"], params["b_hh_b"])[None, :], 1, 1)
    bhhn_f = pad_bhh_n(params["b_hh_f"])
    bhhn_b = pad_bhh_n(params["b_hh_b"])

    const2 = lambda shape: pl.BlockSpec(shape, lambda c: (0, 0))
    const3 = lambda shape: pl.BlockSpec(shape, lambda c: (0, 0, 0))

    in_specs = [
        pl.BlockSpec((C, Bp, Ep), lambda c: (c, 0, 0)),             # x, fwd chunks
        pl.BlockSpec((C, Bp, Ep), lambda c: (nc - 1 - c, 0, 0)),    # x, bwd chunks
        const3((2, Bp, Hp)),                                        # h0 (resident)
        const2((Ep, 3 * Hp)), const2((Hp, 3 * Hp)),                 # fwd W_ih, W_hh
        const2((1, 3 * Hp)), const2((1, Hp)),                       # fwd biases
        const2((Ep, 3 * Hp)), const2((Hp, 3 * Hp)),                 # bwd W_ih, W_hh
        const2((1, 3 * Hp)), const2((1, Hp)),                       # bwd biases
    ]
    out_specs = (
        pl.BlockSpec((C, Bp, Hp), lambda c: (c, 0, 0)),             # out_fwd
        pl.BlockSpec((C, Bp, Hp), lambda c: (nc - 1 - c, 0, 0)),    # out_bwd
        const3((2, Bp, Hp)),                                        # hT
    )
    out_shape = (
        jax.ShapeDtypeStruct((T_pad, Bp, Hp), jnp.float32),
        jax.ShapeDtypeStruct((T_pad, Bp, Hp), jnp.float32),
        jax.ShapeDtypeStruct((2, Bp, Hp), jnp.float32),
    )
    scratch_shapes = [
        pltpu.VMEM((Bp, Hp), jnp.float32),          # h_fwd carry
        pltpu.VMEM((Bp, Hp), jnp.float32),          # h_bwd carry
        pltpu.VMEM((C, Bp, 3 * Hp), jnp.float32),   # gx_fwd for current chunk
        pltpu.VMEM((C, Bp, 3 * Hp), jnp.float32),   # gx_bwd for current chunk
    ]

    # Explicit scoped-VMEM budget: double-buffered chunk I/O + resident weights
    # + scratch, with headroom.
    est_bytes = 4 * (
        2 * 2 * C * Bp * (Ep + Hp)              # x / out chunks, both dirs, 2-buffered
        + 2 * 2 * (Ep + Hp) * 3 * Hp            # W_ih / W_hh, both dirs (safety x2)
        + 2 * 4 * 8 * 4 * Hp                    # biases (sublane-padded)
        + 4 * 2 * Bp * Hp                       # h0 / hT
        + 2 * Bp * Hp + 2 * C * Bp * 3 * Hp     # scratch
    )
    vmem_limit = min(max(2 * est_bytes, 4 << 20), 64 << 20)

    kernel = functools.partial(_birnn_gru_kernel, T=T, T_pad=T_pad, Hp=Hp,
                               mask_pad=(T_pad != T))

    out_f, out_b, hT = pl.pallas_call(
        kernel,
        out_shape=out_shape,
        grid_spec=pltpu.PrefetchScalarGridSpec(
            num_scalar_prefetch=0,
            grid=(nc,),
            in_specs=in_specs,
            out_specs=out_specs,
            scratch_shapes=scratch_shapes,
        ),
        compiler_params=pltpu.CompilerParams(
            dimension_semantics=("arbitrary",),
            vmem_limit_bytes=int(vmem_limit),
        ),
    )(x, x, h0, wih_f, whh_f, bihc_f, bhhn_f, wih_b, whh_b, bihc_b, bhhn_b)

    out = jnp.concatenate([out_f[:T, :B, :H], out_b[:T, :B, :H]], axis=-1)
    hT = hT[:, :B, :H]
    if unbatched:
        out = out[:, 0, :]
        hT = hT[:, 0, :]
    return out, hT


# --------------------------- pure-JAX reference ---------------------------- #

def _ref_gru_step(x_t, h, w_ih, w_hh, b_ih, b_hh):
    H = h.shape[-1]
    gx = x_t @ w_ih.T + b_ih
    gh = h @ w_hh.T + b_hh
    r = jax.nn.sigmoid(gx[:, :H] + gh[:, :H])
    z = jax.nn.sigmoid(gx[:, H:2 * H] + gh[:, H:2 * H])
    n = jnp.tanh(gx[:, 2 * H:] + r * gh[:, 2 * H:])
    return (1.0 - z) * n + z * h


def ref_forward(params, tokens, hidden=None):
    T, B = tokens.shape
    H = params["w_hh_f"].shape[1]
    emb = jnp.take(params["embedding"], tokens, axis=0)
    if hidden is None:
        hidden = jnp.zeros((2, B, H), jnp.float32)

    def fscan(h, x):
        h2 = _ref_gru_step(x, h, params["w_ih_f"], params["w_hh_f"],
                           params["b_ih_f"], params["b_hh_f"])
        return h2, h2

    def bscan(h, x):
        h2 = _ref_gru_step(x, h, params["w_ih_b"], params["w_hh_b"],
                           params["b_ih_b"], params["b_hh_b"])
        return h2, h2

    hf, outs_f = lax.scan(fscan, hidden[0], emb)
    hb, outs_b = lax.scan(bscan, hidden[1], emb[::-1])
    outs_b = outs_b[::-1]
    out = jnp.concatenate([outs_f, outs_b], axis=-1)
    hT = jnp.stack([hf, hb])
    return out, hT


# ---------------------------------- main ----------------------------------- #

if __name__ == "__main__":
    key = jax.random.PRNGKey(0)
    k_param, k_tok, k_tok2, k_h = jax.random.split(key, 4)

    input_size = 20   # vocab
    embed_size = 32
    hidden_size = 32

    params = init_params(k_param, input_size, embed_size, hidden_size, padding_index=1)

    # Test 1: batched, multi-chunk pipeline, zero initial hidden.
    T, B = 8, 2
    tokens = jax.random.randint(k_tok, (T, B), 0, input_size, dtype=jnp.int32)
    tokens = tokens.at[0, 0].set(1)  # exercise padding_idx semantics
    out, hT = birnn_encoder(params, tokens, hidden=None, chunk=4)
    out = jax.block_until_ready(out)
    hT = jax.block_until_ready(hT)
    out_r, hT_r = ref_forward(params, tokens, hidden=None)
    assert out.shape == (T, B, 2 * hidden_size)
    assert hT.shape == (2, B, hidden_size)
    assert jnp.allclose(out, out_r, atol=1e-4, rtol=1e-4)
    assert jnp.allclose(hT, hT_r, atol=1e-4, rtol=1e-4)

    # Test 2: ragged T (chunk masking path), provided hidden, odd batch size.
    T2, B2 = 5, 3
    tokens2 = jax.random.randint(k_tok2, (T2, B2), 0, input_size, dtype=jnp.int32)
    h0 = 0.1 * jax.random.normal(k_h, (2, B2, hidden_size), jnp.float32)
    out2, hT2 = birnn_encoder(params, tokens2, hidden=h0, chunk=4)
    out2 = jax.block_until_ready(out2)
    out2_r, hT2_r = ref_forward(params, tokens2, hidden=h0)
    assert jnp.allclose(out2, out2_r, atol=1e-4, rtol=1e-4)
    assert jnp.allclose(hT2, hT2_r, atol=1e-4, rtol=1e-4)

    # Test 3: unbatched input (allowed by the module spec).
    T3 = 6
    tok3 = jax.random.randint(jax.random.PRNGKey(3), (T3,), 0, input_size,
                              dtype=jnp.int32)
    out3, hT3 = birnn_encoder(params, tok3, hidden=None, chunk=8)
    out3 = jax.block_until_ready(out3)
    out3_r, hT3_r = ref_forward(params, tok3[:, None], hidden=None)
    assert jnp.allclose(out3, out3_r[:, 0, :], atol=1e-4, rtol=1e-4)
    assert jnp.allclose(hT3, hT3_r[:, 0, :], atol=1e-4, rtol=1e-4)

    print("KERNEL_OK")
</pallas_src>

<mosaic_0001>
module attributes {stable_mosaic.version = 11 : i64} {
  func.func @_birnn_gru_kernel(%arg0: i32, %arg1: memref<4x8x128xf32, #tpu.memory_space<vmem>>, %arg2: memref<4x8x128xf32, #tpu.memory_space<vmem>>, %arg3: memref<2x8x128xf32, #tpu.memory_space<vmem>>, %arg4: memref<128x384xf32, #tpu.memory_space<vmem>>, %arg5: memref<128x384xf32, #tpu.memory_space<vmem>>, %arg6: memref<1x384xf32, #tpu.memory_space<vmem>>, %arg7: memref<1x128xf32, #tpu.memory_space<vmem>>, %arg8: memref<128x384xf32, #tpu.memory_space<vmem>>, %arg9: memref<128x384xf32, #tpu.memory_space<vmem>>, %arg10: memref<1x384xf32, #tpu.memory_space<vmem>>, %arg11: memref<1x128xf32, #tpu.memory_space<vmem>>, %arg12: memref<4x8x128xf32, #tpu.memory_space<vmem>>, %arg13: memref<4x8x128xf32, #tpu.memory_space<vmem>>, %arg14: memref<2x8x128xf32, #tpu.memory_space<vmem>>, %arg15: memref<8x128xf32, #tpu.memory_space<vmem>>, %arg16: memref<8x128xf32, #tpu.memory_space<vmem>>, %arg17: memref<4x8x384xf32, #tpu.memory_space<vmem>>, %arg18: memref<4x8x384xf32, #tpu.memory_space<vmem>>) attributes {dimension_semantics = [#tpu.dimension_semantics<arbitrary>], iteration_bounds = array<i64: 2>, scalar_prefetch = 0 : i64, scratch_operands = 4 : i64, tpu.core_type = #tpu.core_type<tc>, window_params = [{transform_indices = @transform_0, window_bounds = array<i64: 4, 8, 128>}, {transform_indices = @transform_1, window_bounds = array<i64: 4, 8, 128>}, {pipeline_mode = #tpu.pipeline_mode<synchronous>, transform_indices = @transform_2, window_bounds = array<i64: 2, 8, 128>}, {pipeline_mode = #tpu.pipeline_mode<synchronous>, transform_indices = @transform_3, window_bounds = array<i64: 128, 384>}, {pipeline_mode = #tpu.pipeline_mode<synchronous>, transform_indices = @transform_4, window_bounds = array<i64: 128, 384>}, {pipeline_mode = #tpu.pipeline_mode<synchronous>, transform_indices = @transform_5, window_bounds = array<i64: 1, 384>}, {pipeline_mode = #tpu.pipeline_mode<synchronous>, transform_indices = @transform_6, window_bounds = array<i64: 1, 128>}, {pipeline_mode = #tpu.pipeline_mode<synchronous>, transform_indices = @transform_7, window_bounds = array<i64: 128, 384>}, {pipeline_mode = #tpu.pipeline_mode<synchronous>, transform_indices = @transform_8, window_bounds = array<i64: 128, 384>}, {pipeline_mode = #tpu.pipeline_mode<synchronous>, transform_indices = @transform_9, window_bounds = array<i64: 1, 384>}, {pipeline_mode = #tpu.pipeline_mode<synchronous>, transform_indices = @transform_10, window_bounds = array<i64: 1, 128>}, {transform_indices = @transform_11, window_bounds = array<i64: 4, 8, 128>}, {transform_indices = @transform_12, window_bounds = array<i64: 4, 8, 128>}, {pipeline_mode = #tpu.pipeline_mode<synchronous>, transform_indices = @transform_13, window_bounds = array<i64: 2, 8, 128>}]} {
    %c0_i32 = arith.constant 0 : i32
    %0 = arith.cmpi eq, %arg0, %c0_i32 : i32
    %1 = arith.extui %0 : i1 to i32
    %c0_i32_0 = arith.constant 0 : i32
    %2 = arith.cmpi ne, %1, %c0_i32_0 : i32
    scf.if %2 {
      %c0_136 = arith.constant 0 : index
      %c0_137 = arith.constant 0 : index
      %c0_138 = arith.constant 0 : index
      %336 = vector.load %arg3[%c0_136, %c0_137, %c0_138] : memref<2x8x128xf32, #tpu.memory_space<vmem>>, vector<1x8x128xf32>
      %337 = vector.shape_cast %336 : vector<1x8x128xf32> to vector<8x128xf32>
      %c0_139 = arith.constant 0 : index
      %c0_140 = arith.constant 0 : index
      %338 = vector.load %arg15[%c0_139, %c0_140] : memref<8x128xf32, #tpu.memory_space<vmem>>, vector<8x128xf32>
      tpu.vector_store %arg15[%c0_139, %c0_140], %337 {strides = array<i32>} : memref<8x128xf32, #tpu.memory_space<vmem>>, vector<8x128xf32>,
      %c1 = arith.constant 1 : index
      %c0_141 = arith.constant 0 : index
      %c0_142 = arith.constant 0 : index
      %339 = vector.load %arg3[%c1, %c0_141, %c0_142] : memref<2x8x128xf32, #tpu.memory_space<vmem>>, vector<1x8x128xf32>
      %340 = vector.shape_cast %339 : vector<1x8x128xf32> to vector<8x128xf32>
      %c0_143 = arith.constant 0 : index
      %c0_144 = arith.constant 0 : index
      %341 = vector.load %arg16[%c0_143, %c0_144] : memref<8x128xf32, #tpu.memory_space<vmem>>, vector<8x128xf32>
      tpu.vector_store %arg16[%c0_143, %c0_144], %340 {strides = array<i32>} : memref<8x128xf32, #tpu.memory_space<vmem>>, vector<8x128xf32>,
    } else {
    }
    %c0 = arith.constant 0 : index
    %c0_1 = arith.constant 0 : index
    %c0_2 = arith.constant 0 : index
    %3 = vector.load %arg1[%c0, %c0_1, %c0_2] : memref<4x8x128xf32, #tpu.memory_space<vmem>>, vector<4x8x128xf32>
    %4 = vector.shape_cast %3 : vector<4x8x128xf32> to vector<32x128xf32>
    %c0_3 = arith.constant 0 : index
    %c0_4 = arith.constant 0 : index
    %c0_5 = arith.constant 0 : index
    %5 = vector.load %arg2[%c0_3, %c0_4, %c0_5] : memref<4x8x128xf32, #tpu.memory_space<vmem>>, vector<4x8x128xf32>
    %6 = vector.shape_cast %5 : vector<4x8x128xf32> to vector<32x128xf32>
    %c0_6 = arith.constant 0 : index
    %c0_7 = arith.constant 0 : index
    %7 = vector.load %arg4[%c0_6, %c0_7] : memref<128x384xf32, #tpu.memory_space<vmem>>, vector<128x384xf32>
    %cst = arith.constant dense<0.000000e+00> : vector<32x384xf32>
    %8 = tpu.matmul %4, %7, %cst {dimension_numbers = #tpu.dot_dimension_numbers<[1], [0], [0], [1], [0, 0, 1, 1], [], []>} : vector<32x128xf32>, vector<128x384xf32>, vector<32x384xf32> -> vector<32x384xf32>
    %c0_8 = arith.constant 0 : index
    %c0_9 = arith.constant 0 : index
    %9 = vector.load %arg6[%c0_8, %c0_9] : memref<1x384xf32, #tpu.memory_space<vmem>>, vector<1x384xf32>
    %10 = vector.broadcast %9 : vector<1x384xf32> to vector<32x384xf32>
    %11 = arith.addf %8, %10 : vector<32x384xf32>
    %12 = vector.shape_cast %11 : vector<32x384xf32> to vector<4x8x384xf32>
    %c0_10 = arith.constant 0 : index
    %c0_11 = arith.constant 0 : index
    %c0_12 = arith.constant 0 : index
    %13 = vector.load %arg17[%c0_10, %c0_11, %c0_12] : memref<4x8x384xf32, #tpu.memory_space<vmem>>, vector<4x8x384xf32>
    tpu.vector_store %arg17[%c0_10, %c0_11, %c0_12], %12 {strides = array<i32>} : memref<4x8x384xf32, #tpu.memory_space<vmem>>, vector<4x8x384xf32>,
    %c0_13 = arith.constant 0 : index
    %c0_14 = arith.constant 0 : index
    %14 = vector.load %arg8[%c0_13, %c0_14] : memref<128x384xf32, #tpu.memory_space<vmem>>, vector<128x384xf32>
    %cst_15 = arith.constant dense<0.000000e+00> : vector<32x384xf32>
    %15 = tpu.matmul %6, %14, %cst_15 {dimension_numbers = #tpu.dot_dimension_numbers<[1], [0], [0], [1], [0, 0, 1, 1], [], []>} : vector<32x128xf32>, vector<128x384xf32>, vector<32x384xf32> -> vector<32x384xf32>
    %c0_16 = arith.constant 0 : index
    %c0_17 = arith.constant 0 : index
    %16 = vector.load %arg10[%c0_16, %c0_17] : memref<1x384xf32, #tpu.memory_space<vmem>>, vector<1x384xf32>
    %17 = vector.broadcast %16 : vector<1x384xf32> to vector<32x384xf32>
    %18 = arith.addf %15, %17 : vector<32x384xf32>
    %19 = vector.shape_cast %18 : vector<32x384xf32> to vector<4x8x384xf32>
    %c0_18 = arith.constant 0 : index
    %c0_19 = arith.constant 0 : index
    %c0_20 = arith.constant 0 : index
    %20 = vector.load %arg18[%c0_18, %c0_19, %c0_20] : memref<4x8x384xf32, #tpu.memory_space<vmem>>, vector<4x8x384xf32>
    tpu.vector_store %arg18[%c0_18, %c0_19, %c0_20], %19 {strides = array<i32>} : memref<4x8x384xf32, #tpu.memory_space<vmem>>, vector<4x8x384xf32>,
    %c0_21 = arith.constant 0 : index
    %c0_22 = arith.constant 0 : index
    %21 = vector.load %arg5[%c0_21, %c0_22] : memref<128x384xf32, #tpu.memory_space<vmem>>, vector<128x384xf32>
    %c0_23 = arith.constant 0 : index
    %c0_24 = arith.constant 0 : index
    %22 = vector.load %arg9[%c0_23, %c0_24] : memref<128x384xf32, #tpu.memory_space<vmem>>, vector<128x384xf32>
    %c0_25 = arith.constant 0 : index
    %c0_26 = arith.constant 0 : index
    %23 = vector.load %arg7[%c0_25, %c0_26] : memref<1x128xf32, #tpu.memory_space<vmem>>, vector<1x128xf32>
    %24 = vector.shape_cast %23 : vector<1x128xf32> to vector<1x128xf32>
    %25 = vector.broadcast %24 : vector<1x128xf32> to vector<8x128xf32>
    %c0_27 = arith.constant 0 : index
    %c0_28 = arith.constant 0 : index
    %26 = vector.load %arg11[%c0_27, %c0_28] : memref<1x128xf32, #tpu.memory_space<vmem>>, vector<1x128xf32>
    %27 = vector.shape_cast %26 : vector<1x128xf32> to vector<1x128xf32>
    %28 = vector.broadcast %27 : vector<1x128xf32> to vector<8x128xf32>
    %c0_i32_29 = arith.constant 0 : i32
    %c0_30 = arith.constant 0 : index
    %c0_31 = arith.constant 0 : index
    %29 = vector.load %arg15[%c0_30, %c0_31] : memref<8x128xf32, #tpu.memory_space<vmem>>, vector<8x128xf32>
    %c0_32 = arith.constant 0 : index
    %c0_33 = arith.constant 0 : index
    %30 = vector.load %arg16[%c0_32, %c0_33] : memref<8x128xf32, #tpu.memory_space<vmem>>, vector<8x128xf32>
    %31 = arith.index_cast %c0_i32_29 : i32 to index
    %c0_34 = arith.constant 0 : index
    %c0_35 = arith.constant 0 : index
    %32 = vector.load %arg17[%31, %c0_34, %c0_35] : memref<4x8x384xf32, #tpu.memory_space<vmem>>, vector<1x8x384xf32>
    %33 = vector.shape_cast %32 : vector<1x8x384xf32> to vector<8x384xf32>
    %cst_36 = arith.constant dense<0.000000e+00> : vector<8x384xf32>
    %34 = tpu.matmul %29, %21, %cst_36 {dimension_numbers = #tpu.dot_dimension_numbers<[1], [0], [0], [1], [0, 0, 1, 1], [], []>} : vector<8x128xf32>, vector<128x384xf32>, vector<8x384xf32> -> vector<8x384xf32>
    %35 = vector.extract_strided_slice %33 {offsets = [0, 0], sizes = [8, 128], strides = [1, 1]} : vector<8x384xf32> to vector<8x128xf32>
    %36 = vector.extract_strided_slice %34 {offsets = [0, 0], sizes = [8, 128], strides = [1, 1]} : vector<8x384xf32> to vector<8x128xf32>
    %37 = arith.addf %35, %36 : vector<8x128xf32>
    %38 = arith.negf %37 : vector<8x128xf32>
    %39 = math.exp %38 : vector<8x128xf32>
    %cst_37 = arith.constant 1.000000e+00 : f32
    %40 = vector.broadcast %cst_37 : f32 to vector<8x128xf32>
    %41 = arith.addf %40, %39 : vector<8x128xf32>
    %42 = arith.divf %40, %41 : vector<8x128xf32>
    %43 = vector.extract_strided_slice %33 {offsets = [0, 128], sizes = [8, 128], strides = [1, 1]} : vector<8x384xf32> to vector<8x128xf32>
    %44 = vector.extract_strided_slice %34 {offsets = [0, 128], sizes = [8, 128], strides = [1, 1]} : vector<8x384xf32> to vector<8x128xf32>
    %45 = arith.addf %43, %44 : vector<8x128xf32>
    %46 = arith.negf %45 : vector<8x128xf32>
    %47 = math.exp %46 : vector<8x128xf32>
    %cst_38 = arith.constant 1.000000e+00 : f32
    %48 = vector.broadcast %cst_38 : f32 to vector<8x128xf32>
    %49 = arith.addf %48, %47 : vector<8x128xf32>
    %50 = arith.divf %48, %49 : vector<8x128xf32>
    %51 = vector.extract_strided_slice %33 {offsets = [0, 256], sizes = [8, 128], strides = [1, 1]} : vector<8x384xf32> to vector<8x128xf32>
    %52 = vector.extract_strided_slice %34 {offsets = [0, 256], sizes = [8, 128], strides = [1, 1]} : vector<8x384xf32> to vector<8x128xf32>
    %53 = arith.addf %52, %25 : vector<8x128xf32>
    %54 = arith.mulf %42, %53 : vector<8x128xf32>
    %55 = arith.addf %51, %54 : vector<8x128xf32>
    %56 = math.tanh %55 : vector<8x128xf32>
    %cst_39 = arith.constant 1.000000e+00 : f32
    %57 = vector.broadcast %cst_39 : f32 to vector<8x128xf32>
    %58 = arith.subf %57, %50 : vector<8x128xf32>
    %59 = arith.mulf %58, %56 : vector<8x128xf32>
    %60 = arith.mulf %50, %29 : vector<8x128xf32>
    %61 = arith.addf %59, %60 : vector<8x128xf32>
    %c3_i32 = arith.constant 3 : i32
    %62 = arith.subi %c3_i32, %c0_i32_29 : i32
    %63 = arith.index_cast %62 : i32 to index
    %c0_40 = arith.constant 0 : index
    %c0_41 = arith.constant 0 : index
    %64 = vector.load %arg18[%63, %c0_40, %c0_41] : memref<4x8x384xf32, #tpu.memory_space<vmem>>, vector<1x8x384xf32>
    %65 = vector.shape_cast %64 : vector<1x8x384xf32> to vector<8x384xf32>
    %cst_42 = arith.constant dense<0.000000e+00> : vector<8x384xf32>
    %66 = tpu.matmul %30, %22, %cst_42 {dimension_numbers = #tpu.dot_dimension_numbers<[1], [0], [0], [1], [0, 0, 1, 1], [], []>} : vector<8x128xf32>, vector<128x384xf32>, vector<8x384xf32> -> vector<8x384xf32>
    %67 = vector.extract_strided_slice %65 {offsets = [0, 0], sizes = [8, 128], strides = [1, 1]} : vector<8x384xf32> to vector<8x128xf32>
    %68 = vector.extract_strided_slice %66 {offsets = [0, 0], sizes = [8, 128], strides = [1, 1]} : vector<8x384xf32> to vector<8x128xf32>
    %69 = arith.addf %67, %68 : vector<8x128xf32>
    %70 = arith.negf %69 : vector<8x128xf32>
    %71 = math.exp %70 : vector<8x128xf32>
    %cst_43 = arith.constant 1.000000e+00 : f32
    %72 = vector.broadcast %cst_43 : f32 to vector<8x128xf32>
    %73 = arith.addf %72, %71 : vector<8x128xf32>
    %74 = arith.divf %72, %73 : vector<8x128xf32>
    %75 = vector.extract_strided_slice %65 {offsets = [0, 128], sizes = [8, 128], strides = [1, 1]} : vector<8x384xf32> to vector<8x128xf32>
    %76 = vector.extract_strided_slice %66 {offsets = [0, 128], sizes = [8, 128], strides = [1, 1]} : vector<8x384xf32> to vector<8x128xf32>
    %77 = arith.addf %75, %76 : vector<8x128xf32>
    %78 = arith.negf %77 : vector<8x128xf32>
    %79 = math.exp %78 : vector<8x128xf32>
    %cst_44 = arith.constant 1.000000e+00 : f32
    %80 = vector.broadcast %cst_44 : f32 to vector<8x128xf32>
    %81 = arith.addf %80, %79 : vector<8x128xf32>
    %82 = arith.divf %80, %81 : vector<8x128xf32>
    %83 = vector.extract_strided_slice %65 {offsets = [0, 256], sizes = [8, 128], strides = [1, 1]} : vector<8x384xf32> to vector<8x128xf32>
    %84 = vector.extract_strided_slice %66 {offsets = [0, 256], sizes = [8, 128], strides = [1, 1]} : vector<8x384xf32> to vector<8x128xf32>
    %85 = arith.addf %84, %28 : vector<8x128xf32>
    %86 = arith.mulf %74, %85 : vector<8x128xf32>
    %87 = arith.addf %83, %86 : vector<8x128xf32>
    %88 = math.tanh %87 : vector<8x128xf32>
    %cst_45 = arith.constant 1.000000e+00 : f32
    %89 = vector.broadcast %cst_45 : f32 to vector<8x128xf32>
    %90 = arith.subf %89, %82 : vector<8x128xf32>
    %91 = arith.mulf %90, %88 : vector<8x128xf32>
    %92 = arith.mulf %82, %30 : vector<8x128xf32>
    %93 = arith.addf %91, %92 : vector<8x128xf32>
    %c0_46 = arith.constant 0 : index
    %c0_47 = arith.constant 0 : index
    %94 = vector.load %arg15[%c0_46, %c0_47] : memref<8x128xf32, #tpu.memory_space<vmem>>, vector<8x128xf32>
    tpu.vector_store %arg15[%c0_46, %c0_47], %61 {strides = array<i32>} : memref<8x128xf32, #tpu.memory_space<vmem>>, vector<8x128xf32>,
    %c0_48 = arith.constant 0 : index
    %c0_49 = arith.constant 0 : index
    %95 = vector.load %arg16[%c0_48, %c0_49] : memref<8x128xf32, #tpu.memory_space<vmem>>, vector<8x128xf32>
    tpu.vector_store %arg16[%c0_48, %c0_49], %93 {strides = array<i32>} : memref<8x128xf32, #tpu.memory_space<vmem>>, vector<8x128xf32>,
    %96 = arith.index_cast %c0_i32_29 : i32 to index
    %c0_50 = arith.constant 0 : index
    %c0_51 = arith.constant 0 : index
    %97 = vector.load %arg12[%96, %c0_50, %c0_51] : memref<4x8x128xf32, #tpu.memory_space<vmem>>, vector<1x8x128xf32>
    %98 = vector.shape_cast %97 : vector<1x8x128xf32> to vector<8x128xf32>
    %99 = vector.shape_cast %61 : vector<8x128xf32> to vector<1x8x128xf32>
    tpu.vector_store %arg12[%96, %c0_50, %c0_51], %99 {strides = array<i32>} : memref<4x8x128xf32, #tpu.memory_space<vmem>>, vector<1x8x128xf32>,
    %c3_i32_52 = arith.constant 3 : i32
    %100 = arith.subi %c3_i32_52, %c0_i32_29 : i32
    %101 = arith.index_cast %100 : i32 to index
    %c0_53 = arith.constant 0 : index
    %c0_54 = arith.constant 0 : index
    %102 = vector.load %arg13[%101, %c0_53, %c0_54] : memref<4x8x128xf32, #tpu.memory_space<vmem>>, vector<1x8x128xf32>
    %103 = vector.shape_cast %102 : vector<1x8x128xf32> to vector<8x128xf32>
    %104 = vector.shape_cast %93 : vector<8x128xf32> to vector<1x8x128xf32>
    tpu.vector_store %arg13[%101, %c0_53, %c0_54], %104 {strides = array<i32>} : memref<4x8x128xf32, #tpu.memory_space<vmem>>, vector<1x8x128xf32>,
    %c1_i32 = arith.constant 1 : i32
    %c0_55 = arith.constant 0 : index
    %c0_56 = arith.constant 0 : index
    %105 = vector.load %arg15[%c0_55, %c0_56] : memref<8x128xf32, #tpu.memory_space<vmem>>, vector<8x128xf32>
    %c0_57 = arith.constant 0 : index
    %c0_58 = arith.constant 0 : index
    %106 = vector.load %arg16[%c0_57, %c0_58] : memref<8x128xf32, #tpu.memory_space<vmem>>, vector<8x128xf32>
    %107 = arith.index_cast %c1_i32 : i32 to index
    %c0_59 = arith.constant 0 : index
    %c0_60 = arith.constant 0 : index
    %108 = vector.load %arg17[%107, %c0_59, %c0_60] : memref<4x8x384xf32, #tpu.memory_space<vmem>>, vector<1x8x384xf32>
    %109 = vector.shape_cast %108 : vector<1x8x384xf32> to vector<8x384xf32>
    %cst_61 = arith.constant dense<0.000000e+00> : vector<8x384xf32>
    %110 = tpu.matmul %105, %21, %cst_61 {dimension_numbers = #tpu.dot_dimension_numbers<[1], [0], [0], [1], [0, 0, 1, 1], [], []>} : vector<8x128xf32>, vector<128x384xf32>, vector<8x384xf32> -> vector<8x384xf32>
    %111 = vector.extract_strided_slice %109 {offsets = [0, 0], sizes = [8, 128], strides = [1, 1]} : vector<8x384xf32> to vector<8x128xf32>
    %112 = vector.extract_strided_slice %110 {offsets = [0, 0], sizes = [8, 128], strides = [1, 1]} : vector<8x384xf32> to vector<8x128xf32>
    %113 = arith.addf %111, %112 : vector<8x128xf32>
    %114 = arith.negf %113 : vector<8x128xf32>
    %115 = math.exp %114 : vector<8x128xf32>
    %cst_62 = arith.constant 1.000000e+00 : f32
    %116 = vector.broadcast %cst_62 : f32 to vector<8x128xf32>
    %117 = arith.addf %116, %115 : vector<8x128xf32>
    %118 = arith.divf %116, %117 : vector<8x128xf32>
    %119 = vector.extract_strided_slice %109 {offsets = [0, 128], sizes = [8, 128], strides = [1, 1]} : vector<8x384xf32> to vector<8x128xf32>
    %120 = vector.extract_strided_slice %110 {offsets = [0, 128], sizes = [8, 128], strides = [1, 1]} : vector<8x384xf32> to vector<8x128xf32>
    %121 = arith.addf %119, %120 : vector<8x128xf32>
    %122 = arith.negf %121 : vector<8x128xf32>
    %123 = math.exp %122 : vector<8x128xf32>
    %cst_63 = arith.constant 1.000000e+00 : f32
    %124 = vector.broadcast %cst_63 : f32 to vector<8x128xf32>
    %125 = arith.addf %124, %123 : vector<8x128xf32>
    %126 = arith.divf %124, %125 : vector<8x128xf32>
    %127 = vector.extract_strided_slice %109 {offsets = [0, 256], sizes = [8, 128], strides = [1, 1]} : vector<8x384xf32> to vector<8x128xf32>
    %128 = vector.extract_strided_slice %110 {offsets = [0, 256], sizes = [8, 128], strides = [1, 1]} : vector<8x384xf32> to vector<8x128xf32>
    %129 = arith.addf %128, %25 : vector<8x128xf32>
    %130 = arith.mulf %118, %129 : vector<8x128xf32>
    %131 = arith.addf %127, %130 : vector<8x128xf32>
    %132 = math.tanh %131 : vector<8x128xf32>
    %cst_64 = arith.constant 1.000000e+00 : f32
    %133 = vector.broadcast %cst_64 : f32 to vector<8x128xf32>
    %134 = arith.subf %133, %126 : vector<8x128xf32>
    %135 = arith.mulf %134, %132 : vector<8x128xf32>
    %136 = arith.mulf %126, %105 : vector<8x128xf32>
    %137 = arith.addf %135, %136 : vector<8x128xf32>
    %c3_i32_65 = arith.constant 3 : i32
    %138 = arith.subi %c3_i32_65, %c1_i32 : i32
    %139 = arith.index_cast %138 : i32 to index
    %c0_66 = arith.constant 0 : index
    %c0_67 = arith.constant 0 : index
    %140 = vector.load %arg18[%139, %c0_66, %c0_67] : memref<4x8x384xf32, #tpu.memory_space<vmem>>, vector<1x8x384xf32>
    %141 = vector.shape_cast %140 : vector<1x8x384xf32> to vector<8x384xf32>
    %cst_68 = arith.constant dense<0.000000e+00> : vector<8x384xf32>
    %142 = tpu.matmul %106, %22, %cst_68 {dimension_numbers = #tpu.dot_dimension_numbers<[1], [0], [0], [1], [0, 0, 1, 1], [], []>} : vector<8x128xf32>, vector<128x384xf32>, vector<8x384xf32> -> vector<8x384xf32>
    %143 = vector.extract_strided_slice %141 {offsets = [0, 0], sizes = [8, 128], strides = [1, 1]} : vector<8x384xf32> to vector<8x128xf32>
    %144 = vector.extract_strided_slice %142 {offsets = [0, 0], sizes = [8, 128], strides = [1, 1]} : vector<8x384xf32> to vector<8x128xf32>
    %145 = arith.addf %143, %144 : vector<8x128xf32>
    %146 = arith.negf %145 : vector<8x128xf32>
    %147 = math.exp %146 : vector<8x128xf32>
    %cst_69 = arith.constant 1.000000e+00 : f32
    %148 = vector.broadcast %cst_69 : f32 to vector<8x128xf32>
    %149 = arith.addf %148, %147 : vector<8x128xf32>
    %150 = arith.divf %148, %149 : vector<8x128xf32>
    %151 = vector.extract_strided_slice %141 {offsets = [0, 128], sizes = [8, 128], strides = [1, 1]} : vector<8x384xf32> to vector<8x128xf32>
    %152 = vector.extract_strided_slice %142 {offsets = [0, 128], sizes = [8, 128], strides = [1, 1]} : vector<8x384xf32> to vector<8x128xf32>
    %153 = arith.addf %151, %152 : vector<8x128xf32>
    %154 = arith.negf %153 : vector<8x128xf32>
    %155 = math.exp %154 : vector<8x128xf32>
    %cst_70 = arith.constant 1.000000e+00 : f32
    %156 = vector.broadcast %cst_70 : f32 to vector<8x128xf32>
    %157 = arith.addf %156, %155 : vector<8x128xf32>
    %158 = arith.divf %156, %157 : vector<8x128xf32>
    %159 = vector.extract_strided_slice %141 {offsets = [0, 256], sizes = [8, 128], strides = [1, 1]} : vector<8x384xf32> to vector<8x128xf32>
    %160 = vector.extract_strided_slice %142 {offsets = [0, 256], sizes = [8, 128], strides = [1, 1]} : vector<8x384xf32> to vector<8x128xf32>
    %161 = arith.addf %160, %28 : vector<8x128xf32>
    %162 = arith.mulf %150, %161 : vector<8x128xf32>
    %163 = arith.addf %159, %162 : vector<8x128xf32>
    %164 = math.tanh %163 : vector<8x128xf32>
    %cst_71 = arith.constant 1.000000e+00 : f32
    %165 = vector.broadcast %cst_71 : f32 to vector<8x128xf32>
    %166 = arith.subf %165, %158 : vector<8x128xf32>
    %167 = arith.mulf %166, %164 : vector<8x128xf32>
    %168 = arith.mulf %158, %106 : vector<8x128xf32>
    %169 = arith.addf %167, %168 : vector<8x128xf32>
    %c0_72 = arith.constant 0 : index
    %c0_73 = arith.constant 0 : index
    %170 = vector.load %arg15[%c0_72, %c0_73] : memref<8x128xf32, #tpu.memory_space<vmem>>, vector<8x128xf32>
    tpu.vector_store %arg15[%c0_72, %c0_73], %137 {strides = array<i32>} : memref<8x128xf32, #tpu.memory_space<vmem>>, vector<8x128xf32>,
    %c0_74 = arith.constant 0 : index
    %c0_75 = arith.constant 0 : index
    %171 = vector.load %arg16[%c0_74, %c0_75] : memref<8x128xf32, #tpu.memory_space<vmem>>, vector<8x128xf32>
    tpu.vector_store %arg16[%c0_74, %c0_75], %169 {strides = array<i32>} : memref<8x128xf32, #tpu.memory_space<vmem>>, vector<8x128xf32>,
    %172 = arith.index_cast %c1_i32 : i32 to index
    %c0_76 = arith.constant 0 : index
    %c0_77 = arith.constant 0 : index
    %173 = vector.load %arg12[%172, %c0_76, %c0_77] : memref<4x8x128xf32, #tpu.memory_space<vmem>>, vector<1x8x128xf32>
    %174 = vector.shape_cast %173 : vector<1x8x128xf32> to vector<8x128xf32>
    %175 = vector.shape_cast %137 : vector<8x128xf32> to vector<1x8x128xf32>
    tpu.vector_store %arg12[%172, %c0_76, %c0_77], %175 {strides = array<i32>} : memref<4x8x128xf32, #tpu.memory_space<vmem>>, vector<1x8x128xf32>,
    %c3_i32_78 = arith.constant 3 : i32
    %176 = arith.subi %c3_i32_78, %c1_i32 : i32
    %177 = arith.index_cast %176 : i32 to index
    %c0_79 = arith.constant 0 : index
    %c0_80 = arith.constant 0 : index
    %178 = vector.load %arg13[%177, %c0_79, %c0_80] : memref<4x8x128xf32, #tpu.memory_space<vmem>>, vector<1x8x128xf32>
    %179 = vector.shape_cast %178 : vector<1x8x128xf32> to vector<8x128xf32>
    %180 = vector.shape_cast %169 : vector<8x128xf32> to vector<1x8x128xf32>
    tpu.vector_store %arg13[%177, %c0_79, %c0_80], %180 {strides = array<i32>} : memref<4x8x128xf32, #tpu.memory_space<vmem>>, vector<1x8x128xf32>,
    %c2_i32 = arith.constant 2 : i32
    %c0_81 = arith.constant 0 : index
    %c0_82 = arith.constant 0 : index
    %181 = vector.load %arg15[%c0_81, %c0_82] : memref<8x128xf32, #tpu.memory_space<vmem>>, vector<8x128xf32>
    %c0_83 = arith.constant 0 : index
    %c0_84 = arith.constant 0 : index
    %182 = vector.load %arg16[%c0_83, %c0_84] : memref<8x128xf32, #tpu.memory_space<vmem>>, vector<8x128xf32>
    %183 = arith.index_cast %c2_i32 : i32 to index
    %c0_85 = arith.constant 0 : index
    %c0_86 = arith.constant 0 : index
    %184 = vector.load %arg17[%183, %c0_85, %c0_86] : memref<4x8x384xf32, #tpu.memory_space<vmem>>, vector<1x8x384xf32>
    %185 = vector.shape_cast %184 : vector<1x8x384xf32> to vector<8x384xf32>
    %cst_87 = arith.constant dense<0.000000e+00> : vector<8x384xf32>
    %186 = tpu.matmul %181, %21, %cst_87 {dimension_numbers = #tpu.dot_dimension_numbers<[1], [0], [0], [1], [0, 0, 1, 1], [], []>} : vector<8x128xf32>, vector<128x384xf32>, vector<8x384xf32> -> vector<8x384xf32>
    %187 = vector.extract_strided_slice %185 {offsets = [0, 0], sizes = [8, 128], strides = [1, 1]} : vector<8x384xf32> to vector<8x128xf32>
    %188 = vector.extract_strided_slice %186 {offsets = [0, 0], sizes = [8, 128], strides = [1, 1]} : vector<8x384xf32> to vector<8x128xf32>
    %189 = arith.addf %187, %188 : vector<8x128xf32>
    %190 = arith.negf %189 : vector<8x128xf32>
    %191 = math.exp %190 : vector<8x128xf32>
    %cst_88 = arith.constant 1.000000e+00 : f32
    %192 = vector.broadcast %cst_88 : f32 to vector<8x128xf32>
    %193 = arith.addf %192, %191 : vector<8x128xf32>
    %194 = arith.divf %192, %193 : vector<8x128xf32>
    %195 = vector.extract_strided_slice %185 {offsets = [0, 128], sizes = [8, 128], strides = [1, 1]} : vector<8x384xf32> to vector<8x128xf32>
    %196 = vector.extract_strided_slice %186 {offsets = [0, 128], sizes = [8, 128], strides = [1, 1]} : vector<8x384xf32> to vector<8x128xf32>
    %197 = arith.addf %195, %196 : vector<8x128xf32>
    %198 = arith.negf %197 : vector<8x128xf32>
    %199 = math.exp %198 : vector<8x128xf32>
    %cst_89 = arith.constant 1.000000e+00 : f32
    %200 = vector.broadcast %cst_89 : f32 to vector<8x128xf32>
    %201 = arith.addf %200, %199 : vector<8x128xf32>
    %202 = arith.divf %200, %201 : vector<8x128xf32>
    %203 = vector.extract_strided_slice %185 {offsets = [0, 256], sizes = [8, 128], strides = [1, 1]} : vector<8x384xf32> to vector<8x128xf32>
    %204 = vector.extract_strided_slice %186 {offsets = [0, 256], sizes = [8, 128], strides = [1, 1]} : vector<8x384xf32> to vector<8x128xf32>
    %205 = arith.addf %204, %25 : vector<8x128xf32>
    %206 = arith.mulf %194, %205 : vector<8x128xf32>
    %207 = arith.addf %203, %206 : vector<8x128xf32>
    %208 = math.tanh %207 : vector<8x128xf32>
    %cst_90 = arith.constant 1.000000e+00 : f32
    %209 = vector.broadcast %cst_90 : f32 to vector<8x128xf32>
    %210 = arith.subf %209, %202 : vector<8x128xf32>
    %211 = arith.mulf %210, %208 : vector<8x128xf32>
    %212 = arith.mulf %202, %181 : vector<8x128xf32>
    %213 = arith.addf %211, %212 : vector<8x128xf32>
    %c3_i32_91 = arith.constant 3 : i32
    %214 = arith.subi %c3_i32_91, %c2_i32 : i32
    %215 = arith.index_cast %214 : i32 to index
    %c0_92 = arith.constant 0 : index
    %c0_93 = arith.constant 0 : index
    %216 = vector.load %arg18[%215, %c0_92, %c0_93] : memref<4x8x384xf32, #tpu.memory_space<vmem>>, vector<1x8x384xf32>
    %217 = vector.shape_cast %216 : vector<1x8x384xf32> to vector<8x384xf32>
    %cst_94 = arith.constant dense<0.000000e+00> : vector<8x384xf32>
    %218 = tpu.matmul %182, %22, %cst_94 {dimension_numbers = #tpu.dot_dimension_numbers<[1], [0], [0], [1], [0, 0, 1, 1], [], []>} : vector<8x128xf32>, vector<128x384xf32>, vector<8x384xf32> -> vector<8x384xf32>
    %219 = vector.extract_strided_slice %217 {offsets = [0, 0], sizes = [8, 128], strides = [1, 1]} : vector<8x384xf32> to vector<8x128xf32>
    %220 = vector.extract_strided_slice %218 {offsets = [0, 0], sizes = [8, 128], strides = [1, 1]} : vector<8x384xf32> to vector<8x128xf32>
    %221 = arith.addf %219, %220 : vector<8x128xf32>
    %222 = arith.negf %221 : vector<8x128xf32>
    %223 = math.exp %222 : vector<8x128xf32>
    %cst_95 = arith.constant 1.000000e+00 : f32
    %224 = vector.broadcast %cst_95 : f32 to vector<8x128xf32>
    %225 = arith.addf %224, %223 : vector<8x128xf32>
    %226 = arith.divf %224, %225 : vector<8x128xf32>
    %227 = vector.extract_strided_slice %217 {offsets = [0, 128], sizes = [8, 128], strides = [1, 1]} : vector<8x384xf32> to vector<8x128xf32>
    %228 = vector.extract_strided_slice %218 {offsets = [0, 128], sizes = [8, 128], strides = [1, 1]} : vector<8x384xf32> to vector<8x128xf32>
    %229 = arith.addf %227, %228 : vector<8x128xf32>
    %230 = arith.negf %229 : vector<8x128xf32>
    %231 = math.exp %230 : vector<8x128xf32>
    %cst_96 = arith.constant 1.000000e+00 : f32
    %232 = vector.broadcast %cst_96 : f32 to vector<8x128xf32>
    %233 = arith.addf %232, %231 : vector<8x128xf32>
    %234 = arith.divf %232, %233 : vector<8x128xf32>
    %235 = vector.extract_strided_slice %217 {offsets = [0, 256], sizes = [8, 128], strides = [1, 1]} : vector<8x384xf32> to vector<8x128xf32>
    %236 = vector.extract_strided_slice %218 {offsets = [0, 256], sizes = [8, 128], strides = [1, 1]} : vector<8x384xf32> to vector<8x128xf32>
    %237 = arith.addf %236, %28 : vector<8x128xf32>
    %238 = arith.mulf %226, %237 : vector<8x128xf32>
    %239 = arith.addf %235, %238 : vector<8x128xf32>
    %240 = math.tanh %239 : vector<8x128xf32>
    %cst_97 = arith.constant 1.000000e+00 : f32
    %241 = vector.broadcast %cst_97 : f32 to vector<8x128xf32>
    %242 = arith.subf %241, %234 : vector<8x128xf32>
    %243 = arith.mulf %242, %240 : vector<8x128xf32>
    %244 = arith.mulf %234, %182 : vector<8x128xf32>
    %245 = arith.addf %243, %244 : vector<8x128xf32>
    %c0_98 = arith.constant 0 : index
    %c0_99 = arith.constant 0 : index
    %246 = vector.load %arg15[%c0_98, %c0_99] : memref<8x128xf32, #tpu.memory_space<vmem>>, vector<8x128xf32>
    tpu.vector_store %arg15[%c0_98, %c0_99], %213 {strides = array<i32>} : memref<8x128xf32, #tpu.memory_space<vmem>>, vector<8x128xf32>,
    %c0_100 = arith.constant 0 : index
    %c0_101 = arith.constant 0 : index
    %247 = vector.load %arg16[%c0_100, %c0_101] : memref<8x128xf32, #tpu.memory_space<vmem>>, vector<8x128xf32>
    tpu.vector_store %arg16[%c0_100, %c0_101], %245 {strides = array<i32>} : memref<8x128xf32, #tpu.memory_space<vmem>>, vector<8x128xf32>,
    %248 = arith.index_cast %c2_i32 : i32 to index
    %c0_102 = arith.constant 0 : index
    %c0_103 = arith.constant 0 : index
    %249 = vector.load %arg12[%248, %c0_102, %c0_103] : memref<4x8x128xf32, #tpu.memory_space<vmem>>, vector<1x8x128xf32>
    %250 = vector.shape_cast %249 : vector<1x8x128xf32> to vector<8x128xf32>
    %251 = vector.shape_cast %213 : vector<8x128xf32> to vector<1x8x128xf32>
    tpu.vector_store %arg12[%248, %c0_102, %c0_103], %251 {strides = array<i32>} : memref<4x8x128xf32, #tpu.memory_space<vmem>>, vector<1x8x128xf32>,
    %c3_i32_104 = arith.constant 3 : i32
    %252 = arith.subi %c3_i32_104, %c2_i32 : i32
    %253 = arith.index_cast %252 : i32 to index
    %c0_105 = arith.constant 0 : index
    %c0_106 = arith.constant 0 : index
    %254 = vector.load %arg13[%253, %c0_105, %c0_106] : memref<4x8x128xf32, #tpu.memory_space<vmem>>, vector<1x8x128xf32>
    %255 = vector.shape_cast %254 : vector<1x8x128xf32> to vector<8x128xf32>
    %256 = vector.shape_cast %245 : vector<8x128xf32> to vector<1x8x128xf32>
    tpu.vector_store %arg13[%253, %c0_105, %c0_106], %256 {strides = array<i32>} : memref<4x8x128xf32, #tpu.memory_space<vmem>>, vector<1x8x128xf32>,
    %c3_i32_107 = arith.constant 3 : i32
    %c0_108 = arith.constant 0 : index
    %c0_109 = arith.constant 0 : index
    %257 = vector.load %arg15[%c0_108, %c0_109] : memref<8x128xf32, #tpu.memory_space<vmem>>, vector<8x128xf32>
    %c0_110 = arith.constant 0 : index
    %c0_111 = arith.constant 0 : index
    %258 = vector.load %arg16[%c0_110, %c0_111] : memref<8x128xf32, #tpu.memory_space<vmem>>, vector<8x128xf32>
    %259 = arith.index_cast %c3_i32_107 : i32 to index
    %c0_112 = arith.constant 0 : index
    %c0_113 = arith.constant 0 : index
    %260 = vector.load %arg17[%259, %c0_112, %c0_113] : memref<4x8x384xf32, #tpu.memory_space<vmem>>, vector<1x8x384xf32>
    %261 = vector.shape_cast %260 : vector<1x8x384xf32> to vector<8x384xf32>
    %cst_114 = arith.constant dense<0.000000e+00> : vector<8x384xf32>
    %262 = tpu.matmul %257, %21, %cst_114 {dimension_numbers = #tpu.dot_dimension_numbers<[1], [0], [0], [1], [0, 0, 1, 1], [], []>} : vector<8x128xf32>, vector<128x384xf32>, vector<8x384xf32> -> vector<8x384xf32>
    %263 = vector.extract_strided_slice %261 {offsets = [0, 0], sizes = [8, 128], strides = [1, 1]} : vector<8x384xf32> to vector<8x128xf32>
    %264 = vector.extract_strided_slice %262 {offsets = [0, 0], sizes = [8, 128], strides = [1, 1]} : vector<8x384xf32> to vector<8x128xf32>
    %265 = arith.addf %263, %264 : vector<8x128xf32>
    %266 = arith.negf %265 : vector<8x128xf32>
    %267 = math.exp %266 : vector<8x128xf32>
    %cst_115 = arith.constant 1.000000e+00 : f32
    %268 = vector.broadcast %cst_115 : f32 to vector<8x128xf32>
    %269 = arith.addf %268, %267 : vector<8x128xf32>
    %270 = arith.divf %268, %269 : vector<8x128xf32>
    %271 = vector.extract_strided_slice %261 {offsets = [0, 128], sizes = [8, 128], strides = [1, 1]} : vector<8x384xf32> to vector<8x128xf32>
    %272 = vector.extract_strided_slice %262 {offsets = [0, 128], sizes = [8, 128], strides = [1, 1]} : vector<8x384xf32> to vector<8x128xf32>
    %273 = arith.addf %271, %272 : vector<8x128xf32>
    %274 = arith.negf %273 : vector<8x128xf32>
    %275 = math.exp %274 : vector<8x128xf32>
    %cst_116 = arith.constant 1.000000e+00 : f32
    %276 = vector.broadcast %cst_116 : f32 to vector<8x128xf32>
    %277 = arith.addf %276, %275 : vector<8x128xf32>
    %278 = arith.divf %276, %277 : vector<8x128xf32>
    %279 = vector.extract_strided_slice %261 {offsets = [0, 256], sizes = [8, 128], strides = [1, 1]} : vector<8x384xf32> to vector<8x128xf32>
    %280 = vector.extract_strided_slice %262 {offsets = [0, 256], sizes = [8, 128], strides = [1, 1]} : vector<8x384xf32> to vector<8x128xf32>
    %281 = arith.addf %280, %25 : vector<8x128xf32>
    %282 = arith.mulf %270, %281 : vector<8x128xf32>
    %283 = arith.addf %279, %282 : vector<8x128xf32>
    %284 = math.tanh %283 : vector<8x128xf32>
    %cst_117 = arith.constant 1.000000e+00 : f32
    %285 = vector.broadcast %cst_117 : f32 to vector<8x128xf32>
    %286 = arith.subf %285, %278 : vector<8x128xf32>
    %287 = arith.mulf %286, %284 : vector<8x128xf32>
    %288 = arith.mulf %278, %257 : vector<8x128xf32>
    %289 = arith.addf %287, %288 : vector<8x128xf32>
    %c3_i32_118 = arith.constant 3 : i32
    %290 = arith.subi %c3_i32_118, %c3_i32_107 : i32
    %291 = arith.index_cast %290 : i32 to index
    %c0_119 = arith.constant 0 : index
    %c0_120 = arith.constant 0 : index
    %292 = vector.load %arg18[%291, %c0_119, %c0_120] : memref<4x8x384xf32, #tpu.memory_space<vmem>>, vector<1x8x384xf32>
    %293 = vector.shape_cast %292 : vector<1x8x384xf32> to vector<8x384xf32>
    %cst_121 = arith.constant dense<0.000000e+00> : vector<8x384xf32>
    %294 = tpu.matmul %258, %22, %cst_121 {dimension_numbers = #tpu.dot_dimension_numbers<[1], [0], [0], [1], [0, 0, 1, 1], [], []>} : vector<8x128xf32>, vector<128x384xf32>, vector<8x384xf32> -> vector<8x384xf32>
    %295 = vector.extract_strided_slice %293 {offsets = [0, 0], sizes = [8, 128], strides = [1, 1]} : vector<8x384xf32> to vector<8x128xf32>
    %296 = vector.extract_strided_slice %294 {offsets = [0, 0], sizes = [8, 128], strides = [1, 1]} : vector<8x384xf32> to vector<8x128xf32>
    %297 = arith.addf %295, %296 : vector<8x128xf32>
    %298 = arith.negf %297 : vector<8x128xf32>
    %299 = math.exp %298 : vector<8x128xf32>
    %cst_122 = arith.constant 1.000000e+00 : f32
    %300 = vector.broadcast %cst_122 : f32 to vector<8x128xf32>
    %301 = arith.addf %300, %299 : vector<8x128xf32>
    %302 = arith.divf %300, %301 : vector<8x128xf32>
    %303 = vector.extract_strided_slice %293 {offsets = [0, 128], sizes = [8, 128], strides = [1, 1]} : vector<8x384xf32> to vector<8x128xf32>
    %304 = vector.extract_strided_slice %294 {offsets = [0, 128], sizes = [8, 128], strides = [1, 1]} : vector<8x384xf32> to vector<8x128xf32>
    %305 = arith.addf %303, %304 : vector<8x128xf32>
    %306 = arith.negf %305 : vector<8x128xf32>
    %307 = math.exp %306 : vector<8x128xf32>
    %cst_123 = arith.constant 1.000000e+00 : f32
    %308 = vector.broadcast %cst_123 : f32 to vector<8x128xf32>
    %309 = arith.addf %308, %307 : vector<8x128xf32>
    %310 = arith.divf %308, %309 : vector<8x128xf32>
    %311 = vector.extract_strided_slice %293 {offsets = [0, 256], sizes = [8, 128], strides = [1, 1]} : vector<8x384xf32> to vector<8x128xf32>
    %312 = vector.extract_strided_slice %294 {offsets = [0, 256], sizes = [8, 128], strides = [1, 1]} : vector<8x384xf32> to vector<8x128xf32>
    %313 = arith.addf %312, %28 : vector<8x128xf32>
    %314 = arith.mulf %302, %313 : vector<8x128xf32>
    %315 = arith.addf %311, %314 : vector<8x128xf32>
    %316 = math.tanh %315 : vector<8x128xf32>
    %cst_124 = arith.constant 1.000000e+00 : f32
    %317 = vector.broadcast %cst_124 : f32 to vector<8x128xf32>
    %318 = arith.subf %317, %310 : vector<8x128xf32>
    %319 = arith.mulf %318, %316 : vector<8x128xf32>
    %320 = arith.mulf %310, %258 : vector<8x128xf32>
    %321 = arith.addf %319, %320 : vector<8x128xf32>
    %c0_125 = arith.constant 0 : index
    %c0_126 = arith.constant 0 : index
    %322 = vector.load %arg15[%c0_125, %c0_126] : memref<8x128xf32, #tpu.memory_space<vmem>>, vector<8x128xf32>
    tpu.vector_store %arg15[%c0_125, %c0_126], %289 {strides = array<i32>} : memref<8x128xf32, #tpu.memory_space<vmem>>, vector<8x128xf32>,
    %c0_127 = arith.constant 0 : index
    %c0_128 = arith.constant 0 : index
    %323 = vector.load %arg16[%c0_127, %c0_128] : memref<8x128xf32, #tpu.memory_space<vmem>>, vector<8x128xf32>
    tpu.vector_store %arg16[%c0_127, %c0_128], %321 {strides = array<i32>} : memref<8x128xf32, #tpu.memory_space<vmem>>, vector<8x128xf32>,
    %324 = arith.index_cast %c3_i32_107 : i32 to index
    %c0_129 = arith.constant 0 : index
    %c0_130 = arith.constant 0 : index
    %325 = vector.load %arg12[%324, %c0_129, %c0_130] : memref<4x8x128xf32, #tpu.memory_space<vmem>>, vector<1x8x128xf32>
    %326 = vector.shape_cast %325 : vector<1x8x128xf32> to vector<8x128xf32>
    %327 = vector.shape_cast %289 : vector<8x128xf32> to vector<1x8x128xf32>
    tpu.vector_store %arg12[%324, %c0_129, %c0_130], %327 {strides = array<i32>} : memref<4x8x128xf32, #tpu.memory_space<vmem>>, vector<1x8x128xf32>,
    %c3_i32_131 = arith.constant 3 : i32
    %328 = arith.subi %c3_i32_131, %c3_i32_107 : i32
    %329 = arith.index_cast %328 : i32 to index
    %c0_132 = arith.constant 0 : index
    %c0_133 = arith.constant 0 : index
    %330 = vector.load %arg13[%329, %c0_132, %c0_133] : memref<4x8x128xf32, #tpu.memory_space<vmem>>, vector<1x8x128xf32>
    %331 = vector.shape_cast %330 : vector<1x8x128xf32> to vector<8x128xf32>
    %332 = vector.shape_cast %321 : vector<8x128xf32> to vector<1x8x128xf32>
    tpu.vector_store %arg13[%329, %c0_132, %c0_133], %332 {strides = array<i32>} : memref<4x8x128xf32, #tpu.memory_space<vmem>>, vector<1x8x128xf32>,
    %c4_i32 = arith.constant 4 : i32
    %c1_i32_134 = arith.constant 1 : i32
    %333 = arith.cmpi eq, %arg0, %c1_i32_134 : i32
    %334 = arith.extui %333 : i1 to i32
    %c0_i32_135 = arith.constant 0 : i32
    %335 = arith.cmpi ne, %334, %c0_i32_135 : i32
    scf.if %335 {
      %c0_136 = arith.constant 0 : index
      %c0_137 = arith.constant 0 : index
      %336 = vector.load %arg15[%c0_136, %c0_137] : memref<8x128xf32, #tpu.memory_space<vmem>>, vector<8x128xf32>
      %c0_138 = arith.constant 0 : index
      %c0_139 = arith.constant 0 : index
      %c0_140 = arith.constant 0 : index
      %337 = vector.load %arg14[%c0_138, %c0_139, %c0_140] : memref<2x8x128xf32, #tpu.memory_space<vmem>>, vector<1x8x128xf32>
      %338 = vector.shape_cast %337 : vector<1x8x128xf32> to vector<8x128xf32>
      %339 = vector.shape_cast %336 : vector<8x128xf32> to vector<1x8x128xf32>
      tpu.vector_store %arg14[%c0_138, %c0_139, %c0_140], %339 {strides = array<i32>} : memref<2x8x128xf32, #tpu.memory_space<vmem>>, vector<1x8x128xf32>,
      %c0_141 = arith.constant 0 : index
      %c0_142 = arith.constant 0 : index
      %340 = vector.load %arg16[%c0_141, %c0_142] : memref<8x128xf32, #tpu.memory_space<vmem>>, vector<8x128xf32>
      %c1 = arith.constant 1 : index
      %c0_143 = arith.constant 0 : index
      %c0_144 = arith.constant 0 : index
      %341 = vector.load %arg14[%c1, %c0_143, %c0_144] : memref<2x8x128xf32, #tpu.memory_space<vmem>>, vector<1x8x128xf32>
      %342 = vector.shape_cast %341 : vector<1x8x128xf32> to vector<8x128xf32>
      %343 = vector.shape_cast %340 : vector<8x128xf32> to vector<1x8x128xf32>
      tpu.vector_store %arg14[%c1, %c0_143, %c0_144], %343 {strides = array<i32>} : memref<2x8x128xf32, #tpu.memory_space<vmem>>, vector<1x8x128xf32>,
    } else {
    }
    return
  }
  func.func @transform_0(%arg0: i32) -> (i32, i32, i32) {
    %c0_i32 = arith.constant 0 : i32
    %c0_i32_0 = arith.constant 0 : i32
    %c0_i32_1 = arith.constant 0 : i32
    return %arg0, %c0_i32, %c0_i32_0 : i32, i32, i32
  }
  func.func @transform_1(%arg0: i32) -> (i32, i32, i32) {
    %c1_i32 = arith.constant 1 : i32
    %0 = arith.subi %c1_i32, %arg0 : i32
    %c0_i32 = arith.constant 0 : i32
    %c0_i32_0 = arith.constant 0 : i32
    %c0_i32_1 = arith.constant 0 : i32
    return %0, %c0_i32, %c0_i32_0 : i32, i32, i32
  }
  func.func @transform_2(%arg0: i32) -> (i32, i32, i32) {
    %c0_i32 = arith.constant 0 : i32
    %c0_i32_0 = arith.constant 0 : i32
    %c0_i32_1 = arith.constant 0 : i32
    %c0_i32_2 = arith.constant 0 : i32
    return %c0_i32, %c0_i32_0, %c0_i32_1 : i32, i32, i32
  }
  func.func @transform_3(%arg0: i32) -> (i32, i32) {
    %c0_i32 = arith.constant 0 : i32
    %c0_i32_0 = arith.constant 0 : i32
    %c0_i32_1 = arith.constant 0 : i32
    return %c0_i32, %c0_i32_0 : i32, i32
  }
  func.func @transform_4(%arg0: i32) -> (i32, i32) {
    %c0_i32 = arith.constant 0 : i32
    %c0_i32_0 = arith.constant 0 : i32
    %c0_i32_1 = arith.constant 0 : i32
    return %c0_i32, %c0_i32_0 : i32, i32
  }
  func.func @transform_5(%arg0: i32) -> (i32, i32) {
    %c0_i32 = arith.constant 0 : i32
    %c0_i32_0 = arith.constant 0 : i32
    %c0_i32_1 = arith.constant 0 : i32
    return %c0_i32, %c0_i32_0 : i32, i32
  }
  func.func @transform_6(%arg0: i32) -> (i32, i32) {
    %c0_i32 = arith.constant 0 : i32
    %c0_i32_0 = arith.constant 0 : i32
    %c0_i32_1 = arith.constant 0 : i32
    return %c0_i32, %c0_i32_0 : i32, i32
  }
  func.func @transform_7(%arg0: i32) -> (i32, i32) {
    %c0_i32 = arith.constant 0 : i32
    %c0_i32_0 = arith.constant 0 : i32
    %c0_i32_1 = arith.constant 0 : i32
    return %c0_i32, %c0_i32_0 : i32, i32
  }
  func.func @transform_8(%arg0: i32) -> (i32, i32) {
    %c0_i32 = arith.constant 0 : i32
    %c0_i32_0 = arith.constant 0 : i32
    %c0_i32_1 = arith.constant 0 : i32
    return %c0_i32, %c0_i32_0 : i32, i32
  }
  func.func @transform_9(%arg0: i32) -> (i32, i32) {
    %c0_i32 = arith.constant 0 : i32
    %c0_i32_0 = arith.constant 0 : i32
    %c0_i32_1 = arith.constant 0 : i32
    return %c0_i32, %c0_i32_0 : i32, i32
  }
  func.func @transform_10(%arg0: i32) -> (i32, i32) {
    %c0_i32 = arith.constant 0 : i32
    %c0_i32_0 = arith.constant 0 : i32
    %c0_i32_1 = arith.constant 0 : i32
    return %c0_i32, %c0_i32_0 : i32, i32
  }
  func.func @transform_11(%arg0: i32) -> (i32, i32, i32) {
    %c0_i32 = arith.constant 0 : i32
    %c0_i32_0 = arith.constant 0 : i32
    %c0_i32_1 = arith.constant 0 : i32
    return %arg0, %c0_i32, %c0_i32_0 : i32, i32, i32
  }
  func.func @transform_12(%arg0: i32) -> (i32, i32, i32) {
    %c1_i32 = arith.constant 1 : i32
    %0 = arith.subi %c1_i32, %arg0 : i32
    %c0_i32 = arith.constant 0 : i32
    %c0_i32_0 = arith.constant 0 : i32
    %c0_i32_1 = arith.constant 0 : i32
    return %0, %c0_i32, %c0_i32_0 : i32, i32, i32
  }
  func.func @transform_13(%arg0: i32) -> (i32, i32, i32) {
    %c0_i32 = arith.constant 0 : i32
    %c0_i32_0 = arith.constant 0 : i32
    %c0_i32_1 = arith.constant 0 : i32
    %c0_i32_2 = arith.constant 0 : i32
    return %c0_i32, %c0_i32_0, %c0_i32_1 : i32, i32, i32
  }
}

</mosaic_0001>

<bundles_post_ra>
// kernel: tpu_custom_call.1
= control target key start
LH: loop header
LB: loop body
LE: loop exit
PB: predicated region body
PF: predicated region fallthrough
CT: control target
= control target key end

     0   :  { %s5759_s0 = inlined_call_operand.hbm [shape: f32[8,8,128], index: 0, kind: input, shape index: {}]   ;;  %s5760_s1 = inlined_call_operand.hbm [shape: f32[8,8,128], index: 1, kind: input, shape index: {}]   ;;  %s5761_s2 = inlined_call_operand.hbm [shape: f32[2,8,128], index: 2, kind: input, shape index: {}]   ;;  %s5762_s3 = inlined_call_operand.hbm [shape: f32[128,384], index: 3, kind: input, shape index: {}]   ;;  %s5763_s4 = inlined_call_operand.hbm [shape: f32[128,384], index: 4, kind: input, shape index: {}]   ;;  %s5764_s5 = inlined_call_operand.vmem [shape: f32[1,384], index: 5, kind: input, shape index: {}]   ;;  %s5765_s6 = inlined_call_operand.vmem [shape: f32[1,128], index: 6, kind: input, shape index: {}]   ;;  %s5766_s7 = inlined_call_operand.hbm [shape: f32[128,384], index: 7, kind: input, shape index: {}]   ;;  %s5767_s8 = inlined_call_operand.hbm [shape: f32[128,384], index: 8, kind: input, shape index: {}]   ;;  %s5768_s9 = inlined_call_operand.vmem [shape: f32[1,384], index: 9, kind: input, shape index: {}]   ;;  %s5769_s10 = inlined_call_operand.vmem [shape: f32[1,128], index: 10, kind: input, shape index: {}]   ;;  %s5770_s11 = inlined_call_operand.hbm [shape: f32[8,8,128], index: 11, kind: output, shape index: {0}]   ;;  %s5771_s12 = inlined_call_operand.hbm [shape: f32[8,8,128], index: 12, kind: output, shape index: {1}]   ;;  %s5772_s13 = inlined_call_operand.hbm [shape: f32[2,8,128], index: 13, kind: output, shape index: {2}]  }
   0x1   :  { %5818 = sst [smem:[#allocation50_spill]] %s5759_s0 }
   0x2   :  { %5819 = sst [smem:[#allocation51_spill]] %s5760_s1 }
   0x3   :  { %5820 = sst [smem:[#allocation52_spill]] %s5761_s2 }
   0x4   :  { %5821 = sst [smem:[#allocation53_spill]] %s5762_s3 }
   0x5   :  { %5822 = sst [smem:[#allocation54_spill]] %s5763_s4 }
   0x6   :  { %5823 = sst [smem:[#allocation55_spill]] %s5764_s5 }
   0x7   :  { %5824 = sst [smem:[#allocation56_spill]] %s5765_s6 }
   0x8   :  { %5825 = sst [smem:[#allocation57_spill]] %s5766_s7 }
   0x9   :  { %5826 = sst [smem:[#allocation58_spill]] %s5768_s9 }
   0xa   :  { %5827 = sst [smem:[#allocation59_spill]] %s5769_s10 }
   0xb   :  { %5828 = sst [smem:[#allocation60_spill]] %s5770_s11 }
   0xc   :  { %5829 = sst [smem:[#allocation61_spill]] %s5771_s12 }
   0xd   :  { %5830 = sst [smem:[#allocation62_spill]] %s5772_s13 }
   0xe   :  { %19 = vsyncpa [#allocation7], 0 }
   0xf   :  { %21 = vsyncpa [#allocation7 + $0x1], 0 }
  0x10   :  { %22 = vsyncpa [#allocation10], 0 }
  0x11   :  { %24 = vsyncpa [#allocation10 + $0x1], 0 }
  0x12   :  { %25 = vsyncpa [#allocation13], 0 }
  0x13   :  { %26 = vsyncpa [#allocation16], 0 }
  0x14   :  { %27 = vsyncpa [#allocation8], 0 }
  0x15   :  { %29 = vsyncpa [#allocation8 + $0x1], 0 }
  0x16   :  { %30 = vsyncpa [#allocation20], 0 }
  0x17   :  { %32 = vsyncpa [#allocation20 + $0x1], 0  ;;  %s4716_s25 = smov 0   ;;  %s4718_s26 = smov 0  }
  0x18   :  { %s4720_s27 = smov 0   ;;  %s4722_s28 = smov 0  }
  0x19   :  { %s4724_s29 = smov 0   ;;  %s4726_s30 = smov 0  }
  0x1a   :  { %s4728_s14 = smov 0  }
  0x1b LB: > { %s4627_s15 = smov [#allocation11]   ;;  %s4752_s17 = sadd.s32 4294967295, %s4625_s14   ;;  %s4625_s14 = sphi %s4728_s14, %s5941_s14   ;;  %s4621_s30 = sphi %s4726_s30, %s5940_s30   ;;  %s4617_s29 = sphi %s4724_s29, %s5939_s29   ;;  %s4613_s28 = sphi %s4722_s28, %s5938_s28   ;;  %s4609_s27 = sphi %s4720_s27, %s5937_s27   ;;  %s4605_s26 = sphi %s4718_s26, %s5936_s26   ;;  %s4601_s25 = sphi %s4716_s25, %s5935_s25  }
  0x1c   : > { %s373_s16 = sshll.u32 %s4627_s15, 4  ;;  %p2827_p0 = scmp.ge.s32.totalorder %s4625_s14, 1  ;;  %s4758_s16 = int_to_ptr.vmem [resolvable:$true] %s373_s16 }
  0x1d   : > { %p5779_p1 = scmp.eq.s32.totalorder %s4752_s17, 0  ;;  %p361_p2 = scmp.lt.s32.totalorder %s4625_s14, 3 }
  0x1e   : > { %s4628_s19 = smov [#allocation12]   ;;  %s4629_s22 = smov [#allocation15]  }
  0x1f   : > { %p4760_p4 = pnand %p2827_p0, %p361_p2  ;;  %s386_s20 = sshll.u32 %s4628_s19, 4  ;;  %s4773_s20 = int_to_ptr.vmem [resolvable:$true] %s386_s20 }
  0x20   : > { %s4775_s23 = sshll.u32 %s4629_s22, 4  ;;  %s5834_s2 = sld [smem:[#allocation52_spill]]  ;;  %s419_s23 = int_to_ptr.vmem [resolvable:$true] %s4775_s23 }
  0x21   : > { %s5831_s18 = scalar_select %p4760_p4, 1, 0 }
  0x22   : > { %p4062_p6 = pneg %p4760_p4 }
  0x23   : > { %5832 = sst [smem:[#allocation30_spill]] %s5831_s18 }
  0x24   : > { %p4769_p7 = pnand %p4062_p6, %p5779_p1 }
  0x26   : > { %s4257_s13 = scalar_lea.hbm %s5834_s2, 256  ;;  %p4785_p9 = pneg %p4769_p7 }
  0x27   : > { %p4258_p8 = scmp.ne.s32.totalorder %s5834_s2, %s4257_s13  ;;  %p4264_p12 = scmp.lt.u32.totalorder %s4257_s13, %s5834_s2 }
  0x29   : > { %p4260_p10 = pnand %p4785_p9, %p4258_p8 }
  0x2b   : > { %p4261_p11 = pneg %p4260_p10 }
  0x2d   : > { %p4266_p13 = pnand %p4264_p12, %p4261_p11 }
  0x2f   : > { %4269 = shalt.err (!%p4266_p13)
}
  0x30   : > { %s4270_s11 = scalar_lea.vmem %s4758_s16, 256  ;;  %p4278_p5 = scmp.lt.s32.totalorder %s4758_s16, %s4758_s16 }
  0x31   : > { %p4271_p0 = scmp.ne.s32.totalorder %s4758_s16, %s4270_s11  ;;  %p4279_p3 = scmp.lt.s32.totalorder %s4270_s11, %s4270_s11 }
  0x33   : > { %p4273_p2 = pnand %p4271_p0, %p4785_p9  ;;  %p4280_p8 = por %p4279_p3, %p4278_p5 }
  0x35   : > { %p4274_p6 = pneg %p4273_p2 }
  0x37   : > { %p4281_p10 = pnand %p4280_p8, %p4274_p6 }
  0x39   : > { %4284 = shalt.err (!%p4281_p10)
}
  0x3a   : > { %s5777_s12 = smov 128   ;;  %s5781_s10 = smov 8  }
  0x3b   : > { %4065 = dma.hbm_to_vmem [thread:$0]  (!%p4769_p7), %s5834_s2, 256, %s4758_s16, [#allocation10], %s5777_s12, %s5777_s12, %s5781_s10  }
  0x3c   : > { %s5836_s3 = sld [smem:[#allocation53_spill]] }
  0x42   : > { %s4285_s11 = scalar_lea.hbm %s5836_s3, 6144 }
  0x43   : > { %p4286_p3 = scmp.ne.s32.totalorder %s5836_s3, %s4285_s11  ;;  %p4292_p12 = scmp.lt.u32.totalorder %s4285_s11, %s5836_s3 }
  0x45   : > { %p4288_p5 = pnand %p4286_p3, %p4785_p9 }
  0x47   : > { %p4289_p11 = pneg %p4288_p5 }
  0x49   : > { %p4294_p13 = pnand %p4292_p12, %p4289_p11 }
  0x4b   : > { %4297 = shalt.err (!%p4294_p13)
}
  0x4c   : > { %s4298_s16 = scalar_lea.vmem %s4773_s20, 6144  ;;  %p4306_p8 = scmp.lt.s32.totalorder %s4773_s20, %s4773_s20 }
  0x4d   : > { %p4299_p0 = scmp.ne.s32.totalorder %s4773_s20, %s4298_s16  ;;  %p4307_p10 = scmp.lt.s32.totalorder %s4298_s16, %s4298_s16 }
  0x4f   : > { %p4301_p2 = pnand %p4299_p0, %p4785_p9  ;;  %p4308_p3 = por %p4307_p10, %p4306_p8 }
  0x51   : > { %p4302_p6 = pneg %p4301_p2 }
  0x53   : > { %p4309_p5 = pnand %p4308_p3, %p4302_p6 }
  0x55   : > { %4312 = shalt.err (!%p4309_p5)
}
  0x56   : > { %s4632_s6 = smov 384   ;;  %s4633_s5 = smov 24  }
  0x57   : > { %4068 = dma.hbm_to_vmem [thread:$0]  (!%p4769_p7), %s5836_s3, 6144, %s4773_s20, [#allocation13], %s4632_s6, %s4632_s6, %s4633_s5  }
  0x58   : > { %s5837_s7 = sld [smem:[#allocation57_spill]] }
  0x5e   : > { %s4313_s15 = scalar_lea.hbm %s5837_s7, 6144 }
  0x5f   : > { %p4314_p11 = scmp.ne.s32.totalorder %s5837_s7, %s4313_s15  ;;  %p4320_p0 = scmp.lt.u32.totalorder %s4313_s15, %s5837_s7 }
  0x61   : > { %p4316_p12 = pnand %p4314_p11, %p4785_p9 }
  0x63   : > { %p4317_p13 = pneg %p4316_p12 }
  0x65   : > { %p4322_p2 = pnand %p4320_p0, %p4317_p13 }
  0x67   : > { %4325 = shalt.err (!%p4322_p2)
}
  0x68   : > { %s4326_s9 = scalar_lea.vmem %s419_s23, 6144  ;;  %p4334_p3 = scmp.lt.s32.totalorder %s419_s23, %s419_s23 }
  0x69   : > { %p4327_p6 = scmp.ne.s32.totalorder %s419_s23, %s4326_s9  ;;  %p4335_p5 = scmp.lt.s32.totalorder %s4326_s9, %s4326_s9 }
  0x6b   : > { %p4329_p8 = pnand %p4327_p6, %p4785_p9  ;;  %p4336_p1 = por %p4335_p5, %p4334_p3 }
  0x6d   : > { %p4330_p10 = pneg %p4329_p8 }
  0x6f   : > { %p4337_p4 = pnand %p4336_p1, %p4330_p10 }
  0x71   : > { %4340 = shalt.err (!%p4337_p4)
}
  0x72   : > { %4074 = dma.hbm_to_vmem [thread:$0]  (!%p4769_p7), %s5837_s7, 6144, %s419_s23, [#allocation16], %s4632_s6, %s4632_s6, %s4633_s5  }
  0x73   : > { %s4634_s18 = smov [#allocation14]   ;;  %s4635_s24 = smov [#allocation17]  }
  0x74   : > { %s399_s13 = sshll.u32 %s4634_s18, 4  ;;  %s431_s15 = sshll.u32 %s4635_s24, 4  ;;  %s400_s13 = int_to_ptr.vmem [resolvable:$true] %s399_s13  ;;  %s432_s15 = int_to_ptr.vmem [resolvable:$true] %s431_s15 }
  0x75   : > { %s5838_s4 = sld [smem:[#allocation54_spill]] }
  0x7b   : > { %s4341_s16 = scalar_lea.hbm %s5838_s4, 6144 }
  0x7c   : > { %p4342_p1 = scmp.ne.s32.totalorder %s5838_s4, %s4341_s16  ;;  %p4348_p12 = scmp.lt.u32.totalorder %s4341_s16, %s5838_s4 }
  0x7e   : > { %p4344_p4 = pnand %p4342_p1, %p4785_p9 }
  0x80   : > { %p4345_p11 = pneg %p4344_p4 }
  0x82   : > { %p4350_p13 = pnand %p4348_p12, %p4345_p11 }
  0x84   : > { %4353 = shalt.err (!%p4350_p13)
}
  0x85   : > { %s4354_s23 = scalar_lea.vmem %s400_s13, 6144  ;;  %p4362_p8 = scmp.lt.s32.totalorder %s400_s13, %s400_s13 }
  0x86   : > { %p4355_p0 = scmp.ne.s32.totalorder %s400_s13, %s4354_s23  ;;  %p4363_p10 = scmp.lt.s32.totalorder %s4354_s23, %s4354_s23 }
  0x88   : > { %p4357_p2 = pnand %p4355_p0, %p4785_p9  ;;  %p4364_p3 = por %p4363_p10, %p4362_p8 }
  0x8a   : > { %p4358_p6 = pneg %p4357_p2 }
  0x8c   : > { %p4365_p5 = pnand %p4364_p3, %p4358_p6 }
  0x8e   : > { %4368 = shalt.err (!%p4365_p5)
}
  0x8f   : > { %4071 = dma.hbm_to_vmem [thread:$0]  (!%p4769_p7), %s5838_s4, 6144, %s400_s13, [#allocation13], %s4632_s6, %s4632_s6, %s4633_s5  }
  0x90   : > { %s4369_s24 = scalar_lea.hbm %s5767_s8, 6144 }
  0x91   : > { %p4370_p1 = scmp.ne.s32.totalorder %s5767_s8, %s4369_s24  ;;  %p4376_p12 = scmp.lt.u32.totalorder %s4369_s24, %s5767_s8 }
  0x93   : > { %p4372_p4 = pnand %p4370_p1, %p4785_p9 }
  0x95   : > { %p4373_p11 = pneg %p4372_p4 }
  0x97   : > { %p4378_p13 = pnand %p4376_p12, %p4373_p11 }
  0x99   : > { %4381 = shalt.err (!%p4378_p13)
}
  0x9a   : > { %s4382_s20 = scalar_lea.vmem %s432_s15, 6144  ;;  %p4390_p8 = scmp.lt.s32.totalorder %s432_s15, %s432_s15 }
  0x9b   : > { %p4383_p0 = scmp.ne.s32.totalorder %s432_s15, %s4382_s20  ;;  %p4391_p10 = scmp.lt.s32.totalorder %s4382_s20, %s4382_s20 }
  0x9d   : > { %p4385_p2 = pnand %p4383_p0, %p4785_p9  ;;  %p4392_p3 = por %p4391_p10, %p4390_p8 }
  0x9f   : > { %p4386_p6 = pneg %p4385_p2 }
  0xa1   : > { %p4393_p5 = pnand %p4392_p3, %p4386_p6 }
  0xa3   : > { %4396 = shalt.err (!%p4393_p5)
}
  0xa4   : > { %4077 = dma.hbm_to_vmem [thread:$0]  (!%p4769_p7), %s5767_s8, 6144, %s432_s15, [#allocation16], %s4632_s6, %s4632_s6, %s4633_s5  }
  0xa5   : > { %s5788_s21 = sadd.s32 4294967294, %s4625_s14   ;;  %s45_s19 = sadd.s32 1, %s4621_s30 }
  0xa6   : > { %p52_p9 = scmp.ne.s32.totalorder %s4621_s30, %s4617_s29  ;;  %p5785_p1 = scmp.eq.s32.totalorder %s4625_s14, 0 }
  0xa7   : > { %p58_p4 = scmp.ne.s32.totalorder %s4617_s29, %s4613_s28  ;;  %p5784_p11 = scmp.eq.s32.totalorder %s4752_s17, 1 }
  0xa8   : > { %p4909_p12 = scmp.eq.s32.totalorder %s5788_s21, 1  ;;  %p54_p13 = por %p5785_p1, %p52_p9 }
  0xa9   : > { %p5840_p0 = scmp.eq.s32.totalorder %s4752_s17, 0  ;;  %p4923_p7 = por %p5784_p11, %p52_p9 }
  0xaa   : > { %p4929_p6 = por %p4909_p12, %p58_p4  ;;  %p5783_p8 = scmp.lt.s32.totalorder %s4625_s14, 2 }
  0xab   : > { %p4917_p2 = por %p5840_p0, %p58_p4  ;;  %s451_s15 = sand.u32 1, %s4621_s30  }
  0xac   : > { %s5842_s6 = scalar_select %p4923_p7, 1, 0 }
  0xad   : > { %s5841_s10 = scalar_select %p4917_p2, 1, 0 }
  0xae   : > { %s5843_s5 = scalar_select %p4929_p6, 1, 0 }
  0xaf   : > { %s2834_s12 = sshll.u32 %s451_s15, 5  ;;  %s2886_s18 = sshll.u32 %s4625_s14, 9 }
  0xb0   : > { %s5844_s0 = sld [smem:[#allocation50_spill]]  ;;  %s455_s16 = scalar_lea.vmem [#allocation6], %s2834_s12 }
  0xb1   : > { %s462_s9 = sshll.u32 %s455_s16, 4  ;;  %p4945_p10 = pnand %p5783_p8, %p54_p13  ;;  %s4941_s9 = int_to_ptr.vmem [resolvable:$true] %s462_s9 }
  0xb2   : > { %s4949_s13 = scalar_lea.sflag [#allocation7], %s451_s15 }
  0xb3   : > { %p4399_p5 = pneg %p4945_p10 }
  0xb6   : > { %s4939_s11 = scalar_lea.hbm %s5844_s0, %s2886_s18  ;;  %s4402_s24 = scalar_lea.hbm %s5844_s0, 1024 }
  0xb7   : > { %s4397_s23 = scalar_lea.hbm %s4939_s11, 512  ;;  %p4403_p13 = scmp.lt.u32.totalorder %s4939_s11, %s5844_s0 }
  0xb8   : > { %p4398_p3 = scmp.ne.s32.totalorder %s4939_s11, %s4397_s23  ;;  %p4404_p0 = scmp.lt.u32.totalorder %s4402_s24, %s4397_s23 }
  0xb9   : > { %p4406_p11 = scmp.lt.u32.totalorder %s4397_s23, %s4939_s11 }
  0xba   : > { %p4400_p9 = pnand %p4399_p5, %p4398_p3  ;;  %p4405_p8 = por %p4404_p0, %p4403_p13 }
  0xbc   : > { %p4401_p4 = pneg %p4400_p9  ;;  %p4407_p1 = por %p4406_p11, %p4405_p8 }
  0xbe   : > { %p4408_p6 = pnand %p4407_p1, %p4401_p4 }
  0xc0   : > { %4411 = shalt.err (!%p4408_p6)
}
  0xc1   : > { %s4412_s15 = scalar_lea.vmem %s4941_s9, 512  ;;  %s4636_s12 = smov [#allocation6]  }
  0xc2   : > { %p4413_p3 = scmp.ne.s32.totalorder %s4941_s9, %s4412_s15  ;;  %s4417_s18 = sshll.u32 %s4636_s12, 4  ;;  %s4418_s18 = int_to_ptr.vmem [resolvable:$false] %s4417_s18 }
  0xc3   : > { %s4419_s22 = scalar_lea.vmem %s4418_s18, 1024  ;;  %p4420_p2 = scmp.lt.s32.totalorder %s4941_s9, %s4418_s18 }
  0xc4   : > { %p4415_p9 = pnand %p4413_p3, %p4399_p5  ;;  %p4421_p13 = scmp.lt.s32.totalorder %s4419_s22, %s4412_s15 }
  0xc6   : > { %p4416_p7 = pneg %p4415_p9  ;;  %p4422_p0 = por %p4421_p13, %p4420_p2 }
  0xc8   : > { %p4423_p11 = pnand %p4422_p0, %p4416_p7 }
  0xca   : > { %4426 = shalt.err (!%p4423_p11)
}
  0xcb   : > { %s5846_s23 = smov 8   ;;  %s5847_s24 = smov 128  }
  0xcc   : > { %4081 = dma.hbm_to_vmem [thread:$0]  (!%p4945_p10), %s4939_s11, 512, %s4941_s9, %s4949_s13, %s5847_s24, %s5847_s24, %s5846_s23  }
  0xcd   : > { %s4981_s20 = sadd.s32 1, %s4625_s14   ;;  %s68_s15 = ssub.s32 1, %s4625_s14 }
  0xce   : > { %s42_s16 = ssub.s32 %s4625_s14, %s4981_s20  ;;  %s69_s12 = ssub.s32 1, %s4981_s20 }
  0xcf   : > { %p43_p1 = scmp.eq.s32.totalorder %s42_s16, 0  ;;  %s70_s18 = ssub.s32 %s68_s15, %s69_s12 }
  0xd0   : > { %s73_s22 = sadd.s32 1, %s4609_s27  ;;  %p71_p2 = scmp.eq.s32.totalorder %s70_s18, 0 }
  0xd1   : > { %s4991_s21 = scalar_select %p43_p1, %s4621_s30, %s45_s19  }
  0xd2   : > { %p80_p7 = scmp.ne.s32.totalorder %s4609_s27, %s4605_s26  ;;  %p86_p6 = scmp.ne.s32.totalorder %s4605_s26, %s4601_s25 }
  0xd3   : > { %s472_s11 = sand.u32 1, %s4625_s14   ;;  %p5848_p8 = scmp.eq.s32.totalorder %s4625_s14, 0 }
  0xd4   : > { %s4999_s9 = scalar_select %p71_p2, %s4609_s27, %s73_s22  }
  0xd5   : > { %p82_p10 = por %p80_p7, %p5848_p8  ;;  %p5849_p5 = scmp.eq.s32.totalorder %s4752_s17, 0 }
  0xd6   : > { %p5851_p3 = scmp.eq.s32.totalorder %s4752_s17, 1  ;;  %p5017_p13 = por %p4909_p12, %p86_p6 }
  0xd7   : > { %p5005_p4 = por %p86_p6, %p5849_p5  ;;  %s474_s25 = sand.u32 1, %s4609_s27  }
  0xd8   : > { %p5011_p9 = por %p5851_p3, %p80_p7  ;;  %s2837_s12 = sshll.u32 %s474_s25, 5 }
  0xd9   : > { %s5853_s19 = scalar_select %p5017_p13, 1, 0 }
  0xda   : > { %s5852_s16 = scalar_select %p5011_p9, 1, 0 }
  0xdb   : > { %s2887_s18 = sshll.u32 %s68_s15, 9  ;;  %s5854_s1 = sld [smem:[#allocation51_spill]] }
  0xdc   : > { %s476_s4 = scalar_lea.vmem [#allocation9], %s2837_s12  ;;  %p5855_p0 = scmp.lt.s32.totalorder %s4625_s14, 2 }
  0xdd   : > { %s484_s7 = sshll.u32 %s476_s4, 4  ;;  %s5035_s15 = scalar_lea.sflag [#allocation10], %s472_s11  ;;  %s5033_s7 = int_to_ptr.vmem [resolvable:$true] %s484_s7 }
  0xde   : > { %p5029_p11 = pnand %p5855_p0, %p82_p10 }
  0xe0   : > { %p4429_p1 = pneg %p5029_p11 }
  0xe1   : > { %s5025_s3 = scalar_lea.hbm %s5854_s1, %s2887_s18  ;;  %s4432_s12 = scalar_lea.hbm %s5854_s1, 1024 }
  0xe2   : > { %s4427_s0 = scalar_lea.hbm %s5025_s3, 512  ;;  %p4433_p6 = scmp.lt.u32.totalorder %s5025_s3, %s5854_s1 }
  0xe3   : > { %p4428_p12 = scmp.ne.s32.totalorder %s5025_s3, %s4427_s0  ;;  %p4434_p8 = scmp.lt.u32.totalorder %s4432_s12, %s4427_s0 }
  0xe4   : > { %p4436_p5 = scmp.lt.u32.totalorder %s4427_s0, %s5025_s3 }
  0xe5   : > { %p4430_p2 = pnand %p4429_p1, %p4428_p12  ;;  %p4435_p10 = por %p4434_p8, %p4433_p6 }
  0xe7   : > { %p4431_p7 = pneg %p4430_p2  ;;  %p4437_p3 = por %p4436_p5, %p4435_p10 }
  0xe9   : > { %p4438_p0 = pnand %p4437_p3, %p4431_p7 }
  0xeb   : > { %4441 = shalt.err (!%p4438_p0)
}
  0xec   : > { %s4442_s11 = scalar_lea.vmem %s5033_s7, 512  ;;  %s4637_s4 = smov [#allocation9]  }
  0xed   : > { %p4443_p12 = scmp.ne.s32.totalorder %s5033_s7, %s4442_s11  ;;  %s4447_s25 = sshll.u32 %s4637_s4, 4  ;;  %s4448_s25 = int_to_ptr.vmem [resolvable:$false] %s4447_s25 }
  0xee   : > { %s4449_s18 = scalar_lea.vmem %s4448_s25, 1024  ;;  %p4450_p9 = scmp.lt.s32.totalorder %s5033_s7, %s4448_s25 }
  0xef   : > { %p4445_p2 = pnand %p4443_p12, %p4429_p1  ;;  %p4451_p6 = scmp.lt.s32.totalorder %s4449_s18, %s4442_s11 }
  0xf1   : > { %p4446_p13 = pneg %p4445_p2  ;;  %p4452_p8 = por %p4451_p6, %p4450_p9 }
  0xf3   : > { %p4453_p10 = pnand %p4452_p8, %p4446_p13 }
  0xf5   : > { %4456 = shalt.err (!%p4453_p10)
}
  0xf6   : > { %4084 = dma.hbm_to_vmem [thread:$0]  (!%p5029_p11), %s5025_s3, 512, %s5033_s7, %s5035_s15, %s5847_s24, %s5847_s24, %s5846_s23  }
  0xf7   : > { %s5857_s0 = sld [smem:[#allocation30_spill]] }
  0xfd   : > { %p5858_p1 = scmp.ne.s32.totalorder %s5857_s0, 0 }
  0xff   : > { %496 = sbr.rel (%p5858_p1) target bundleno = 1556 (0x614), region = 64 }
 0x106   : > { %s5069_s12 = sand.u32 1, %s4617_s29   ;;  %p5859_p9 = scmp.ne.s32.totalorder %s5841_s10, 0 }
 0x107   : > { %s2841_s22 = sshll.u32 %s5069_s12, 5  ;;  %s499_s11 = scalar_lea.sflag [#allocation7], %s5069_s12 }
 0x108   : > { %s5073_s4 = scalar_lea.vmem [#allocation6], %s2841_s22 }
 0x109   : > { %4568 = dma.done.wait (%p5859_p9), %s499_s11, 512  }
 0x10a   : > { %4570 = vsyncadd (%p5859_p9), %s499_s11, 4294966784  ;;  %s507_s3 = sand.u32 1, %s4752_s17   ;;  %s509_s7 = sand.u32 1, %s4605_s26  }
 0x10b   : > { %s2842_s23 = sshll.u32 %s509_s7, 5  ;;  %s508_s24 = scalar_lea.sflag [#allocation10], %s507_s3 }
 0x10c   : > { %s5083_s2 = scalar_lea.vmem [#allocation9], %s2842_s23 }
 0x10d   : > { %4572 = dma.done.wait (%p5005_p4), %s508_s24, 512  }
 0x10e   : > { %4574 = vsyncadd (%p5005_p4), %s508_s24, 4294966784  ;;  %p5860_p13 = scmp.eq.s32.totalorder %s4752_s17, 0 }
 0x110   : > { %4576 = dma.done.wait (%p5860_p13), [#allocation10], 256   ;;  %p5861_p11 = pmov %p5860_p13 }
 0x112   : > { %4578 = vsyncadd (%p5861_p11), [#allocation10], 4294967040  ;;  %p5862_p7 = pmov %p5861_p11 }
 0x114   : > { %4580 = dma.done.wait (%p5862_p7), [#allocation13], 12288   ;;  %p5863_p5 = pmov %p5862_p7 }
 0x116   : > { %4582 = vsyncadd (%p5863_p5), [#allocation13], 4294955008  ;;  %p5864_p3 = pmov %p5863_p5 }
 0x118   : > { %4584 = dma.done.wait (%p5864_p3), [#allocation16], 12288   ;;  %p5865_p0 = pmov %p5864_p3 }
 0x119   : > { %s5101_s10 = scalar_lea.vmem [#allocation18], %s2841_s22  ;;  %s5103_s13 = scalar_lea.vmem [#allocation19], %s2842_s23 }
 0x11a   : > { %4586 = vsyncadd (%p5865_p0), [#allocation16], 4294955008  ;;  %p5866_p4 = scmp.ne.s32.totalorder %s4752_s17, 0 }
 0x11b   : > { %v594_v0 = vld [vmem:[#allocation11] sm:$0xff] (!%p5866_p4)  ;;  %v597_v1 = vld [vmem:[#allocation11 + $0x8] sm:$0xff] (!%p5866_p4) }
 0x11c   : > { %593 = sbr.rel (%p5866_p4) target bundleno = 291 (0x123), region = 96  ;;  %595 = vst [vmem:[#allocation2] sm:$0xff] (!%p5866_p4), %v594_v0  ;;  %598 = vst [vmem:[#allocation3] sm:$0xff] (!%p5866_p4), %v597_v1 }
 0x123 PF: > { %v608_v2 = vld [vmem:[#allocation12 + $0x8] sm:$0xff]  ;;  %v611_v3 = vld [vmem:[#allocation12 + $0x20] sm:$0xff]  ;;  %v610_v6 = vld [vmem:[#allocation12 + $0x18] sm:$0xff]  ;;  %v5790_v9 = vmov 0.0   ;;  %vm4640_vm0 = vmmov 0   ;;  %s5877_s18 = sld [smem:[#allocation55_spill]] }
 0x124   : > { %v607_v4 = vld [vmem:[#allocation12] sm:$0xff]  ;;  %v3422_v5 = vpack.c.bf16 %v611_v3, %v608_v2  ;;  %v614_v7 = vld [vmem:[#allocation12 + $0x38] sm:$0xff]  ;;  %v617_v8 = vld [vmem:[#allocation12 + $0x50] sm:$0xff]  ;;  %736 = vmatprep.mubr.f32.mxu0 %v5790_v9  ;;  %s5881_s11 = sld [smem:[#allocation58_spill]]  ;;  %s5887_s23 = sld [smem:[#allocation56_spill]] }
 0x125   : > { %v3424_v10 = vpack.c.bf16 %v610_v6, %v607_v4  ;;  %v3426_v11 = vpack.c.bf16 %v617_v8, %v614_v7  ;;  %v613_v12 = vld [vmem:[#allocation12 + $0x30] sm:$0xff]  ;;  %v616_v13 = vld [vmem:[#allocation12 + $0x48] sm:$0xff]  ;;  %v623_v15 = vld [vmem:[#allocation12 + $0x80] sm:$0xff]  ;;  %s5891_s15 = sld [smem:[#allocation59_spill]]  ;;  %p2875_p12 = scmp.ne.s32.totalorder %s4752_s17, 1 }
 0x126   : > { %v620_v14 = vld [vmem:[#allocation12 + $0x68] sm:$0xff]  ;;  %3423 = vmatprep.subr.bf16.mxu0 %v3422_v5  ;;  %v3428_v16 = vpack.c.bf16 %v616_v13, %v613_v12  ;;  %v619_v18 = vld [vmem:[#allocation12 + $0x60] sm:$0xff]  ;;  %v622_v19 = vld [vmem:[#allocation12 + $0x78] sm:$0xff] }
 0x127   : > { %3425 = vmatpush1.bf16.msra.mxu0 %v3424_v10  ;;  %v3430_v17 = vpack.c.bf16 %v623_v15, %v620_v14  ;;  %v626_v20 = vld [vmem:[#allocation12 + $0x98] sm:$0xff]  ;;  %v629_v21 = vld [vmem:[#allocation12 + $0xb0] sm:$0xff]  ;;  %v3432_v22 = vpack.c.bf16 %v622_v19, %v619_v18  ;;  %v628_v25 = vld [vmem:[#allocation12 + $0xa8] sm:$0xff] }
 0x128   : > { %3427 = vmatprep.subr.bf16.mxu0 %v3426_v11  ;;  %v625_v23 = vld [vmem:[#allocation12 + $0x90] sm:$0xff]  ;;  %v3434_v24 = vpack.c.bf16 %v629_v21, %v626_v20  ;;  %v612_v27 = vld [vmem:[#allocation12 + $0x28] sm:$0xff]  ;;  %v635_v29 = vld [vmem:[#allocation12 + $0xe0] sm:$0xff] }
 0x129   : > { %v609_v26 = vld [vmem:[#allocation12 + $0x10] sm:$0xff]  ;;  %v632_v28 = vld [vmem:[#allocation12 + $0xc8] sm:$0xff]  ;;  %v615_v31 = vld [vmem:[#allocation12 + $0x40] sm:$0xff]  ;;  %v3436_v33 = vpack.c.bf16 %v628_v25, %v625_v23 }
 0x12a   : > { %v3454_v30 = vpack.c.bf16 %v612_v27, %v609_v26  ;;  %v618_v32 = vld [vmem:[#allocation12 + $0x58] sm:$0xff]  ;;  %v631_v34 = vld [vmem:[#allocation12 + $0xc0] sm:$0xff]  ;;  %v3438_v37 = vpack.c.bf16 %v635_v29, %v632_v28  ;;  %v5109_v38 = vld [vmem:[%s5073_s4] sm:$0xff] }
 0x12b   : > { %3429 = vmatpush1.bf16.msra.mxu0 %v3428_v16  ;;  %v634_v35 = vld [vmem:[#allocation12 + $0xd8] sm:$0xff]  ;;  %v3458_v36 = vpack.c.bf16 %v618_v32, %v615_v31  ;;  %v621_v39 = vld [vmem:[#allocation12 + $0x70] sm:$0xff]  ;;  %v624_v40 = vld [vmem:[#allocation12 + $0x88] sm:$0xff]  ;;  %3098 = vmatprep.mubr.f32.mxu1 %v5109_v38 }
 0x12c   : > { %3431 = vmatprep.subr.bf16.mxu0 %v3430_v17  ;;  %3455 = vmatprep.subr.bf16.mxu1 %v3454_v30  ;;  %v638_v41 = vld [vmem:[#allocation12 + $0xf8] sm:$0xff]  ;;  %v641_v42 = vld [vmem:[#allocation12 + $0x110] sm:$0xff]  ;;  %v3462_v43 = vpack.c.bf16 %v624_v40, %v621_v39  ;;  %v627_v44 = vld [vmem:[#allocation12 + $0xa0] sm:$0xff]  ;;  %v3440_v46 = vpack.c.bf16 %v634_v35, %v631_v34 }
 0x12d   : > { %3457 = vmatpush3.bf16.msra.mxu1 %v3454_v30  ;;  %v630_v45 = vld [vmem:[#allocation12 + $0xb8] sm:$0xff]  ;;  %v3442_v47 = vpack.c.bf16 %v641_v42, %v638_v41  ;;  %v637_v48 = vld [vmem:[#allocation12 + $0xf0] sm:$0xff]  ;;  %v640_v49 = vld [vmem:[#allocation12 + $0x108] sm:$0xff] }
 0x12e   : > { %3459 = vmatprep.subr.bf16.mxu1 %v3458_v36  ;;  %v644_v50 = vld [vmem:[#allocation12 + $0x128] sm:$0xff]  ;;  %v647_v51 = vld [vmem:[#allocation12 + $0x140] sm:$0xff]  ;;  %v3466_v52 = vpack.c.bf16 %v630_v45, %v627_v44  ;;  %v633_v53 = vld [vmem:[#allocation12 + $0xd0] sm:$0xff]  ;;  %v3444_v55 = vpack.c.bf16 %v640_v49, %v637_v48 }
 0x12f   : > { %3433 = vmatpush1.bf16.msra.mxu0 %v3432_v22  ;;  %v636_v54 = vld [vmem:[#allocation12 + $0xe8] sm:$0xff]  ;;  %v3446_v56 = vpack.c.bf16 %v647_v51, %v644_v50  ;;  %v643_v57 = vld [vmem:[#allocation12 + $0x120] sm:$0xff]  ;;  %v646_v58 = vld [vmem:[#allocation12 + $0x138] sm:$0xff] }
 0x130   : > { %3435 = vmatprep.subr.bf16.mxu0 %v3434_v24  ;;  %v650_v59 = vld [vmem:[#allocation12 + $0x158] sm:$0xff]  ;;  %v653_v60 = vld [vmem:[#allocation12 + $0x170] sm:$0xff]  ;;  %v3470_v61 = vpack.c.bf16 %v636_v54, %v633_v53  ;;  %v639_v62 = vld [vmem:[#allocation12 + $0x100] sm:$0xff]  ;;  %v3448_v0 = vpack.c.bf16 %v646_v58, %v643_v57 }
 0x131   : > { %3461 = vmatpush3.bf16.msra.mxu1 %v3458_v36  ;;  %v642_v63 = vld [vmem:[#allocation12 + $0x118] sm:$0xff]  ;;  %v3450_v1 = vpack.c.bf16 %v653_v60, %v650_v59  ;;  %v649_v2 = vld [vmem:[#allocation12 + $0x150] sm:$0xff]  ;;  %v652_v3 = vld [vmem:[#allocation12 + $0x168] sm:$0xff] }
 0x132   : > { %3463 = vmatprep.subr.bf16.mxu1 %v3462_v43  ;;  %v859_v4 = vld [vmem:[#allocation15 + $0x8] sm:$0xff]  ;;  %v862_v5 = vld [vmem:[#allocation15 + $0x20] sm:$0xff]  ;;  %v3474_v6 = vpack.c.bf16 %v642_v63, %v639_v62  ;;  %v645_v7 = vld [vmem:[#allocation12 + $0x130] sm:$0xff]  ;;  %v3452_v10 = vpack.c.bf16 %v652_v3, %v649_v2 }
 0x133   : > { %3437 = vmatpush1.bf16.msra.mxu0 %v3436_v33  ;;  %v648_v8 = vld [vmem:[#allocation12 + $0x148] sm:$0xff]  ;;  %v3486_v11 = vpack.c.bf16 %v862_v5, %v859_v4  ;;  %v858_v12 = vld [vmem:[#allocation15] sm:$0xff]  ;;  %v861_v13 = vld [vmem:[#allocation15 + $0x18] sm:$0xff] }
 0x134   : > { %3439 = vmatprep.subr.bf16.mxu0 %v3438_v37  ;;  %v865_v14 = vld [vmem:[#allocation15 + $0x38] sm:$0xff]  ;;  %v868_v15 = vld [vmem:[#allocation15 + $0x50] sm:$0xff]  ;;  %v3478_v16 = vpack.c.bf16 %v648_v8, %v645_v7  ;;  %v651_v17 = vld [vmem:[#allocation12 + $0x160] sm:$0xff]  ;;  %v3488_v19 = vpack.c.bf16 %v861_v13, %v858_v12 }
 0x135   : > { %3465 = vmatpush3.bf16.msra.mxu1 %v3462_v43  ;;  %v654_v18 = vld [vmem:[#allocation12 + $0x178] sm:$0xff]  ;;  %v3490_v20 = vpack.c.bf16 %v868_v15, %v865_v14  ;;  %v864_v21 = vld [vmem:[#allocation15 + $0x30] sm:$0xff]  ;;  %v867_v22 = vld [vmem:[#allocation15 + $0x48] sm:$0xff] }
 0x136   : > { %3467 = vmatprep.subr.bf16.mxu1 %v3466_v52  ;;  %v871_v23 = vld [vmem:[#allocation15 + $0x68] sm:$0xff]  ;;  %v874_v24 = vld [vmem:[#allocation15 + $0x80] sm:$0xff]  ;;  %v3482_v25 = vpack.c.bf16 %v654_v18, %v651_v17  ;;  %v860_v26 = vld [vmem:[#allocation15 + $0x10] sm:$0xff]  ;;  %v3492_v28 = vpack.c.bf16 %v867_v22, %v864_v21 }
 0x137   : > { %3441 = vmatpush1.bf16.msra.mxu0 %v3440_v46  ;;  %v863_v27 = vld [vmem:[#allocation15 + $0x28] sm:$0xff]  ;;  %v600_v29 = vld [vmem:[%s5073_s4 + $0x8] sm:$0xff]  ;;  %v3494_v30 = vpack.c.bf16 %v874_v24, %v871_v23  ;;  %v870_v31 = vld [vmem:[#allocation15 + $0x60] sm:$0xff] }
 0x138   : > { %3443 = vmatprep.subr.bf16.mxu0 %v3442_v47  ;;  %v873_v32 = vld [vmem:[#allocation15 + $0x78] sm:$0xff]  ;;  %v880_v34 = vld [vmem:[#allocation15 + $0xb0] sm:$0xff]  ;;  %v3518_v35 = vpack.c.bf16 %v863_v27, %v860_v26  ;;  %v866_v36 = vld [vmem:[#allocation15 + $0x40] sm:$0xff] }
 0x139   : > { %3469 = vmatpush3.bf16.msra.mxu1 %v3466_v52  ;;  %v877_v33 = vld [vmem:[#allocation15 + $0x98] sm:$0xff]  ;;  %v601_v39 = vld [vmem:[%s5073_s4 + $0x10] sm:$0xff]  ;;  %v876_v41 = vld [vmem:[#allocation15 + $0x90] sm:$0xff] }
 0x13a   : > { %3471 = vmatprep.subr.bf16.mxu1 %v3470_v61  ;;  %v869_v37 = vld [vmem:[#allocation15 + $0x58] sm:$0xff]  ;;  %v3498_v40 = vpack.c.bf16 %v880_v34, %v877_v33  ;;  %v879_v42 = vld [vmem:[#allocation15 + $0xa8] sm:$0xff]  ;;  %v886_v44 = vld [vmem:[#allocation15 + $0xe0] sm:$0xff] }
 0x13b   : > { %3445 = vmatpush1.bf16.msra.mxu0 %v3444_v55  ;;  %v883_v43 = vld [vmem:[#allocation15 + $0xc8] sm:$0xff]  ;;  %v3522_v45 = vpack.c.bf16 %v869_v37, %v866_v36  ;;  %v872_v46 = vld [vmem:[#allocation15 + $0x70] sm:$0xff]  ;;  %v3500_v48 = vpack.c.bf16 %v879_v42, %v876_v41  ;;  %v882_v51 = vld [vmem:[#allocation15 + $0xc0] sm:$0xff] }
 0x13c   : > { %3447 = vmatprep.subr.bf16.mxu0 %v3446_v56  ;;  %v875_v47 = vld [vmem:[#allocation15 + $0x88] sm:$0xff]  ;;  %v3502_v50 = vpack.c.bf16 %v886_v44, %v883_v43  ;;  %v885_v52 = vld [vmem:[#allocation15 + $0xd8] sm:$0xff]  ;;  %v892_v54 = vld [vmem:[#allocation15 + $0x110] sm:$0xff] }
 0x13d   : > { %3473 = vmatpush3.bf16.msra.mxu1 %v3470_v61  ;;  %v602_v49 = vld [vmem:[%s5073_s4 + $0x18] sm:$0xff]  ;;  %v889_v53 = vld [vmem:[#allocation15 + $0xf8] sm:$0xff]  ;;  %v3526_v55 = vpack.c.bf16 %v875_v47, %v872_v46  ;;  %v878_v56 = vld [vmem:[#allocation15 + $0xa0] sm:$0xff]  ;;  %v3504_v58 = vpack.c.bf16 %v885_v52, %v882_v51 }
 0x13e   : > { %3475 = vmatprep.subr.bf16.mxu1 %v3474_v6  ;;  %v881_v57 = vld [vmem:[#allocation15 + $0xb8] sm:$0xff]  ;;  %v3506_v59 = vpack.c.bf16 %v892_v54, %v889_v53  ;;  %v888_v60 = vld [vmem:[#allocation15 + $0xf0] sm:$0xff]  ;;  %v891_v61 = vld [vmem:[#allocation15 + $0x108] sm:$0xff] }
 0x13f   : > { %3449 = vmatpush1.bf16.msra.mxu0 %v3448_v0  ;;  %v895_v62 = vld [vmem:[#allocation15 + $0x128] sm:$0xff]  ;;  %v898_v63 = vld [vmem:[#allocation15 + $0x140] sm:$0xff]  ;;  %v603_v0 = vld [vmem:[%s5083_s2] sm:$0xff]  ;;  %v3508_v4 = vpack.c.bf16 %v891_v61, %v888_v60 }
 0x140   : > { %3451 = vmatprep.subr.bf16.mxu0 %v3450_v1  ;;  %v3530_v1 = vpack.c.bf16 %v881_v57, %v878_v56  ;;  %v884_v2 = vld [vmem:[#allocation15 + $0xd0] sm:$0xff]  ;;  %v887_v3 = vld [vmem:[#allocation15 + $0xe8] sm:$0xff]  ;;  %v3510_v5 = vpack.c.bf16 %v898_v63, %v895_v62  ;;  %v897_v7 = vld [vmem:[#allocation15 + $0x138] sm:$0xff]  ;;  %v5792_v56 = vmov 0.0|0.0  }
 0x141   : > { %3477 = vmatpush3.bf16.msra.mxu1 %v3474_v6  ;;  %v894_v6 = vld [vmem:[#allocation15 + $0x120] sm:$0xff]  ;;  %v901_v8 = vld [vmem:[#allocation15 + $0x158] sm:$0xff]  ;;  %v903_v17 = vld [vmem:[#allocation15 + $0x168] sm:$0xff] }
 0x142   : > { %3479 = vmatprep.subr.bf16.mxu1 %v3478_v16  ;;  %v890_v12 = vld [vmem:[#allocation15 + $0x100] sm:$0xff]  ;;  %v893_v13 = vld [vmem:[#allocation15 + $0x118] sm:$0xff]  ;;  %v3512_v14 = vpack.c.bf16 %v897_v7, %v894_v6  ;;  %v1110_v18 = vld [vmem:[#allocation14 + $0x8] sm:$0xff] }
 0x143   : > { %3453 = vmatpush1.bf16.msra.mxu0 %v3452_v10  ;;  %v904_v10 = vld [vmem:[#allocation15 + $0x170] sm:$0xff]  ;;  %v899_v22 = vld [vmem:[#allocation15 + $0x148] sm:$0xff]  ;;  %v1112_v26 = vld [vmem:[#allocation14 + $0x18] sm:$0xff] }
 0x144   : > { %3487 = vmatprep.subr.bf16.mxu0 %v3486_v11  ;;  %v3534_v11 = vpack.c.bf16 %v887_v3, %v884_v2  ;;  %v3514_v15 = vpack.c.bf16 %v904_v10, %v901_v8  ;;  %v896_v21 = vld [vmem:[#allocation15 + $0x130] sm:$0xff]  ;;  %v1116_v27 = vld [vmem:[#allocation14 + $0x38] sm:$0xff]  ;;  %v1122_v36 = vld [vmem:[#allocation14 + $0x68] sm:$0xff] }
 0x145   : > { %3481 = vmatpush3.bf16.msra.mxu1 %v3478_v16  ;;  %v900_v16 = vld [vmem:[#allocation15 + $0x150] sm:$0xff]  ;;  %v1125_v37 = vld [vmem:[#allocation14 + $0x80] sm:$0xff]  ;;  %v1124_v43 = vld [vmem:[#allocation14 + $0x78] sm:$0xff] }
 0x146   : > { %737 = vmatmul.mubr.f32.vlgmr.msra.gmra.mrb[0].mxu0 %v5109_v38  ;;  %3483 = vmatprep.subr.bf16.mxu1 %v3482_v25  ;;  %v3496_v38 = vpack.c.bf16 %v873_v32, %v870_v31  ;;  %v3516_v23 = vpack.c.bf16 %v903_v17, %v900_v16  ;;  %v905_v31 = vld [vmem:[#allocation15 + $0x178] sm:$0xff]  ;;  %v1115_v34 = vld [vmem:[#allocation14 + $0x30] sm:$0xff]  ;;  %v5134_v41 = vpack.c.bf16 %v1125_v37, %v1122_v36  ;;  %v1121_v42 = vld [vmem:[#allocation14 + $0x60] sm:$0xff] }
 0x147   : > { %3489 = vmatpush1.bf16.msra.mxu0 %v3488_v19  ;;  %742 = vmatprep.mubr.f32.mxu0 %v5790_v9  ;;  %v1113_v19 = vld [vmem:[#allocation14 + $0x20] sm:$0xff]  ;;  %v1128_v44 = vld [vmem:[#allocation14 + $0x98] sm:$0xff]  ;;  %v1111_v46 = vld [vmem:[#allocation14 + $0x10] sm:$0xff] }
 0x148   : > { %3491 = vmatprep.subr.bf16.mxu0 %v3490_v20  ;;  %v3538_v20 = vpack.c.bf16 %v893_v13, %v890_v12  ;;  %v5121_v24 = vpack.c.bf16 %v1113_v19, %v1110_v18  ;;  %v1114_v47 = vld [vmem:[#allocation14 + $0x28] sm:$0xff]  ;;  %v1127_v51 = vld [vmem:[#allocation14 + $0x90] sm:$0xff]  ;;  %v1117_v57 = vld [vmem:[#allocation14 + $0x40] sm:$0xff] }
 0x149   : > { %3485 = vmatpush3.bf16.msra.mxu1 %v3482_v25  ;;  %v1109_v25 = vld [vmem:[#allocation14] sm:$0xff]  ;;  %v1130_v52 = vld [vmem:[#allocation14 + $0xa8] sm:$0xff]  ;;  %v5144_v54 = vpack.c.bf16 %v1114_v47, %v1111_v46  ;;  %v1136_v63 = vld [vmem:[#allocation14 + $0xd8] sm:$0xff] }
 0x14a   : > { %743 = vmatmul.mubr.f32.gmra.mrb[2].mxu0 %v600_v29  ;;  %3519 = vmatprep.subr.bf16.mxu1 %v3518_v35  ;;  %v5123_v32 = vpack.c.bf16 %v1112_v26, %v1109_v25  ;;  %v1134_v53 = vld [vmem:[#allocation14 + $0xc8] sm:$0xff]  ;;  %v1133_v62 = vld [vmem:[#allocation14 + $0xc0] sm:$0xff]  ;;  %v1143_v2 = vld [vmem:[#allocation14 + $0x110] sm:$0xff] }
 0x14b   : > { %3493 = vmatpush1.bf16.msra.mxu0 %v3492_v28  ;;  %748 = vmatprep.mubr.f32.mxu0 %v5790_v9  ;;  %v1119_v28 = vld [vmem:[#allocation14 + $0x50] sm:$0xff]  ;;  %v606_v60 = vld [vmem:[%s5083_s2 + $0x18] sm:$0xff]  ;;  %v1149_v12 = vld [vmem:[#allocation14 + $0x140] sm:$0xff] }
 0x14c   : > { %3495 = vmatprep.subr.bf16.mxu0 %v3494_v30  ;;  %3099 = vmatmul.mubr.f32.vlgmr.msra.gmra.mrb[0].mxu1 %v600_v29  ;;  %v3542_v29 = vpack.c.bf16 %v899_v22, %v896_v21  ;;  %v902_v30 = vld [vmem:[#allocation15 + $0x160] sm:$0xff]  ;;  %v5126_v33 = vpack.c.bf16 %v1119_v28, %v1116_v27  ;;  %v1123_v3 = vld [vmem:[#allocation14 + $0x70] sm:$0xff]  ;;  %v1142_v8 = vld [vmem:[#allocation14 + $0x108] sm:$0xff] }
 0x14d   : > { %3521 = vmatpush3.bf16.msra.mxu1 %v3518_v35  ;;  %3101 = vmatprep.mubr.f32.mxu1 %v601_v39  ;;  %v1118_v35 = vld [vmem:[#allocation14 + $0x48] sm:$0xff]  ;;  %v1139_v7 = vld [vmem:[#allocation14 + $0xf0] sm:$0xff]  ;;  %v1129_v13 = vld [vmem:[#allocation14 + $0xa0] sm:$0xff] }
 0x14e   : > { %749 = vmatmul.mubr.f32.gmra.mrb[4].mxu0 %v601_v39  ;;  %3523 = vmatprep.subr.bf16.mxu1 %v3522_v45  ;;  %v5129_v39 = vpack.c.bf16 %v1118_v35, %v1115_v34  ;;  %v1146_v10 = vld [vmem:[#allocation14 + $0x128] sm:$0xff]  ;;  %v1145_v17 = vld [vmem:[#allocation14 + $0x120] sm:$0xff]  ;;  %v1148_v18 = vld [vmem:[#allocation14 + $0x138] sm:$0xff] }
 0x14f   : > { %3497 = vmatpush1.bf16.msra.mxu0 %v3496_v38  ;;  %754 = vmatprep.mubr.f32.mxu0 %v5790_v9  ;;  %v3546_v38 = vpack.c.bf16 %v905_v31, %v902_v30  ;;  %v5176_v16 = vpack.c.bf16 %v1149_v12, %v1146_v10  ;;  %v1152_v19 = vld [vmem:[#allocation14 + $0x158] sm:$0xff]  ;;  %v1155_v21 = vld [vmem:[#allocation14 + $0x170] sm:$0xff]  ;;  %v5183_v25 = vpack.c.bf16 %v1148_v18, %v1145_v17  ;;  %v1154_v28 = vld [vmem:[#allocation14 + $0x168] sm:$0xff] }
 0x150   : > { %3499 = vmatprep.subr.bf16.mxu0 %v3498_v40  ;;  %3102 = vmatmul.mubr.f32.gmra.mrb[2].mxu1 %v602_v49  ;;  %v604_v40 = vld [vmem:[%s5083_s2 + $0x8] sm:$0xff]  ;;  %v1135_v22 = vld [vmem:[#allocation14 + $0xd0] sm:$0xff]  ;;  %v5186_v26 = vpack.c.bf16 %v1155_v21, %v1152_v19  ;;  %v1161_v31 = vld [vmem:[#allocation17 + $0x20] sm:$0xff] }
 0x151   : > { %3525 = vmatpush3.bf16.msra.mxu1 %v3522_v45  ;;  %3136 = vmatprep.mubr.f32.mxu1 %v603_v0  ;;  %v1131_v45 = vld [vmem:[#allocation14 + $0xb0] sm:$0xff]  ;;  %5869 = vst [vmem:[#allocation33_spill] sm:$0xff] %v5176_v16  ;;  %5870 = vst [vmem:[#allocation34_spill] sm:$0xff] %v5183_v25  ;;  %v1141_v34 = vld [vmem:[#allocation14 + $0x100] sm:$0xff] }
 0x152   : > { %755 = vmatmul.mubr.f32.gmra.mrb[6].mxu0 %v602_v49  ;;  %3527 = vmatprep.subr.bf16.mxu1 %v3526_v55  ;;  %v605_v49 = vld [vmem:[%s5083_s2 + $0x10] sm:$0xff]  ;;  %5871 = vst [vmem:[#allocation35_spill] sm:$0xff] %v5186_v26  ;;  %v1151_v27 = vld [vmem:[#allocation14 + $0x150] sm:$0xff]  ;;  %v1144_v35 = vld [vmem:[#allocation14 + $0x118] sm:$0xff] }
 0x153   : > { %3501 = vmatpush1.bf16.msra.mxu0 %v3500_v48  ;;  %987 = vmatprep.mubr.f32.mxu0 %v5790_v9  ;;  %v5137_v48 = vpack.c.bf16 %v1124_v43, %v1121_v42  ;;  %v5193_v36 = vpack.c.bf16 %v1154_v28, %v1151_v27  ;;  %v1164_v42 = vld [vmem:[#allocation17 + $0x38] sm:$0xff]  ;;  %v5199_v43 = vpack.c.bf16 %v1144_v35, %v1141_v34  ;;  %v1150_v46 = vld [vmem:[#allocation14 + $0x148] sm:$0xff]  ;;  %v5203_v47 = vld [vmem:[#allocation2] sm:$0xff] }
 0x154   : > { %3503 = vmatprep.subr.bf16.mxu0 %v3502_v50  ;;  %v5142_v50 = vpack.c.bf16 %v1131_v45, %v1128_v44  ;;  %v1167_v44 = vld [vmem:[#allocation17 + $0x50] sm:$0xff]  ;;  %v1162_v12 = vld [vmem:[#allocation17 + $0x28] sm:$0xff]  ;;  %v1168_v27 = vld [vmem:[#allocation17 + $0x58] sm:$0xff] }
 0x155   : > { %3529 = vmatpush3.bf16.msra.mxu1 %v3526_v55  ;;  %v1137_v55 = vld [vmem:[#allocation14 + $0xe0] sm:$0xff]  ;;  %5872 = vst [vmem:[#allocation36_spill] sm:$0xff] %v5193_v36  ;;  %5874 = vst [vmem:[#allocation38_spill] sm:$0xff] %v5199_v43  ;;  %v1147_v45 = vld [vmem:[#allocation14 + $0x130] sm:$0xff] }
 0x156   : > { %3531 = vmatprep.subr.bf16.mxu1 %v3530_v1  ;;  %v5152_v61 = vpack.c.bf16 %v1137_v55, %v1134_v53  ;;  %v1166_v53 = vld [vmem:[#allocation17 + $0x48] sm:$0xff]  ;;  %v1159_v10 = vld [vmem:[#allocation17 + $0x10] sm:$0xff]  ;;  %v1184_v34 = vld [vmem:[#allocation17 + $0xd8] sm:$0xff] }
 0x157   : > { %3505 = vmatpush1.bf16.msra.mxu0 %v3504_v58  ;;  %v1120_v58 = vld [vmem:[#allocation14 + $0x58] sm:$0xff]  ;;  %v1170_v55 = vld [vmem:[#allocation17 + $0x68] sm:$0xff]  ;;  %v1175_v17 = vld [vmem:[#allocation17 + $0x90] sm:$0xff]  ;;  %v5233_v21 = vpack.c.bf16 %v1162_v12, %v1159_v10 }
 0x158   : > { %3507 = vmatprep.subr.bf16.mxu0 %v3506_v59  ;;  %v5148_v59 = vpack.c.bf16 %v1130_v52, %v1127_v51  ;;  %v5208_v51 = vpack.c.bf16 %v1167_v44, %v1164_v42  ;;  %v1163_v52 = vld [vmem:[#allocation17 + $0x30] sm:$0xff]  ;;  %v1178_v18 = vld [vmem:[#allocation17 + $0xa8] sm:$0xff]  ;;  %v1188_v35 = vld [vmem:[#allocation17 + $0xf8] sm:$0xff] }
 0x159   : > { %3533 = vmatpush3.bf16.msra.mxu1 %v3530_v1  ;;  %v5155_v1 = vpack.c.bf16 %v1120_v58, %v1117_v57  ;;  %v5211_v57 = vpack.c.bf16 %v1150_v46, %v1147_v45  ;;  %v1173_v58 = vld [vmem:[#allocation17 + $0x80] sm:$0xff]  ;;  %v1182_v19 = vld [vmem:[#allocation17 + $0xc8] sm:$0xff]  ;;  %v5237_v28 = vpack.c.bf16 %v1178_v18, %v1175_v17  ;;  %v1171_v42 = vld [vmem:[#allocation17 + $0x70] sm:$0xff] }
 0x15a   : > { %3535 = vmatprep.subr.bf16.mxu1 %v3534_v11  ;;  %v1174_v44 = vld [vmem:[#allocation17 + $0x88] sm:$0xff]  ;;  %v1196_v10 = vld [vmem:[#allocation17 + $0x138] sm:$0xff]  ;;  %v1203_v18 = vld [vmem:[#allocation17 + $0x170] sm:$0xff] }
 0x15b   : > { %3509 = vmatpush1.bf16.msra.mxu0 %v3508_v4  ;;  %v1126_v4 = vld [vmem:[#allocation14 + $0x88] sm:$0xff]  ;;  %5875 = vst [vmem:[#allocation39_spill] sm:$0xff] %v5211_v57  ;;  %v1200_v12 = vld [vmem:[#allocation17 + $0x158] sm:$0xff] }
 0x15c   : > { %3511 = vmatprep.subr.bf16.mxu0 %v3510_v5  ;;  %v5160_v5 = vpack.c.bf16 %v1136_v63, %v1133_v62  ;;  %v1156_v62 = vld [vmem:[#allocation14 + $0x178] sm:$0xff]  ;;  %v5216_v63 = vpack.c.bf16 %v1166_v53, %v1163_v52  ;;  %v1187_v52 = vld [vmem:[#allocation17 + $0xf0] sm:$0xff]  ;;  %v1190_v53 = vld [vmem:[#allocation17 + $0x108] sm:$0xff] }
 0x15d   : > { %3537 = vmatpush3.bf16.msra.mxu1 %v3534_v11  ;;  %v5167_v11 = vpack.c.bf16 %v1126_v4, %v1123_v3  ;;  %v1172_v3 = vld [vmem:[#allocation17 + $0x78] sm:$0xff] }
 0x15e   : > { %3539 = vmatprep.subr.bf16.mxu1 %v3538_v20  ;;  %v1176_v4 = vld [vmem:[#allocation17 + $0x98] sm:$0xff] }
 0x15f   : > { %3513 = vmatpush1.bf16.msra.mxu0 %v3512_v14  ;;  %v1132_v14 = vld [vmem:[#allocation14 + $0xb8] sm:$0xff] }
 0x160   : > { %3515 = vmatprep.subr.bf16.mxu0 %v3514_v15  ;;  %v5173_v15 = vpack.c.bf16 %v1142_v8, %v1139_v7  ;;  %v1179_v8 = vld [vmem:[#allocation17 + $0xb0] sm:$0xff] }
 0x161   : > { %3541 = vmatpush3.bf16.msra.mxu1 %v3538_v20  ;;  %v5179_v20 = vpack.c.bf16 %v1132_v14, %v1129_v13  ;;  %v5230_v14 = vpack.c.bf16 %v1179_v8, %v1176_v4  ;;  %v1193_v8 = vld [vmem:[#allocation17 + $0x120] sm:$0xff] }
 0x162   : > { %3543 = vmatprep.subr.bf16.mxu1 %v3542_v29  ;;  %5868 = vst [vmem:[#allocation32_spill] sm:$0xff] %v5173_v15 }
 0x163   : > { %3517 = vmatpush1.bf16.msra.mxu0 %v3516_v23  ;;  %v1138_v23 = vld [vmem:[#allocation14 + $0xe8] sm:$0xff] }
 0x164   : > { %3551 = vmatprep.subr.bf16.mxu0 %v5121_v24  ;;  %v5189_v30 = vpack.c.bf16 %v1138_v23, %v1135_v22  ;;  %v1185_v22 = vld [vmem:[#allocation17 + $0xe0] sm:$0xff] }
 0x165   : > { %3545 = vmatpush3.bf16.msra.mxu1 %v3542_v29  ;;  %v1158_v29 = vld [vmem:[#allocation17 + $0x8] sm:$0xff]  ;;  %v1165_v23 = vld [vmem:[#allocation17 + $0x40] sm:$0xff] }
 0x166   : > { %988 = vmatmul.mubr.f32.vlgmr.msra.gmra.mrb[8].mxu0 %v603_v0  ;;  %3547 = vmatprep.subr.bf16.mxu1 %v3546_v38  ;;  %v1140_v0 = vld [vmem:[#allocation14 + $0xf8] sm:$0xff]  ;;  %v5196_v37 = vpack.c.bf16 %v1161_v31, %v1158_v29  ;;  %v5241_v29 = vpack.c.bf16 %v1185_v22, %v1182_v19  ;;  %v1181_v31 = vld [vmem:[#allocation17 + $0xc0] sm:$0xff]  ;;  %v1183_v19 = vld [vmem:[#allocation17 + $0xd0] sm:$0xff] }
 0x167   : > { %3553 = vmatpush1.bf16.msra.mxu0 %v5123_v32  ;;  %993 = vmatprep.mubr.f32.mxu0 %v5790_v9  ;;  %v5164_v6 = vpack.c.bf16 %v1143_v2, %v1140_v0  ;;  %v5220_v0 = vpack.c.bf16 %v1173_v58, %v1170_v55  ;;  %v1169_v2 = vld [vmem:[#allocation17 + $0x60] sm:$0xff]  ;;  %v5250_v45 = vpack.c.bf16 %v1184_v34, %v1181_v31  ;;  %v1194_v55 = vld [vmem:[#allocation17 + $0x128] sm:$0xff]  ;;  %v1199_v31 = vld [vmem:[#allocation17 + $0x150] sm:$0xff] }
 0x168   : > { %3555 = vmatprep.subr.bf16.mxu0 %v5126_v33  ;;  %5873 = vst [vmem:[#allocation37_spill] sm:$0xff] %v5196_v37  ;;  %v5227_v13 = vpack.c.bf16 %v1172_v3, %v1169_v2  ;;  %v5256_v58 = vpack.c.bf16 %v1174_v44, %v1171_v42  ;;  %v1180_v2 = vld [vmem:[#allocation17 + $0xb8] sm:$0xff]  ;;  %v5260_v3 = vpack.c.bf16 %v1190_v53, %v1187_v52  ;;  %v1186_v22 = vld [vmem:[#allocation17 + $0xe8] sm:$0xff]  ;;  %v1195_v53 = vld [vmem:[#allocation17 + $0x130] sm:$0xff] }
 0x169   : > { %3549 = vmatpush3.bf16.msra.mxu1 %v3546_v38  ;;  %5867 = vst [vmem:[#allocation31_spill] sm:$0xff] %v5164_v6  ;;  %v1157_v38 = vld [vmem:[#allocation17] sm:$0xff]  ;;  %v1202_v34 = vld [vmem:[#allocation17 + $0x168] sm:$0xff]  ;;  %v1192_v42 = vld [vmem:[#allocation17 + $0x118] sm:$0xff] }
 0x16a   : > { %994 = vmatmul.mubr.f32.gmra.mrb[10].mxu0 %v604_v40  ;;  %3582 = vmatprep.subr.bf16.mxu1 %v5792_v56  ;;  %v5280_v44 = vpack.c.bf16 %v1202_v34, %v1199_v31 }
 0x16b   : > { %3557 = vmatpush1.bf16.msra.mxu0 %v5129_v39  ;;  %999 = vmatprep.mubr.f32.mxu0 %v5790_v9 }
 0x16c   : > { %3559 = vmatprep.subr.bf16.mxu0 %v5134_v41  ;;  %3137 = vmatmul.mubr.f32.vlgmr.msra.gmra.mrb[4].mxu1 %v604_v40  ;;  %v1160_v40 = vld [vmem:[#allocation17 + $0x18] sm:$0xff] }
 0x16d   : > { %3584 = vmatpush3.bf16.msra.mxu1 %v5144_v54  ;;  %3139 = vmatprep.mubr.f32.mxu1 %v605_v49 }
 0x16e   : > { %1000 = vmatmul.mubr.f32.gmra.mrb[12].mxu0 %v605_v49  ;;  %3585 = vmatprep.subr.bf16.mxu1 %v5792_v56  ;;  %v5205_v49 = vpack.c.bf16 %v1160_v40, %v1157_v38  ;;  %v5244_v38 = vpack.c.bf16 %v1168_v27, %v1165_v23  ;;  %v1191_v40 = vld [vmem:[#allocation17 + $0x110] sm:$0xff]  ;;  %v5270_v23 = vpack.c.bf16 %v1196_v10, %v1193_v8  ;;  %v1204_v8 = vld [vmem:[#allocation17 + $0x178] sm:$0xff] }
 0x16f   : > { %3561 = vmatpush1.bf16.msra.mxu0 %v5137_v48  ;;  %1005 = vmatprep.mubr.f32.mxu0 %v5790_v9  ;;  %v5253_v46 = vpack.c.bf16 %v1191_v40, %v1188_v35  ;;  %v5273_v27 = vpack.c.bf16 %v1203_v18, %v1200_v12  ;;  %v5276_v35 = vpack.c.bf16 %v1186_v22, %v1183_v19  ;;  %v1189_v40 = vld [vmem:[#allocation17 + $0x100] sm:$0xff]  ;;  %v657_v12 = vlaneseq }
 0x170   : > { %3563 = vmatprep.subr.bf16.mxu0 %v5142_v50  ;;  %3140 = vmatmul.mubr.f32.gmra.mrb[6].mxu1 %v606_v60  ;;  %v5284_v52 = vpack.c.bf16 %v1192_v42, %v1189_v40  ;;  %v655_v22 = vld [vmem:[%s5877_s18] sm:$0x7] }
 0x171   : > { %3587 = vmatpush3.bf16.msra.mxu1 %v5155_v1  ;;  %3174 = vmatprep.mubr.msk.f32.mxu1 %vm4640_vm0, %v5790_v9  ;;  %v658_v18 = vshrl.u32 %v657_v12, 7  ;;  %v906_v12 = vld [vmem:[%s5881_s11] sm:$0x7] }
 0x172   : > { %1006 = vmatmul.mubr.f32.gmra.mrb[14].mxu0 %v606_v60  ;;  %3588 = vmatprep.subr.bf16.mxu1 %v5792_v56  ;;  %v1153_v60 = vld [vmem:[#allocation14 + $0x160] sm:$0xff] }
 0x173   : > { %3565 = vmatpush1.bf16.msra.mxu0 %v5148_v59  ;;  %1288 = vmatprep.mubr.f32.mxu0 %v5790_v9  ;;  %v5223_v7 = vpack.c.bf16 %v1156_v62, %v1153_v60  ;;  %v1197_v60 = vld [vmem:[#allocation17 + $0x140] sm:$0xff]  ;;  %v667_v19 = vsub.s32 2, %v658_v18 }
 0x174   : > { %3567 = vmatprep.subr.bf16.mxu0 %v5152_v61  ;;  %v1177_v62 = vld [vmem:[#allocation17 + $0xa0] sm:$0xff]  ;;  %v5263_v4 = vpack.c.bf16 %v1197_v60, %v1194_v55  ;;  %v1198_v55 = vld [vmem:[#allocation17 + $0x148] sm:$0xff] }
 0x175   : > { %3590 = vmatpush3.bf16.msra.mxu1 %v5167_v11  ;;  %5876 = vst [vmem:[#allocation40_spill] sm:$0xff] %v5223_v7  ;;  %v5266_v17 = vpack.c.bf16 %v1180_v2, %v1177_v62  ;;  %v5288_v60 = vld [vmem:[#allocation3] sm:$0xff]  ;;  %v5291_v62 = vpack.c.bf16 %v1198_v55, %v1195_v53  ;;  %v1201_v2 = vld [vmem:[#allocation17 + $0x160] sm:$0xff]  ;;  %v668_v31 = vrot.slane %v655_v22, %v667_v19 }
 0x176   : > { %3591 = vmatprep.subr.bf16.mxu1 %v5792_v56  ;;  %v5299_v10 = vpack.c.bf16 %v1204_v8, %v1201_v2 }
 0x177   : > { %3569 = vmatpush1.bf16.msra.mxu0 %v5160_v5 }
 0x178   : > { %3571 = vmatprep.subr.bf16.mxu0 %v5164_v6 }
 0x179   : > { %3593 = vmatpush3.bf16.msra.mxu1 %v5179_v20 }
 0x17a   : > { %3594 = vmatprep.subr.bf16.mxu1 %v5792_v56 }
 0x17b   : > { %3573 = vmatpush1.bf16.msra.mxu0 %v5173_v15 }
 0x17c   : > { %3575 = vmatprep.subr.bf16.mxu0 %v5176_v16 }
 0x17d   : > { %3596 = vmatpush3.bf16.msra.mxu1 %v5189_v30 }
 0x17e   : > { %3597 = vmatprep.subr.bf16.mxu1 %v5792_v56 }
 0x17f   : > { %3577 = vmatpush1.bf16.msra.mxu0 %v5183_v25 }
 0x180   : > { %3579 = vmatprep.subr.bf16.mxu0 %v5186_v26 }
 0x181   : > { %3599 = vmatpush3.bf16.msra.mxu1 %v5199_v43 }
 0x182   : > { %3600 = vmatprep.subr.bf16.mxu1 %v5792_v56 }
 0x183   : > { %3581 = vmatpush1.bf16.msra.mxu0 %v5193_v36 }
 0x184   : > { %3607 = vmatprep.subr.bf16.mxu0 %v5196_v37 }
 0x185   : > { %3602 = vmatpush3.bf16.msra.mxu1 %v5211_v57 }
 0x186   : > { %1289 = vmatmul.mubr.f32.vlgmr.msra.gmra.mrb[0].mxu0 %v5203_v47  ;;  %3603 = vmatprep.subr.bf16.mxu1 %v5792_v56 }
 0x187   : > { %3609 = vmatpush1.bf16.msra.mxu0 %v5205_v49  ;;  %1455 = vmatprep.mubr.f32.mxu0 %v5790_v9 }
 0x188   : > { %3611 = vmatprep.subr.bf16.mxu0 %v5208_v51 }
 0x189   : > { %3605 = vmatpush3.bf16.msra.mxu1 %v5223_v7 }
 0x18a   : > { %3638 = vmatprep.subr.bf16.mxu1 %v5792_v56 }
 0x18b   : > { %3613 = vmatpush1.bf16.msra.mxu0 %v5216_v63 }
 0x18c   : > { %3615 = vmatprep.subr.bf16.mxu0 %v5220_v0  ;;  %3175 = vmatmul.mubr.f32.vlgmr.msra.gmra.mrb[8].mxu1 %v5203_v47 }
 0x18d   : > { %3640 = vmatpush3.bf16.msra.mxu1 %v5233_v21  ;;  %3209 = vmatprep.mubr.msk.f32.mxu1 %vm4640_vm0, %v5790_v9 }
 0x18e   : > { %3641 = vmatprep.subr.bf16.mxu1 %v5792_v56 }
 0x18f   : > { %3617 = vmatpush1.bf16.msra.mxu0 %v5227_v13 }
 0x190   : > { %3619 = vmatprep.subr.bf16.mxu0 %v5230_v14 }
 0x191   : > { %3643 = vmatpush3.bf16.msra.mxu1 %v5244_v38 }
 0x192   : > { %3644 = vmatprep.subr.bf16.mxu1 %v5792_v56 }
 0x193   : > { %3621 = vmatpush1.bf16.msra.mxu0 %v5237_v28 }
 0x194   : > { %3623 = vmatprep.subr.bf16.mxu0 %v5241_v29 }
 0x195   : > { %3646 = vmatpush3.bf16.msra.mxu1 %v5256_v58 }
 0x196   : > { %3647 = vmatprep.subr.bf16.mxu1 %v5792_v56 }
 0x197   : > { %3625 = vmatpush1.bf16.msra.mxu0 %v5250_v45 }
 0x198   : > { %3627 = vmatprep.subr.bf16.mxu0 %v5253_v46 }
 0x199   : > { %3649 = vmatpush3.bf16.msra.mxu1 %v5266_v17 }
 0x19a   : > { %3650 = vmatprep.subr.bf16.mxu1 %v5792_v56 }
 0x19b   : > { %3629 = vmatpush1.bf16.msra.mxu0 %v5260_v3 }
 0x19c   : > { %3631 = vmatprep.subr.bf16.mxu0 %v5263_v4 }
 0x19d   : > { %3652 = vmatpush3.bf16.msra.mxu1 %v5276_v35 }
 0x19e   : > { %3653 = vmatprep.subr.bf16.mxu1 %v5792_v56 }
 0x19f   : > { %3633 = vmatpush1.bf16.msra.mxu0 %v5270_v23 }
 0x1a0   : > { %3635 = vmatprep.subr.bf16.mxu0 %v5273_v27 }
 0x1a1   : > { %3655 = vmatpush3.bf16.msra.mxu1 %v5284_v52 }
 0x1a2   : > { %3656 = vmatprep.subr.bf16.mxu1 %v5792_v56 }
 0x1a3   : > { %3637 = vmatpush1.bf16.msra.mxu0 %v5280_v44 }
 0x1a4   : > { %3663 = vmatprep.subr.bf16.mxu0 %v5121_v24 }
 0x1a5   : > { %3658 = vmatpush3.bf16.msra.mxu1 %v5291_v62 }
 0x1a6   : > { %1456 = vmatmul.mubr.f32.vlgmr.msra.gmra.mrb[14].mxu0 %v5288_v60  ;;  %3659 = vmatprep.subr.bf16.mxu1 %v5792_v56 }
 0x1a7   : > { %3665 = vmatpush1.bf16.msra.mxu0 %v5123_v32  ;;  %1629 = vmatprep.mubr.f32.mxu0 %v5790_v9 }
 0x1a8   : > { %3667 = vmatprep.subr.bf16.mxu0 %v5126_v33 }
 0x1a9   : > { %3661 = vmatpush3.bf16.msra.mxu1 %v5299_v10 }
 0x1aa   : > { %3694 = vmatprep.subr.bf16.mxu1 %v5792_v56 }
 0x1ab   : > { %3669 = vmatpush1.bf16.msra.mxu0 %v5129_v39 }
 0x1ac   : > { %3671 = vmatprep.subr.bf16.mxu0 %v5134_v41  ;;  %3210 = vmatmul.mubr.f32.vlgmr.msra.gmra.mrb[10].mxu1 %v5288_v60 }
 0x1ad   : > { %3696 = vmatpush3.bf16.msra.mxu1 %v5144_v54  ;;  %3244 = vmatprep.mubr.msk.f32.mxu1 %vm4640_vm0, %v5790_v9  ;;  %v5350_v9 = vrot.slane %v906_v12, %v667_v19 }
 0x1ae   : > { %3697 = vmatprep.subr.bf16.mxu1 %v5792_v56 }
 0x1af   : > { %3673 = vmatpush1.bf16.msra.mxu0 %v5137_v48 }
 0x1b0   : > { %3675 = vmatprep.subr.bf16.mxu0 %v5142_v50 }
 0x1b1   : > { %3699 = vmatpush3.bf16.msra.mxu1 %v5155_v1 }
 0x1b2   : > { %3700 = vmatprep.subr.bf16.mxu1 %v5792_v56 }
 0x1b3   : > { %3677 = vmatpush1.bf16.msra.mxu0 %v5148_v59 }
 0x1b4   : > { %3679 = vmatprep.subr.bf16.mxu0 %v5152_v61 }
 0x1b5   : > { %3702 = vmatpush3.bf16.msra.mxu1 %v5167_v11 }
 0x1b6   : > { %3703 = vmatprep.subr.bf16.mxu1 %v5792_v56 }
 0x1b7   : > { %3681 = vmatpush1.bf16.msra.mxu0 %v5160_v5 }
 0x1b8   : > { %3683 = vmatprep.subr.bf16.mxu0 %v5164_v6 }
 0x1b9   : > { %3705 = vmatpush3.bf16.msra.mxu1 %v5179_v20 }
 0x1ba   : > { %3706 = vmatprep.subr.bf16.mxu1 %v5792_v56 }
 0x1bb   : > { %3685 = vmatpush1.bf16.msra.mxu0 %v5173_v15 }
 0x1bc   : > { %3687 = vmatprep.subr.bf16.mxu0 %v5176_v16 }
 0x1bd   : > { %3708 = vmatpush3.bf16.msra.mxu1 %v5189_v30 }
 0x1be   : > { %3709 = vmatprep.subr.bf16.mxu1 %v5792_v56 }
 0x1bf   : > { %3689 = vmatpush1.bf16.msra.mxu0 %v5183_v25 }
 0x1c0   : > { %3691 = vmatprep.subr.bf16.mxu0 %v5186_v26 }
 0x1c1   : > { %3711 = vmatpush3.bf16.msra.mxu1 %v5199_v43 }
 0x1c2   : > { %3712 = vmatprep.subr.bf16.mxu1 %v5792_v56 }
 0x1c3   : > { %3693 = vmatpush1.bf16.msra.mxu0 %v5193_v36 }
 0x1c4   : > { %3719 = vmatprep.subr.bf16.mxu0 %v5196_v37 }
 0x1c5   : > { %3714 = vmatpush3.bf16.msra.mxu1 %v5211_v57 }
 0x1c6   : > { %3715 = vmatprep.subr.bf16.mxu1 %v5792_v56 }
 0x1c9   : > { %3717 = vmatpush3.bf16.msra.mxu1 %v5223_v7 }
 0x1ca   : > { %3750 = vmatprep.subr.bf16.mxu1 %v5792_v56 }
 0x21f   : > { %v3100_v34 = vpop.f32.mrb[0].mxu1 }
 0x220   : > { %v5341_v40 = vadd.f32 %v3100_v34, %v668_v31  ;;  %v827_v42 = vpop.f32.mrb[1].mxu1 }
 0x222   : > { %5878 = vst [vmem:[#allocation41_spill] sm:$0xff] %v5341_v40 }
 0x223   : > { %v3103_v53 = vpop.f32.mrb[2].mxu1 }
 0x224   : > { %v5343_v55 = vadd.f32 %v3103_v53, %v668_v31  ;;  %v837_v2 = vpop.f32.mrb[3].mxu1 }
 0x225   : > { %v5345_v8 = vadd.f32 %v837_v2, %v668_v31 }
 0x226   : > { %5879 = vst [vmem:[#allocation42_spill] sm:$0xff] %v5343_v55  ;;  %v659_v55 = vsub.s32 0, %v658_v18 }
 0x227   : > { %5880 = vst [vmem:[#allocation43_spill] sm:$0xff] %v5345_v8  ;;  %v663_v8 = vsub.s32 1, %v658_v18 }
 0x228   : > { %v5363_v36 = vrot.slane %v655_v22, %v659_v55 }
 0x229   : > { %v5365_v26 = vrot.slane %v655_v22, %v663_v8  ;;  %v5372_v22 = vld [vmem:[%s5887_s23] ss:$0 sm:$0xff] }
 0x22a   : > { %5885 = vst [vmem:[#allocation47_spill] sm:$0xff] %v5363_v36  ;;  %5888 = vst [vmem:[#allocation49_spill] sm:$0xff] %v5372_v22 }
 0x22b   : > { %5886 = vst [vmem:[#allocation48_spill] sm:$0xff] %v5365_v26 }
 0x23f   : > { %v3138_v56 = vpop.f32.mrb[4].mxu1 }
 0x240   : > { %v5353_v37 = vadd.f32 %v3138_v56, %v5350_v9  ;;  %v1078_v7 = vpop.f32.mrb[5].mxu1 }
 0x241   : > { %v5356_v34 = vadd.f32 %v1078_v7, %v5350_v9 }
 0x242   : > { %5882 = vst [vmem:[#allocation44_spill] sm:$0xff] %v5353_v37 }
 0x243   : > { %5883 = vst [vmem:[#allocation45_spill] sm:$0xff] %v5356_v34  ;;  %v5358_v40 = vpop.f32.mrb[6].mxu1 }
 0x244   : > { %v1088_v53 = vpop.f32.mrb[7].mxu1 }
 0x245   : > { %v5361_v2 = vadd.f32 %v1088_v53, %v5350_v9 }
 0x247   : > { %5884 = vst [vmem:[#allocation46_spill] sm:$0xff] %v5361_v2 }
 0x259   : > { %v1290_v19 = vpop.f32.mrb[0].mxu0 }
 0x25a   : > { %v3998_v56 = vadd.f32 %v1290_v19, %v5363_v36  ;;  %v1292_v37 = vpop.f32.mrb[1].mxu0  ;;  %v828_v36 = vadd.f32 %v827_v42, %v668_v31 }
 0x25b   : > { %v3999_v7 = vadd.f32 %v1292_v37, %v5365_v26 }
 0x25c   : > { %v2853_v57 = vmul.f32 -1.442695, %v3998_v56 }
 0x25d   : > { %v2854_v34 = vmul.f32 -1.442695, %v3999_v7  ;;  %v5377_v7 = vrot.slane %v906_v12, %v663_v8 }
 0x25e   : > { %4177 = vpow2.f32 %v2853_v57  ;;  %v5375_v57 = vrot.slane %v906_v12, %v659_v55 }
 0x25f   : > { %v1361_v25 = vpop.f32.mrb[8].mxu1  ;;  %4179 = vpow2.f32 %v2854_v34 }
 0x260   : > { %v3176_v16 = vpop.f32.mrb[9].mxu1  ;;  %v1379_v19 = vadd.f32 %v5372_v22, %v1361_v25 }
 0x268   : > { %v4178_v53 = vpop.eup %4177 }
 0x269   : > { %v1369_v2 = vadd.f32 1.0, %v4178_v53  ;;  %v4180_v18 = vpop.eup %4179 }
 0x26a   : > { %v1376_v43 = vadd.f32 1.0, %v4180_v18 }
 0x26b   : > { %4181 = vrcp.f32 %v1369_v2 }
 0x26c   : > { %4183 = vrcp.f32 %v1376_v43 }
 0x275   : > { %v4182_v56 = vpop.eup %4181 }
 0x276   : > { %v1380_v37 = vmul.f32 %v4182_v56, %v1379_v19  ;;  %v4184_v25 = vpop.eup %4183 }
 0x277   : > { %v1383_v43 = vsub.f32 1.0, %v4184_v25 }
 0x278   : > { %v1381_v16 = vadd.f32 %v1380_v37, %v828_v36  ;;  %v1385_v36 = vmul.f32 %v4184_v25, %v5203_v47  ;;  %v5890_v47 = vmov 0.0   ;;  %v5400_v37 = vld [vmem:[%s5891_s15] ss:$0 sm:$0xff] }
 0x279   : > { %v1457_v34 = vpop.f32.mrb[14].mxu0 }
 0x27a   : > { %4185 = vtanh.f32 %v1381_v16  ;;  %v4012_v2 = vadd.f32 %v1457_v34, %v5375_v57  ;;  %v1459_v53 = vpop.f32.mrb[15].mxu0 }
 0x27b   : > { %v4013_v18 = vadd.f32 %v1459_v53, %v5377_v7  ;;  %v1094_v53 = vadd.f32 %v5358_v40, %v5350_v9 }
 0x27c   : > { %v2855_v26 = vmul.f32 -1.442695, %v4012_v2 }
 0x27d   : > { %v2856_v22 = vmul.f32 -1.442695, %v4013_v18 }
 0x27e   : > { %4187 = vpow2.f32 %v2855_v26  ;;  %v5889_v26 = vmov 0.0|0.0  }
 0x27f   : > { %v1528_v31 = vpop.f32.mrb[10].mxu1  ;;  %4189 = vpow2.f32 %v2856_v22 }
 0x280   : > { %v3211_v42 = vpop.f32.mrb[11].mxu1  ;;  %v1546_v34 = vadd.f32 %v5400_v37, %v1528_v31 }
 0x284   : > { %v4186_v55 = vpop.eup %4185 }
 0x285   : > { %v1384_v19 = vmul.f32 %v4186_v55, %v1383_v43 }
 0x287   : > { %v5382_v8 = vadd.f32 %v1385_v36, %v1384_v19  ;;  %v5893_v36 = vld [vmem:[#allocation33_spill] sm:$0xff]  ;;  %v5894_v19 = vld [vmem:[#allocation34_spill] sm:$0xff] }
 0x288   : > { %v4188_v12 = vpop.eup %4187 }
 0x289   : > { %1556 = vst [vmem:[%s5101_s10] sm:$0xff] %v5382_v8  ;;  %v1536_v56 = vadd.f32 1.0, %v4188_v12  ;;  %1630 = vmatmul.mubr.f32.vlgmr.msra.gmra.mrb[2].mxu0 %v5382_v8  ;;  %3245 = vmatmul.mubr.f32.vlgmr.msra.gmra.mrb[12].mxu1 %v5382_v8  ;;  %v4190_v22 = vpop.eup %4189  ;;  %v5895_v12 = vld [vmem:[#allocation39_spill] sm:$0xff] }
 0x28a   : > { %3721 = vmatpush1.bf16.msra.mxu0 %v5205_v49  ;;  %3752 = vmatpush3.bf16.msra.mxu1 %v5233_v21  ;;  %v1543_v16 = vadd.f32 1.0, %v4190_v22  ;;  %v5897_v22 = vld [vmem:[#allocation36_spill] sm:$0xff] }
 0x28b   : > { %4191 = vrcp.f32 %v1536_v56  ;;  %3723 = vmatprep.subr.bf16.mxu0 %v5208_v51  ;;  %3753 = vmatprep.subr.bf16.mxu1 %v5889_v26  ;;  %v5896_v56 = vld [vmem:[#allocation35_spill] sm:$0xff] }
 0x28c   : > { %1796 = vmatprep.mubr.f32.mxu0 %v5890_v47  ;;  %3279 = vmatprep.mubr.msk.f32.mxu1 %vm4640_vm0, %v5890_v47  ;;  %4193 = vrcp.f32 %v1543_v16  ;;  %v5898_v16 = vld [vmem:[#allocation40_spill] sm:$0xff] }
 0x28e   : > { %3725 = vmatpush1.bf16.msra.mxu0 %v5216_v63  ;;  %3755 = vmatpush3.bf16.msra.mxu1 %v5244_v38 }
 0x28f   : > { %3727 = vmatprep.subr.bf16.mxu0 %v5220_v0  ;;  %3756 = vmatprep.subr.bf16.mxu1 %v5889_v26 }
 0x292   : > { %3729 = vmatpush1.bf16.msra.mxu0 %v5227_v13  ;;  %3758 = vmatpush3.bf16.msra.mxu1 %v5256_v58 }
 0x293   : > { %3731 = vmatprep.subr.bf16.mxu0 %v5230_v14  ;;  %3759 = vmatprep.subr.bf16.mxu1 %v5889_v26 }
 0x295   : > { %v4192_v2 = vpop.eup %4191 }
 0x296   : > { %v1547_v18 = vmul.f32 %v4192_v2, %v1546_v34  ;;  %3733 = vmatpush1.bf16.msra.mxu0 %v5237_v28  ;;  %3761 = vmatpush3.bf16.msra.mxu1 %v5266_v17  ;;  %v4194_v9 = vpop.eup %4193  ;;  %v5899_v34 = vld [vmem:[#allocation37_spill] sm:$0xff] }
 0x297   : > { %3735 = vmatprep.subr.bf16.mxu0 %v5241_v29  ;;  %3762 = vmatprep.subr.bf16.mxu1 %v5889_v26  ;;  %v1550_v40 = vsub.f32 1.0, %v4194_v9  ;;  %v1552_v43 = vmul.f32 %v4194_v9, %v5288_v60  ;;  %v5892_v60 = vld [vmem:[#allocation38_spill] sm:$0xff] }
 0x298   : > { %v1548_v25 = vadd.f32 %v1547_v18, %v1094_v53  ;;  %v5900_v18 = vld [vmem:[#allocation47_spill] sm:$0xff] }
 0x29a   : > { %4195 = vtanh.f32 %v1548_v25  ;;  %3737 = vmatpush1.bf16.msra.mxu0 %v5250_v45  ;;  %3764 = vmatpush3.bf16.msra.mxu1 %v5276_v35 }
 0x29b   : > { %3739 = vmatprep.subr.bf16.mxu0 %v5253_v46  ;;  %3765 = vmatprep.subr.bf16.mxu1 %v5889_v26 }
 0x29e   : > { %3741 = vmatpush1.bf16.msra.mxu0 %v5260_v3  ;;  %3767 = vmatpush3.bf16.msra.mxu1 %v5284_v52 }
 0x29f   : > { %3743 = vmatprep.subr.bf16.mxu0 %v5263_v4  ;;  %3768 = vmatprep.subr.bf16.mxu1 %v5889_v26 }
 0x2a2   : > { %3745 = vmatpush1.bf16.msra.mxu0 %v5270_v23  ;;  %3770 = vmatpush3.bf16.msra.mxu1 %v5291_v62 }
 0x2a3   : > { %3747 = vmatprep.subr.bf16.mxu0 %v5273_v27  ;;  %3771 = vmatprep.subr.bf16.mxu1 %v5889_v26 }
 0x2a4   : > { %v4196_v31 = vpop.eup %4195 }
 0x2a5   : > { %v1551_v42 = vmul.f32 %v4196_v31, %v1550_v40 }
 0x2a6   : > { %3749 = vmatpush1.bf16.msra.mxu0 %v5280_v44  ;;  %3773 = vmatpush3.bf16.msra.mxu1 %v5299_v10 }
 0x2a7   : > { %v5430_v55 = vadd.f32 %v1552_v43, %v1551_v42  ;;  %3775 = vmatprep.subr.bf16.mxu0 %v5121_v24  ;;  %3806 = vmatprep.subr.bf16.mxu1 %v5889_v26  ;;  %v5901_v43 = vld [vmem:[#allocation48_spill] sm:$0xff] }
 0x2a9   : > { %2857 = vst [vmem:[%s5103_s13 + $0x18] sm:$0xff] %v5430_v55  ;;  %1797 = vmatmul.mubr.f32.vlgmr.msra.gmra.mrb[12].mxu0 %v5430_v55  ;;  %3280 = vmatmul.mubr.f32.vlgmr.msra.gmra.mrb[14].mxu1 %v5430_v55 }
 0x2aa   : > { %3777 = vmatpush1.bf16.msra.mxu0 %v5123_v32  ;;  %3808 = vmatpush3.bf16.msra.mxu1 %v5144_v54 }
 0x2ab   : > { %3779 = vmatprep.subr.bf16.mxu0 %v5126_v33  ;;  %3809 = vmatprep.subr.bf16.mxu1 %v5889_v26 }
 0x2ac   : > { %1971 = vmatprep.mubr.f32.mxu0 %v5890_v47  ;;  %3314 = vmatprep.mubr.msk.f32.mxu1 %vm4640_vm0, %v5890_v47 }
 0x2ae   : > { %3781 = vmatpush1.bf16.msra.mxu0 %v5129_v39  ;;  %3811 = vmatpush3.bf16.msra.mxu1 %v5155_v1 }
 0x2af   : > { %3783 = vmatprep.subr.bf16.mxu0 %v5134_v41  ;;  %3812 = vmatprep.subr.bf16.mxu1 %v5889_v26 }
 0x2b2   : > { %3785 = vmatpush1.bf16.msra.mxu0 %v5137_v48  ;;  %3814 = vmatpush3.bf16.msra.mxu1 %v5167_v11 }
 0x2b3   : > { %3787 = vmatprep.subr.bf16.mxu0 %v5142_v50  ;;  %3815 = vmatprep.subr.bf16.mxu1 %v5889_v26 }
 0x2b6   : > { %3789 = vmatpush1.bf16.msra.mxu0 %v5148_v59  ;;  %3817 = vmatpush3.bf16.msra.mxu1 %v5179_v20 }
 0x2b7   : > { %3791 = vmatprep.subr.bf16.mxu0 %v5152_v61  ;;  %3818 = vmatprep.subr.bf16.mxu1 %v5889_v26 }
 0x2ba   : > { %3793 = vmatpush1.bf16.msra.mxu0 %v5160_v5  ;;  %3820 = vmatpush3.bf16.msra.mxu1 %v5189_v30 }
 0x2bb   : > { %3795 = vmatprep.subr.bf16.mxu0 %v5164_v6  ;;  %3821 = vmatprep.subr.bf16.mxu1 %v5889_v26  ;;  %v5903_v6 = vld [vmem:[#allocation41_spill] sm:$0xff] }
 0x2be   : > { %3797 = vmatpush1.bf16.msra.mxu0 %v5173_v15  ;;  %3823 = vmatpush3.bf16.msra.mxu1 %v5892_v60 }
 0x2bf   : > { %3799 = vmatprep.subr.bf16.mxu0 %v5893_v36  ;;  %3824 = vmatprep.subr.bf16.mxu1 %v5889_v26 }
 0x2c2   : > { %3801 = vmatpush1.bf16.msra.mxu0 %v5894_v19  ;;  %3826 = vmatpush3.bf16.msra.mxu1 %v5895_v12 }
 0x2c3   : > { %3803 = vmatprep.subr.bf16.mxu0 %v5896_v56  ;;  %3827 = vmatprep.subr.bf16.mxu1 %v5889_v26 }
 0x2c6   : > { %3805 = vmatpush1.bf16.msra.mxu0 %v5897_v22  ;;  %3829 = vmatpush3.bf16.msra.mxu1 %v5898_v16 }
 0x2c7   : > { %3831 = vmatprep.subr.bf16.mxu0 %v5899_v34  ;;  %3862 = vmatprep.subr.bf16.mxu1 %v5889_v26  ;;  %v5902_v34 = vld [vmem:[#allocation49_spill] sm:$0xff] }
 0x35c   : > { %v1631_v2 = vpop.f32.mrb[2].mxu0  ;;  %v1702_v53 = vpop.f32.mrb[12].mxu1 }
 0x35d   : > { %v4000_v25 = vadd.f32 %v1631_v2, %v5900_v18  ;;  %v1633_v9 = vpop.f32.mrb[3].mxu0  ;;  %v3246_v40 = vpop.f32.mrb[13].mxu1  ;;  %v1720_v36 = vadd.f32 %v5902_v34, %v1702_v53 }
 0x35e   : > { %v4001_v42 = vadd.f32 %v1633_v9, %v5901_v43 }
 0x35f   : > { %v2858_v31 = vmul.f32 -1.442695, %v4000_v25 }
 0x360   : > { %v2859_v56 = vmul.f32 -1.442695, %v4001_v42 }
 0x361   : > { %4197 = vpow2.f32 %v2858_v31 }
 0x362   : > { %4199 = vpow2.f32 %v2859_v56 }
 0x36b   : > { %v4198_v12 = vpop.eup %4197 }
 0x36c   : > { %v1710_v22 = vadd.f32 1.0, %v4198_v12  ;;  %v4200_v16 = vpop.eup %4199 }
 0x36d   : > { %v1717_v19 = vadd.f32 1.0, %v4200_v16 }
 0x36e   : > { %4201 = vrcp.f32 %v1710_v22 }
 0x36f   : > { %4203 = vrcp.f32 %v1717_v19 }
 0x378   : > { %v4202_v60 = vpop.eup %4201 }
 0x379   : > { %v1721_v15 = vmul.f32 %v4202_v60, %v1720_v36  ;;  %v4204_v22 = vpop.eup %4203 }
 0x37a   : > { %v1724_v53 = vsub.f32 1.0, %v4204_v22  ;;  %v1726_v36 = vmul.f32 %v4204_v22, %v5382_v8 }
 0x37b   : > { %v1722_v2 = vadd.f32 %v1721_v15, %v5903_v6 }
 0x37c   : > { %v1798_v18 = vpop.f32.mrb[12].mxu0  ;;  %v1869_v40 = vpop.f32.mrb[14].mxu1 }
 0x37d   : > { %4205 = vtanh.f32 %v1722_v2  ;;  %v4010_v25 = vadd.f32 %v1798_v18, %v5375_v57  ;;  %v1800_v9 = vpop.f32.mrb[13].mxu0  ;;  %v3281_v56 = vpop.f32.mrb[15].mxu1  ;;  %v1887_v2 = vadd.f32 %v5400_v37, %v1869_v40 }
 0x37e   : > { %v4011_v12 = vadd.f32 %v1800_v9, %v5377_v7  ;;  %v5904_v56 = vld [vmem:[#allocation46_spill] sm:$0xff] }
 0x37f   : > { %v2860_v31 = vmul.f32 -1.442695, %v4010_v25 }
 0x380   : > { %v2861_v16 = vmul.f32 -1.442695, %v4011_v12 }
 0x381   : > { %4207 = vpow2.f32 %v2860_v31 }
 0x382   : > { %4209 = vpow2.f32 %v2861_v16 }
 0x387   : > { %v4206_v42 = vpop.eup %4205 }
 0x388   : > { %v1725_v60 = vmul.f32 %v4206_v42, %v1724_v53 }
 0x38a   : > { %v5480_v6 = vadd.f32 %v1726_v36, %v1725_v60 }
 0x38b   : > { %v4208_v15 = vpop.eup %4207 }
 0x38c   : > { %2862 = vst [vmem:[%s5101_s10 + $0x8] sm:$0xff] %v5480_v6  ;;  %v1877_v19 = vadd.f32 1.0, %v4208_v15  ;;  %1972 = vmatmul.mubr.f32.vlgmr.msra.gmra.mrb[4].mxu0 %v5480_v6  ;;  %3315 = vmatmul.mubr.f32.vlgmr.msra.gmra.mrb[16].mxu1 %v5480_v6  ;;  %v4210_v8 = vpop.eup %4209 }
 0x38d   : > { %3833 = vmatpush1.bf16.msra.mxu0 %v5205_v49  ;;  %3864 = vmatpush3.bf16.msra.mxu1 %v5233_v21  ;;  %v1884_v18 = vadd.f32 1.0, %v4210_v8 }
 0x38e   : > { %4211 = vrcp.f32 %v1877_v19  ;;  %3835 = vmatprep.subr.bf16.mxu0 %v5208_v51  ;;  %3865 = vmatprep.subr.bf16.mxu1 %v5889_v26 }
 0x38f   : > { %2138 = vmatprep.mubr.f32.mxu0 %v5890_v47  ;;  %3349 = vmatprep.mubr.msk.f32.mxu1 %vm4640_vm0, %v5890_v47  ;;  %4213 = vrcp.f32 %v1884_v18 }
 0x391   : > { %3837 = vmatpush1.bf16.msra.mxu0 %v5216_v63  ;;  %3867 = vmatpush3.bf16.msra.mxu1 %v5244_v38 }
 0x392   : > { %3839 = vmatprep.subr.bf16.mxu0 %v5220_v0  ;;  %3868 = vmatprep.subr.bf16.mxu1 %v5889_v26 }
 0x395   : > { %3841 = vmatpush1.bf16.msra.mxu0 %v5227_v13  ;;  %3870 = vmatpush3.bf16.msra.mxu1 %v5256_v58 }
 0x396   : > { %3843 = vmatprep.subr.bf16.mxu0 %v5230_v14  ;;  %3871 = vmatprep.subr.bf16.mxu1 %v5889_v26 }
 0x398   : > { %v4212_v25 = vpop.eup %4211 }
 0x399   : > { %v1888_v9 = vmul.f32 %v4212_v25, %v1887_v2  ;;  %3845 = vmatpush1.bf16.msra.mxu0 %v5237_v28  ;;  %3873 = vmatpush3.bf16.msra.mxu1 %v5266_v17  ;;  %v4214_v40 = vpop.eup %4213 }
 0x39a   : > { %3847 = vmatprep.subr.bf16.mxu0 %v5241_v29  ;;  %3874 = vmatprep.subr.bf16.mxu1 %v5889_v26  ;;  %v1891_v12 = vsub.f32 1.0, %v4214_v40  ;;  %v1893_v53 = vmul.f32 %v4214_v40, %v5430_v55 }
 0x39b   : > { %v1889_v31 = vadd.f32 %v1888_v9, %v5904_v56 }
 0x39d   : > { %4215 = vtanh.f32 %v1889_v31  ;;  %3849 = vmatpush1.bf16.msra.mxu0 %v5250_v45  ;;  %3876 = vmatpush3.bf16.msra.mxu1 %v5276_v35  ;;  %v5916_v31 = vld [vmem:[#allocation43_spill] sm:$0xff] }
 0x39e   : > { %3851 = vmatprep.subr.bf16.mxu0 %v5253_v46  ;;  %3877 = vmatprep.subr.bf16.mxu1 %v5889_v26 }
 0x3a1   : > { %3853 = vmatpush1.bf16.msra.mxu0 %v5260_v3  ;;  %3879 = vmatpush3.bf16.msra.mxu1 %v5284_v52 }
 0x3a2   : > { %3855 = vmatprep.subr.bf16.mxu0 %v5263_v4  ;;  %3880 = vmatprep.subr.bf16.mxu1 %v5889_v26 }
 0x3a5   : > { %3857 = vmatpush1.bf16.msra.mxu0 %v5270_v23  ;;  %3882 = vmatpush3.bf16.msra.mxu1 %v5291_v62 }
 0x3a6   : > { %3859 = vmatprep.subr.bf16.mxu0 %v5273_v27  ;;  %3883 = vmatprep.subr.bf16.mxu1 %v5889_v26 }
 0x3a7   : > { %v4216_v22 = vpop.eup %4215 }
 0x3a8   : > { %v1892_v16 = vmul.f32 %v4216_v22, %v1891_v12 }
 0x3a9   : > { %3861 = vmatpush1.bf16.msra.mxu0 %v5280_v44  ;;  %3885 = vmatpush3.bf16.msra.mxu1 %v5299_v10 }
 0x3aa   : > { %v5522_v42 = vadd.f32 %v1893_v53, %v1892_v16  ;;  %3887 = vmatprep.subr.bf16.mxu0 %v5121_v24  ;;  %3918 = vmatprep.subr.bf16.mxu1 %v5889_v26  ;;  %v5905_v24 = vld [vmem:[#allocation31_spill] sm:$0xff] }
 0x3ac   : > { %2863 = vst [vmem:[%s5103_s13 + $0x10] sm:$0xff] %v5522_v42  ;;  %2139 = vmatmul.mubr.f32.vlgmr.msra.gmra.mrb[10].mxu0 %v5522_v42  ;;  %3350 = vmatmul.mubr.f32.vlgmr.msra.gmra.mrb[18].mxu1 %v5522_v42 }
 0x3ad   : > { %3889 = vmatpush1.bf16.msra.mxu0 %v5123_v32  ;;  %3920 = vmatpush3.bf16.msra.mxu1 %v5144_v54  ;;  %v5906_v32 = vld [vmem:[#allocation32_spill] sm:$0xff] }
 0x3ae   : > { %3891 = vmatprep.subr.bf16.mxu0 %v5126_v33  ;;  %3921 = vmatprep.subr.bf16.mxu1 %v5889_v26  ;;  %v5907_v33 = vld [vmem:[#allocation38_spill] sm:$0xff]  ;;  %v5912_v54 = vld [vmem:[#allocation36_spill] sm:$0xff] }
 0x3af   : > { %2313 = vmatprep.mubr.f32.mxu0 %v5890_v47  ;;  %3384 = vmatprep.mubr.msk.f32.mxu1 %vm4640_vm0, %v5890_v47 }
 0x3b1   : > { %3893 = vmatpush1.bf16.msra.mxu0 %v5129_v39  ;;  %3923 = vmatpush3.bf16.msra.mxu1 %v5155_v1  ;;  %v5908_v39 = vld [vmem:[#allocation33_spill] sm:$0xff] }
 0x3b2   : > { %3895 = vmatprep.subr.bf16.mxu0 %v5134_v41  ;;  %3924 = vmatprep.subr.bf16.mxu1 %v5889_v26  ;;  %v5909_v41 = vld [vmem:[#allocation34_spill] sm:$0xff] }
 0x3b5   : > { %3897 = vmatpush1.bf16.msra.mxu0 %v5137_v48  ;;  %3926 = vmatpush3.bf16.msra.mxu1 %v5167_v11  ;;  %v5910_v48 = vld [vmem:[#allocation39_spill] sm:$0xff] }
 0x3b6   : > { %3899 = vmatprep.subr.bf16.mxu0 %v5142_v50  ;;  %3927 = vmatprep.subr.bf16.mxu1 %v5889_v26  ;;  %v5911_v50 = vld [vmem:[#allocation35_spill] sm:$0xff] }
 0x3b7   : > { %v5915_v11 = vld [vmem:[#allocation47_spill] sm:$0xff] }
 0x3b9   : > { %3901 = vmatpush1.bf16.msra.mxu0 %v5148_v59  ;;  %3929 = vmatpush3.bf16.msra.mxu1 %v5179_v20  ;;  %v5913_v59 = vld [vmem:[#allocation40_spill] sm:$0xff] }
 0x3ba   : > { %3903 = vmatprep.subr.bf16.mxu0 %v5152_v61  ;;  %3930 = vmatprep.subr.bf16.mxu1 %v5889_v26  ;;  %v5914_v61 = vld [vmem:[#allocation37_spill] sm:$0xff] }
 0x3bd   : > { %3905 = vmatpush1.bf16.msra.mxu0 %v5160_v5  ;;  %3932 = vmatpush3.bf16.msra.mxu1 %v5189_v30 }
 0x3be   : > { %3907 = vmatprep.subr.bf16.mxu0 %v5905_v24  ;;  %3933 = vmatprep.subr.bf16.mxu1 %v5889_v26 }
 0x3c1   : > { %3909 = vmatpush1.bf16.msra.mxu0 %v5906_v32  ;;  %3935 = vmatpush3.bf16.msra.mxu1 %v5907_v33 }
 0x3c2   : > { %3911 = vmatprep.subr.bf16.mxu0 %v5908_v39  ;;  %3936 = vmatprep.subr.bf16.mxu1 %v5889_v26 }
 0x3c5   : > { %3913 = vmatpush1.bf16.msra.mxu0 %v5909_v41  ;;  %3938 = vmatpush3.bf16.msra.mxu1 %v5910_v48 }
 0x3c6   : > { %3915 = vmatprep.subr.bf16.mxu0 %v5911_v50  ;;  %3939 = vmatprep.subr.bf16.mxu1 %v5889_v26 }
 0x3c9   : > { %3917 = vmatpush1.bf16.msra.mxu0 %v5912_v54  ;;  %3941 = vmatpush3.bf16.msra.mxu1 %v5913_v59 }
 0x3ca   : > { %3943 = vmatprep.subr.bf16.mxu0 %v5914_v61  ;;  %3974 = vmatprep.subr.bf16.mxu1 %v5889_v26 }
 0x45f   : > { %v1973_v1 = vpop.f32.mrb[4].mxu0  ;;  %v2044_v5 = vpop.f32.mrb[16].mxu1 }
 0x460   : > { %v4002_v20 = vadd.f32 %v1973_v1, %v5915_v11  ;;  %v1975_v30 = vpop.f32.mrb[5].mxu0  ;;  %v3316_v55 = vpop.f32.mrb[17].mxu1  ;;  %v2062_v25 = vadd.f32 %v5902_v34, %v2044_v5 }
 0x461   : > { %v4003_v36 = vadd.f32 %v1975_v30, %v5901_v43  ;;  %v5918_v30 = vld [vmem:[#allocation42_spill] sm:$0xff] }
 0x462   : > { %v2864_v60 = vmul.f32 -1.442695, %v4002_v20 }
 0x463   : > { %v2865_v15 = vmul.f32 -1.442695, %v4003_v36 }
 0x464   : > { %4217 = vpow2.f32 %v2864_v60 }
 0x465   : > { %4219 = vpow2.f32 %v2865_v15 }
 0x46e   : > { %v4218_v19 = vpop.eup %4217 }
 0x46f   : > { %v2052_v8 = vadd.f32 1.0, %v4218_v19  ;;  %v4220_v18 = vpop.eup %4219 }
 0x470   : > { %v2059_v2 = vadd.f32 1.0, %v4220_v18 }
 0x471   : > { %4221 = vrcp.f32 %v2052_v8 }
 0x472   : > { %4223 = vrcp.f32 %v2059_v2 }
 0x47b   : > { %v4222_v9 = vpop.eup %4221 }
 0x47c   : > { %v2063_v56 = vmul.f32 %v4222_v9, %v2062_v25  ;;  %v4224_v39 = vpop.eup %4223 }
 0x47d   : > { %v2066_v48 = vsub.f32 1.0, %v4224_v39  ;;  %v2068_v59 = vmul.f32 %v4224_v39, %v5480_v6 }
 0x47e   : > { %v2064_v40 = vadd.f32 %v2063_v56, %v5916_v31 }
 0x47f   : > { %v2140_v12 = vpop.f32.mrb[10].mxu0  ;;  %v2211_v22 = vpop.f32.mrb[18].mxu1 }
 0x480   : > { %4225 = vtanh.f32 %v2064_v40  ;;  %v4008_v16 = vadd.f32 %v2140_v12, %v5375_v57  ;;  %v2142_v53 = vpop.f32.mrb[11].mxu0  ;;  %v3351_v24 = vpop.f32.mrb[19].mxu1 }
 0x481   : > { %v4009_v33 = vadd.f32 %v2142_v53, %v5377_v7  ;;  %v5919_v24 = vld [vmem:[#allocation45_spill] sm:$0xff] }
 0x482   : > { %v2866_v32 = vmul.f32 -1.442695, %v4008_v16 }
 0x483   : > { %v2867_v41 = vmul.f32 -1.442695, %v4009_v33 }
 0x484   : > { %4227 = vpow2.f32 %v2866_v32 }
 0x485   : > { %4229 = vpow2.f32 %v2867_v41 }
 0x48a   : > { %v4226_v50 = vpop.eup %4225 }
 0x48b   : > { %v2067_v54 = vmul.f32 %v4226_v50, %v2066_v48 }
 0x48d   : > { %v5572_v61 = vadd.f32 %v2068_v59, %v2067_v54 }
 0x48e   : > { %v4228_v1 = vpop.eup %4227 }
 0x48f   : > { %2868 = vst [vmem:[%s5101_s10 + $0x10] sm:$0xff] %v5572_v61  ;;  %v2219_v5 = vadd.f32 1.0, %v4228_v1  ;;  %2314 = vmatmul.mubr.f32.vlgmr.msra.gmra.mrb[6].mxu0 %v5572_v61  ;;  %3385 = vmatmul.mubr.f32.vlgmr.msra.gmra.mrb[20].mxu1 %v5572_v61  ;;  %v4230_v6 = vpop.eup %4229 }
 0x490   : > { %3945 = vmatpush1.bf16.msra.mxu0 %v5205_v49  ;;  %3976 = vmatpush3.bf16.msra.mxu1 %v5233_v21  ;;  %v2226_v49 = vadd.f32 1.0, %v4230_v6 }
 0x491   : > { %4231 = vrcp.f32 %v2219_v5  ;;  %3947 = vmatprep.subr.bf16.mxu0 %v5208_v51  ;;  %3977 = vmatprep.subr.bf16.mxu1 %v5889_v26  ;;  %v2229_v51 = vadd.f32 %v5400_v37, %v2211_v22 }
 0x492   : > { %2479 = vmatprep.mubr.f32.mxu0 %v5890_v47  ;;  %3419 = vmatprep.mubr.msk.f32.mxu1 %vm4640_vm0, %v5890_v47  ;;  %4233 = vrcp.f32 %v2226_v49 }
 0x494   : > { %3949 = vmatpush1.bf16.msra.mxu0 %v5216_v63  ;;  %3979 = vmatpush3.bf16.msra.mxu1 %v5244_v38 }
 0x495   : > { %3951 = vmatprep.subr.bf16.mxu0 %v5220_v0  ;;  %3980 = vmatprep.subr.bf16.mxu1 %v5889_v26  ;;  %v5917_v0 = vld [vmem:[#allocation44_spill] sm:$0xff] }
 0x498   : > { %3953 = vmatpush1.bf16.msra.mxu0 %v5227_v13  ;;  %3982 = vmatpush3.bf16.msra.mxu1 %v5256_v58 }
 0x499   : > { %3955 = vmatprep.subr.bf16.mxu0 %v5230_v14  ;;  %3983 = vmatprep.subr.bf16.mxu1 %v5889_v26 }
 0x49b   : > { %v4232_v21 = vpop.eup %4231 }
 0x49c   : > { %v2230_v63 = vmul.f32 %v4232_v21, %v2229_v51  ;;  %3957 = vmatpush1.bf16.msra.mxu0 %v5237_v28  ;;  %3985 = vmatpush3.bf16.msra.mxu1 %v5266_v17  ;;  %v4234_v14 = vpop.eup %4233 }
 0x49d   : > { %3959 = vmatprep.subr.bf16.mxu0 %v5241_v29  ;;  %3986 = vmatprep.subr.bf16.mxu1 %v5889_v26  ;;  %v2233_v28 = vsub.f32 1.0, %v4234_v14 }
 0x49e   : > { %v2231_v13 = vadd.f32 %v2230_v63, %v5917_v0 }
 0x4a0   : > { %4235 = vtanh.f32 %v2231_v13  ;;  %3961 = vmatpush1.bf16.msra.mxu0 %v5250_v45  ;;  %3988 = vmatpush3.bf16.msra.mxu1 %v5276_v35  ;;  %v2235_v45 = vmul.f32 %v4234_v14, %v5522_v42 }
 0x4a1   : > { %3963 = vmatprep.subr.bf16.mxu0 %v5253_v46  ;;  %3989 = vmatprep.subr.bf16.mxu1 %v5889_v26 }
 0x4a4   : > { %3965 = vmatpush1.bf16.msra.mxu0 %v5260_v3  ;;  %3991 = vmatpush3.bf16.msra.mxu1 %v5284_v52 }
 0x4a5   : > { %3967 = vmatprep.subr.bf16.mxu0 %v5263_v4  ;;  %3992 = vmatprep.subr.bf16.mxu1 %v5889_v26 }
 0x4a8   : > { %3969 = vmatpush1.bf16.msra.mxu0 %v5270_v23  ;;  %3994 = vmatpush3.bf16.msra.mxu1 %v5291_v62 }
 0x4a9   : > { %3971 = vmatprep.subr.bf16.mxu0 %v5273_v27  ;;  %3995 = vmatprep.subr.bf16.mxu1 %v5889_v26 }
 0x4aa   : > { %v4236_v29 = vpop.eup %4235 }
 0x4ab   : > { %v2234_v38 = vmul.f32 %v4236_v29, %v2233_v28 }
 0x4ac   : > { %3973 = vmatpush1.bf16.msra.mxu0 %v5280_v44  ;;  %3997 = vmatpush3.bf16.msra.mxu1 %v5299_v10 }
 0x4ad   : > { %v2236_v46 = vadd.f32 %v2235_v45, %v2234_v38 }
 0x4af   : > { %2869 = vst [vmem:[%s5103_s13 + $0x8] sm:$0xff] %v2236_v46  ;;  %2480 = vmatmul.mubr.f32.vlgmr.msra.gmra.mrb[8].mxu0 %v2236_v46  ;;  %3420 = vmatmul.mubr.f32.vlgmr.msra.gmra.mrb[22].mxu1 %v2236_v46 }
 0x562   : > { %v2315_v58 = vpop.f32.mrb[6].mxu0  ;;  %v2386_v3 = vpop.f32.mrb[20].mxu1 }
 0x563   : > { %v4004_v4 = vadd.f32 %v2315_v58, %v5915_v11  ;;  %v2317_v17 = vpop.f32.mrb[7].mxu0  ;;  %v3386_v23 = vpop.f32.mrb[21].mxu1  ;;  %v2404_v47 = vadd.f32 %v5902_v34, %v2386_v3 }
 0x564   : > { %v4005_v35 = vadd.f32 %v2317_v17, %v5901_v43 }
 0x565   : > { %v2870_v27 = vmul.f32 -1.442695, %v4004_v4 }
 0x566   : > { %v2871_v52 = vmul.f32 -1.442695, %v4005_v35 }
 0x567   : > { %4237 = vpow2.f32 %v2870_v27 }
 0x568   : > { %4239 = vpow2.f32 %v2871_v52 }
 0x571   : > { %v4238_v62 = vpop.eup %4237 }
 0x572   : > { %v2394_v44 = vadd.f32 1.0, %v4238_v62  ;;  %v4240_v10 = vpop.eup %4239 }
 0x573   : > { %v2401_v26 = vadd.f32 1.0, %v4240_v10 }
 0x574   : > { %4241 = vrcp.f32 %v2394_v44 }
 0x575   : > { %4243 = vrcp.f32 %v2401_v26 }
 0x57e   : > { %v4242_v42 = vpop.eup %4241 }
 0x57f   : > { %v2405_v20 = vmul.f32 %v4242_v42, %v2404_v47  ;;  %v4244_v18 = vpop.eup %4243 }
 0x580   : > { %v2408_v34 = vsub.f32 1.0, %v4244_v18  ;;  %v2410_v56 = vmul.f32 %v4244_v18, %v5572_v61 }
 0x581   : > { %v2406_v11 = vadd.f32 %v2405_v20, %v5918_v30 }
 0x582   : > { %v2481_v55 = vpop.f32.mrb[8].mxu0  ;;  %v2552_v60 = vpop.f32.mrb[22].mxu1 }
 0x583   : > { %4245 = vtanh.f32 %v2406_v11  ;;  %v4006_v43 = vadd.f32 %v2481_v55, %v5375_v57  ;;  %v2483_v36 = vpop.f32.mrb[9].mxu0  ;;  %v3421_v15 = vpop.f32.mrb[23].mxu1 }
 0x584   : > { %v4007_v8 = vadd.f32 %v2483_v36, %v5377_v7  ;;  %v2570_v7 = vadd.f32 %v5400_v37, %v2552_v60 }
 0x585   : > { %v2872_v19 = vmul.f32 -1.442695, %v4006_v43 }
 0x586   : > { %v2873_v2 = vmul.f32 -1.442695, %v4007_v8 }
 0x587   : > { %4247 = vpow2.f32 %v2872_v19 }
 0x588   : > { %4249 = vpow2.f32 %v2873_v2 }
 0x58d   : > { %v4246_v25 = vpop.eup %4245 }
 0x58e   : > { %v2409_v9 = vmul.f32 %v4246_v25, %v2408_v34 }
 0x590   : > { %v2411_v31 = vadd.f32 %v2410_v56, %v2409_v9 }
 0x591   : > { %v4248_v40 = vpop.eup %4247 }
 0x592   : > { %2578 = vst [vmem:[#allocation2] sm:$0xff] %v2411_v31  ;;  %2874 = vst [vmem:[%s5101_s10 + $0x18] sm:$0xff] %v2411_v31  ;;  %v2560_v57 = vadd.f32 1.0, %v4248_v40  ;;  %v4250_v12 = vpop.eup %4249 }
 0x593   : > { %v2567_v22 = vadd.f32 1.0, %v4250_v12 }
 0x594   : > { %4251 = vrcp.f32 %v2560_v57 }
 0x595   : > { %4253 = vrcp.f32 %v2567_v22 }
 0x599   : > { %v2587_v59 = vld [vmem:[#allocation2] sm:$0xff] (!%p2875_p12) }
 0x59a   : > { %2588 = vst [vmem:[#allocation21] sm:$0xff] (!%p2875_p12), %v2587_v59 }
 0x59e   : > { %v4252_v16 = vpop.eup %4251 }
 0x59f   : > { %v2571_v53 = vmul.f32 %v4252_v16, %v2570_v7  ;;  %v4254_v33 = vpop.eup %4253 }
 0x5a0   : > { %v2574_v39 = vsub.f32 1.0, %v4254_v33  ;;  %v2576_v50 = vmul.f32 %v4254_v33, %v2236_v46 }
 0x5a1   : > { %v2572_v32 = vadd.f32 %v2571_v53, %v5919_v24 }
 0x5a3   : > { %4255 = vtanh.f32 %v2572_v32 }
 0x5ac   : > { %2586 = sbr.rel (%p2875_p12) target bundleno = 1467 (0x5bb), region = 100 }
 0x5ad   : > { %v4256_v41 = vpop.eup %4255 }
 0x5ae   : > { %v2575_v48 = vmul.f32 %v4256_v41, %v2574_v39 }
 0x5b0   : > { %v2577_v54 = vadd.f32 %v2576_v50, %v2575_v48 }
 0x5b2   : > { %2579 = vst [vmem:[#allocation3] sm:$0xff] %v2577_v54  ;;  %2582 = vst [vmem:[%s5103_s13] sm:$0xff] %v2577_v54 }
 0x5b9   : > { %v2589_v61 = vld [vmem:[#allocation3] sm:$0xff] }
 0x5ba   : > { %2591 = vst [vmem:[#allocation21 + $0x8] sm:$0xff] %v2589_v61 }
 0x5bb PF: > { %s2621_s25 = ssub.s32 1, %s4752_s17  ;;  %s2628_s0 = sshll.u32 %s5103_s13, 4  ;;  %s5634_s0 = int_to_ptr.vmem [resolvable:$true] %s2628_s0 }
 0x5bc   : > { %s2889_s18 = sshll.u32 %s2621_s25, 9  ;;  %s5920_s4 = sld [smem:[#allocation61_spill]] }
 0x5bd   : > { %s5638_s23 = scalar_lea.sflag [#allocation20], %s507_s3  ;;  %s4457_s24 = scalar_lea.vmem %s5634_s0, 512 }
 0x5be   : > { %p4458_p2 = scmp.ne.s32.totalorder %s5634_s0, %s4457_s24  ;;  %p5921_p6 = scmp.ne.s32.totalorder %s5852_s16, 0 }
 0x5bf   : > { %s4641_s2 = smov [#allocation19]  }
 0x5c0   : > { %p4459_p8 = pnand %p4458_p2, %p5921_p6  ;;  %s4461_s13 = sshll.u32 %s4641_s2, 4  ;;  %s4462_s13 = int_to_ptr.vmem [resolvable:$false] %s4461_s13 }
 0x5c1   : > { %s4463_s15 = scalar_lea.vmem %s4462_s13, 1024  ;;  %p4464_p1 = scmp.lt.s32.totalorder %s5634_s0, %s4462_s13 }
 0x5c2   : > { %s5632_s7 = scalar_lea.hbm %s5920_s4, %s2889_s18  ;;  %p4460_p10 = pneg %p4459_p8 }
 0x5c3   : > { %p4465_p9 = scmp.lt.s32.totalorder %s4463_s15, %s4457_s24 }
 0x5c5   : > { %p4466_p13 = por %p4465_p9, %p4464_p1 }
 0x5c7   : > { %p4467_p11 = pnand %p4466_p13, %p4460_p10 }
 0x5c9   : > { %4470 = shalt.err (!%p4467_p11)
}
 0x5ca   : > { %s4471_s3 = scalar_lea.hbm %s5632_s7, 512  ;;  %s4475_s22 = scalar_lea.hbm %s5920_s4, 1024 }
 0x5cb   : > { %p4472_p7 = scmp.ne.s32.totalorder %s5632_s7, %s4471_s3  ;;  %p4476_p0 = scmp.lt.u32.totalorder %s5632_s7, %s5920_s4 }
 0x5cc   : > { %p4477_p4 = scmp.lt.u32.totalorder %s4475_s22, %s4471_s3  ;;  %p4479_p2 = scmp.lt.u32.totalorder %s4471_s3, %s5632_s7 }
 0x5cd   : > { %p4473_p5 = pnand %p4472_p7, %p5921_p6 }
 0x5ce   : > { %p4478_p12 = por %p4477_p4, %p4476_p0 }
 0x5cf   : > { %p4474_p3 = pneg %p4473_p5 }
 0x5d0   : > { %p4480_p8 = por %p4479_p2, %p4478_p12 }
 0x5d2   : > { %p4481_p10 = pnand %p4480_p8, %p4474_p3 }
 0x5d4   : > { %4484 = shalt.err (!%p4481_p10)
}
 0x5d5   : > { %s4642_s24 = smov 128   ;;  %s4643_s13 = smov 8  }
 0x5d6   : > { %4055 = dma.vmem_to_hbm [thread:$0]  (%p5921_p6), %s5634_s0, 512, %s5632_s7, %s5638_s23, %s4642_s24, %s4642_s24, %s4643_s13  }
 0x5d7   : > { %s2888_s15 = sshll.u32 %s4752_s17, 9  ;;  %s5922_s18 = sld [smem:[#allocation60_spill]] }
 0x5d8   : > { %s2611_s11 = sshll.u32 %s5101_s10, 4  ;;  %s2593_s2 = scalar_lea.sflag [#allocation8], %s5069_s12  ;;  %s5672_s11 = int_to_ptr.vmem [resolvable:$true] %s2611_s11 }
 0x5d9   : > { %s4485_s1 = scalar_lea.vmem %s5672_s11, 512  ;;  %p5923_p9 = scmp.ne.s32.totalorder %s5842_s6, 0 }
 0x5da   : > { %p4486_p1 = scmp.ne.s32.totalorder %s5672_s11, %s4485_s1  ;;  %s4644_s16 = smov [#allocation18]  }
 0x5db   : > { %s4489_s0 = sshll.u32 %s4644_s16, 4  ;;  %s4490_s0 = int_to_ptr.vmem [resolvable:$false] %s4489_s0 }
 0x5dc   : > { %p4487_p13 = pnand %p4486_p1, %p5923_p9  ;;  %s4491_s7 = scalar_lea.vmem %s4490_s0, 1024 }
 0x5dd   : > { %s5669_s22 = scalar_lea.hbm %s5922_s18, %s2888_s15  ;;  %p4492_p6 = scmp.lt.s32.totalorder %s5672_s11, %s4490_s0 }
 0x5de   : > { %p4488_p11 = pneg %p4487_p13  ;;  %p4493_p7 = scmp.lt.s32.totalorder %s4491_s7, %s4485_s1 }
 0x5e0   : > { %p4494_p5 = por %p4493_p7, %p4492_p6 }
 0x5e2   : > { %p4495_p3 = pnand %p4494_p5, %p4488_p11 }
 0x5e4   : > { %4498 = shalt.err (!%p4495_p3)
}
 0x5e5   : > { %s4499_s10 = scalar_lea.hbm %s5669_s22, 512  ;;  %s4503_s3 = scalar_lea.hbm %s5922_s18, 1024 }
 0x5e6   : > { %p4500_p0 = scmp.ne.s32.totalorder %s5669_s22, %s4499_s10  ;;  %p4504_p2 = scmp.lt.u32.totalorder %s5669_s22, %s5922_s18 }
 0x5e7   : > { %p4505_p8 = scmp.lt.u32.totalorder %s4503_s3, %s4499_s10  ;;  %p4507_p1 = scmp.lt.u32.totalorder %s4499_s10, %s5669_s22 }
 0x5e8   : > { %p4501_p4 = pnand %p4500_p0, %p5923_p9 }
 0x5e9   : > { %p4506_p10 = por %p4505_p8, %p4504_p2 }
 0x5ea   : > { %p4502_p12 = pneg %p4501_p4 }
 0x5eb   : > { %p4508_p13 = por %p4507_p1, %p4506_p10 }
 0x5ed   : > { %p4509_p11 = pnand %p4508_p13, %p4502_p12 }
 0x5ef   : > { %4512 = shalt.err (!%p4509_p11)
}
 0x5f0   : > { %4054 = dma.vmem_to_hbm [thread:$0]  (%p5923_p9), %s5672_s11, 512, %s5669_s22, %s2593_s2, %s4642_s24, %s4642_s24, %s4643_s13  }
 0x5f1   : > { %s4645_s1 = smov [#allocation21]   ;;  %p5924_p7 = scmp.eq.s32.totalorder %s4752_s17, 1 }
 0x5f2   : > { %s2641_s0 = sshll.u32 %s4645_s1, 4  ;;  %s2642_s0 = int_to_ptr.vmem [resolvable:$true] %s2641_s0 }
 0x5f3   : > { %s4513_s7 = scalar_lea.vmem %s2642_s0, 256  ;;  %p4520_p0 = scmp.lt.s32.totalorder %s2642_s0, %s2642_s0 }
 0x5f4   : > { %p4514_p6 = scmp.ne.s32.totalorder %s2642_s0, %s4513_s7  ;;  %p4521_p4 = scmp.lt.s32.totalorder %s4513_s7, %s4513_s7 }
 0x5f6   : > { %p4515_p5 = pnand %p4514_p6, %p5924_p7  ;;  %p4522_p12 = por %p4521_p4, %p4520_p0 }
 0x5f8   : > { %p4516_p3 = pneg %p4515_p5 }
 0x5fa   : > { %p4523_p2 = pnand %p4522_p12, %p4516_p3 }
 0x5fc   : > { %4526 = shalt.err (!%p4523_p2)
}
 0x5fd   : > { %s5925_s12 = sld [smem:[#allocation62_spill]]  ;;  %p5926_p8 = pmov %p5924_p7 }
 0x603   : > { %s4527_s23 = scalar_lea.hbm %s5925_s12, 256 }
 0x604   : > { %p4528_p9 = scmp.ne.s32.totalorder %s5925_s12, %s4527_s23  ;;  %p4533_p13 = scmp.lt.u32.totalorder %s4527_s23, %s5925_s12 }
 0x606   : > { %p4529_p10 = pnand %p4528_p9, %p5926_p8 }
 0x608   : > { %p4530_p1 = pneg %p4529_p10 }
 0x60a   : > { %p4535_p11 = pnand %p4533_p13, %p4530_p1 }
 0x60c   : > { %4538 = shalt.err (!%p4535_p11)
}
 0x60d   : > { %p5927_p6 = pmov %p5924_p7 }
 0x60f   : > { %4057 = dma.vmem_to_hbm [thread:$0]  (%p5927_p6), %s2642_s0, 256, %s5925_s12, [#allocation20], %s4642_s24, %s4642_s24, %s4643_s13  }
 0x610   : > { %p5928_p7 = pmov %p5927_p6 }
 0x611   : > { %p5929_p5 = pmov %p5927_p6 }
 0x612   : > { %4588 = dma.done.wait (%p5928_p7), [#allocation20], 256  }
 0x613   : > { %4590 = vsyncadd (%p5929_p5), [#allocation20], 4294967040 }
 0x614 PF: > { %s2660_s16 = sand.u32 1, %s4613_s28   ;;  %p5930_p3 = scmp.ne.s32.totalorder %s5843_s5, 0 }
 0x615   : > { %p5931_p0 = scmp.ge.s32.totalorder %s4625_s14, 2  ;;  %s2661_s1 = scalar_lea.sflag [#allocation8], %s2660_s16 }
 0x617   : > { %p4086_p4 = pnand %p5931_p0, %p5930_p3 }
 0x619   : > { %4592 = dma.done.wait (!%p4086_p4), %s2661_s1, 512  }
 0x61a   : > { %4594 = vsyncadd (!%p4086_p4), %s2661_s1, 4294966784  ;;  %s5932_s7 = sadd.s32 4294967294, %s4625_s14   ;;  %p5933_p12 = scmp.ne.s32.totalorder %s5853_s19, 0 }
 0x61b   : > { %s2669_s24 = sand.u32 1, %s5932_s7   ;;  %p5934_p2 = pmov %p5931_p0 }
 0x61c   : > { %s2670_s17 = scalar_lea.sflag [#allocation20], %s2669_s24 }
 0x61d   : > { %p4089_p9 = pnand %p5934_p2, %p5933_p12 }
 0x61f   : > { %4596 = dma.done.wait (!%p4089_p9), %s2670_s17, 512  }
 0x620   : > { %4598 = vsyncadd (!%p4089_p9), %s2670_s17, 4294966784  ;;  %p35_p8 = scmp.ge.s32.totalorder %s4981_s20, 4   ;;  %s5935_s25 = smov %s4605_s26 }
 0x621   : > { %s5936_s26 = smov %s4609_s27  ;;  %s5937_s27 = smov %s4999_s9 }
 0x622   : > { %s5938_s28 = smov %s4617_s29  ;;  %s5939_s29 = smov %s4621_s30 }
 0x623   : > { %s5940_s30 = smov %s4991_s21  ;;  %s5941_s14 = smov %s4981_s20 }
 0x624   :  { %37 = sbr.rel (!%p35_p8) target bundleno = 27 (0x1b), region = 189 }
 0x62b   :  { %2675 = vsyncpa [#allocation7], 1 }
 0x62c   :  { %2677 = vsyncpa [#allocation7 + $0x1], 1 }
 0x62d   :  { %2678 = vsyncpa [#allocation10], 1 }
 0x62e   :  { %2680 = vsyncpa [#allocation10 + $0x1], 1 }
 0x62f   :  { %2681 = vsyncpa [#allocation13], 1 }
 0x630   :  { %2682 = vsyncpa [#allocation16], 1 }
 0x631   :  { %2683 = vsyncpa [#allocation8], 1 }
 0x632   :  { %2685 = vsyncpa [#allocation8 + $0x1], 1 }
 0x633   :  { %2686 = vsyncpa [#allocation20], 1 }
 0x634   :  { %2688 = vsyncpa [#allocation20 + $0x1], 1 }

</bundles_post_ra>
